<compile_context>
chip_gen: v6e
topology: v6e:2x2x1
jax: 0.10.0
libtpu: 0.0.40
codegen_flags: <defaults>
</compile_context>

<pallas_src>
import math

import jax
import jax.numpy as jnp
from jax.experimental import pallas as pl
from jax.experimental.pallas import tpu as pltpu

EPS = 1e-5  # nn.BatchNorm2d default eps


# ----------------------------------------------------------------------------
# In-kernel helper: zero-padded im2col conv -> one MXU matmul.
# ----------------------------------------------------------------------------
def _conv_im2col(a2d, pad_ref, slab_ref, w_ref, N, H, W, C, KH, KW, pads):
    """a2d: (N*H*W, C) activated input (f32 value).

    Builds a zero-padded per-sample image in `pad_ref`, gathers the KH*KW tap
    windows into the im2col slab `slab_ref` (N*Ho*Wo, KH*KW*C), and returns
    slab @ w  as an (N*Ho*Wo, Cout) f32 value.
    """
    top, bottom, left, right = pads
    Hp, Wp = H + top + bottom, W + left + right
    Ho, Wo = Hp - KH + 1, Wp - KW + 1
    M = Ho * Wo

    # Zero only the halo strips (the interior is fully overwritten below).
    if top:
        pad_ref[0:top, :, :] = jnp.zeros((top, Wp, C), jnp.float32)
    if bottom:
        pad_ref[top + H:Hp, :, :] = jnp.zeros((bottom, Wp, C), jnp.float32)
    if left:
        pad_ref[:, 0:left, :] = jnp.zeros((Hp, left, C), jnp.float32)
    if right:
        pad_ref[:, left + W:Wp, :] = jnp.zeros((Hp, right, C), jnp.float32)

    for n in range(N):  # static unroll; batch is tiny and fully fused
        pad_ref[top:top + H, left:left + W, :] = (
            a2d[n * H * W:(n + 1) * H * W].reshape(H, W, C))
        for ki in range(KH):
            for kj in range(KW):
                t = ki * KW + kj
                win = pad_ref[ki:ki + Ho, kj:kj + Wo, :]
                slab_ref[n * M:(n + 1) * M, t * C:(t + 1) * C] = win.reshape(M, C)

    # One matmul per conv (contraction K = KH*KW*C) instead of KH*KW tiny ones.
    return jnp.dot(slab_ref[...], w_ref[...], preferred_element_type=jnp.float32)


# ----------------------------------------------------------------------------
# Fused block-group kernel factory.
# ----------------------------------------------------------------------------
def _make_group_kernel(N, blocks):
    n_params = sum(b["n_params"] for b in blocks)
    n_in = 1 + n_params  # x + all per-block params

    def kernel(*refs):
        x_ref = refs[0]
        params = refs[1:n_in]
        o_ref = refs[n_in]
        scr = refs[n_in + 1:]

        cur = x_ref[...].astype(jnp.float32)  # (N*H0*W0, C0) block input
        pi = 0
        si = 0
        for b in blocks:
            s0 = params[pi][...]
            b0 = params[pi + 1][...]
            w0_ref = params[pi + 2]
            s1 = params[pi + 3][...]
            b1 = params[pi + 4][...]
            w1_ref = params[pi + 5]
            wsc_ref = params[pi + 6] if b["has_shortcut"] else None
            pi += b["n_params"]
            pad0, slab0, pad1, slab1 = scr[si:si + 4]
            si += 4

            # Fused eval-mode BatchNorm (folded affine) + ReLU on conv0 input.
            a0 = jnp.maximum(cur * s0 + b0, 0.0)
            c0 = _conv_im2col(a0, pad0, slab0, w0_ref, N,
                              b["H0"], b["W0"], b["C0"],
                              b["KH0"], b["KW0"], b["pads0"])
            # Fused BN + ReLU on conv1 input; 3x3 stride-1 pad-1 conv.
            a1 = jnp.maximum(c0 * s1 + b1, 0.0)
            c1 = _conv_im2col(a1, pad1, slab1, w1_ref, N,
                              b["Ho"], b["Wo"], b["Cout"], 3, 3, (1, 1, 1, 1))

            if b["has_shortcut"]:
                # 1x1 (strided) shortcut conv on the activated block input.
                # For stride 2 the strided samples are exactly channels
                # [0:Cin] of the space-to-depth activation (no HBM gather).
                sc_in = a0[:, 0:b["Cin"]] if b["stride"] == 2 else a0
                res = jnp.dot(sc_in, wsc_ref[...],
                              preferred_element_type=jnp.float32)
            else:
                res = cur  # identity residual uses the raw block input
            cur = c1 + res

        o_ref[...] = cur.astype(o_ref.dtype)

    return kernel


# ----------------------------------------------------------------------------
# Stride-2 handling: space-to-depth glue (pure layout, same byte count).
# ----------------------------------------------------------------------------
def _space_to_depth(x):
    """(N, H, W, C) -> (N, H//2, W//2, 4C); channel index = (2*ri+rj)*C + c."""
    N, H, W, C = x.shape
    x = x.reshape(N, H // 2, 2, W // 2, 2, C)
    x = jnp.transpose(x, (0, 1, 3, 2, 4, 5))
    return x.reshape(N, H // 2, W // 2, 4 * C)


def _s2d_conv_weights(w):
    """Rewrite a (3,3,C,Co) stride-2 kernel as a (2,2,4C,Co) stride-1 kernel
    acting on the space-to-depth input (ordering matches _space_to_depth)."""
    KH, KW, C, Co = w.shape
    w_eff = jnp.zeros((2, 2, 2, 2, C, Co), w.dtype)  # (di, dj, ri, rj, C, Co)
    for di in range(2):
        for ri in range(2):
            ki = 2 * di + ri
            if ki >= KH:
                continue
            for dj in range(2):
                for rj in range(2):
                    kj = 2 * dj + rj
                    if kj >= KW:
                        continue
                    w_eff = w_eff.at[di, dj, ri, rj].set(w[ki, kj])
    return w_eff.reshape(2, 2, 4 * C, Co)


# ----------------------------------------------------------------------------
# _BlockGroup forward (single pallas_call)
# ----------------------------------------------------------------------------
def _fold_bn(gamma, beta, mean, var):
    scale = gamma / jnp.sqrt(var + EPS)
    bias = beta - mean * scale
    return scale, bias


def block_group_forward(x_nchw, params_list, strides, shortcuts):
    x = jnp.transpose(x_nchw, (0, 2, 3, 1)).astype(jnp.float32)  # NCHW -> NHWC
    N, H, W, C = x.shape

    blocks, args, scratch = [], [], []
    flops = 0
    cur_H, cur_W, cur_C = H, W, C
    x_in = None

    for bi, (p, stride, has_sc) in enumerate(zip(params_list, strides, shortcuts)):
        Cin, Cout = cur_C, p["conv1_w"].shape[-1]
        s0, b0 = _fold_bn(p["bn0_gamma"], p["bn0_beta"], p["bn0_mean"], p["bn0_var"])
        s1, b1 = _fold_bn(p["bn1_gamma"], p["bn1_beta"], p["bn1_mean"], p["bn1_var"])

        if stride == 2:
            if not has_sc:
                raise ValueError("stride-2 block without shortcut not supported")
            # stride-2 3x3 conv == stride-1 2x2 conv over the s2d input;
            # F.pad(relu(bn0(x)), (0,1,0,1)) becomes one zero halo row/col.
            H0, W0, C0 = cur_H // 2, cur_W // 2, 4 * Cin
            KH0 = KW0 = 2
            pads0 = (0, 1, 0, 1)
            s0_eff, b0_eff = jnp.tile(s0, 4), jnp.tile(b0, 4)
            w0 = _s2d_conv_weights(p["conv0_w"]).reshape(KH0 * KW0 * C0, Cout)
        elif stride == 1:
            H0, W0, C0 = cur_H, cur_W, Cin
            KH0 = KW0 = 3
            pads0 = (1, 1, 1, 1)
            s0_eff, b0_eff = s0, b0
            w0 = p["conv0_w"].reshape(9 * Cin, Cout)
        else:
            raise ValueError("Unsupported stride")

        Ho = H0 + pads0[0] + pads0[1] - KH0 + 1
        Wo = W0 + pads0[2] + pads0[3] - KW0 + 1
        M = Ho * Wo

        if bi == 0:
            xb = _space_to_depth(x) if stride == 2 else x
            x_in = xb.reshape(N * H0 * W0, C0)

        bargs = [s0_eff.reshape(1, C0), b0_eff.reshape(1, C0), w0,
                 s1.reshape(1, Cout), b1.reshape(1, Cout),
                 p["conv1_w"].reshape(9 * Cout, Cout)]
        if has_sc:
            bargs.append(p["shortcut_w"].reshape(Cin, Cout))
        args += bargs

        # Per-conv VMEM scratch: padded activation image + im2col slab.
        scratch += [
            pltpu.VMEM((H0 + pads0[0] + pads0[1],
                        W0 + pads0[2] + pads0[3], C0), jnp.float32),
            pltpu.VMEM((N * M, KH0 * KW0 * C0), jnp.float32),
            pltpu.VMEM((Ho + 2, Wo + 2, Cout), jnp.float32),
            pltpu.VMEM((N * M, 9 * Cout), jnp.float32),
        ]

        flops += 2 * N * M * (KH0 * KW0 * C0 + 9 * Cout) * Cout
        if has_sc:
            flops += 2 * N * M * Cin * Cout

        blocks.append(dict(stride=stride, has_shortcut=has_sc, Cin=Cin,
                           Cout=Cout, H0=H0, W0=W0, C0=C0, KH0=KH0, KW0=KW0,
                           pads0=pads0, Ho=Ho, Wo=Wo, n_params=len(bargs)))
        cur_H, cur_W, cur_C = Ho, Wo, Cout

    out_rows, out_cols = N * cur_H * cur_W, cur_C
    kernel = _make_group_kernel(N, blocks)

    nbytes = 4 * (x_in.size + sum(int(a.size) for a in args) + out_rows * out_cols)
    out = pl.pallas_call(
        kernel,
        out_shape=jax.ShapeDtypeStruct((out_rows, out_cols), jnp.float32),
        scratch_shapes=scratch,
        cost_estimate=pl.CostEstimate(flops=int(flops), transcendentals=0,
                                      bytes_accessed=int(nbytes)),
    )(x_in, *args)

    out = out.reshape(N, cur_H, cur_W, cur_C)
    return jnp.transpose(out, (0, 3, 1, 2))  # NHWC -> NCHW


# ----------------------------------------------------------------------------
# Deterministic parameter init (synthetic; no checkpoint)
# ----------------------------------------------------------------------------
def init_block_params(key, in_planes, out_planes, has_shortcut):
    ks = jax.random.split(key, 11)
    f32 = jnp.float32

    def bn(k0, k1, k2, k3, c):
        return dict(
            gamma=jax.random.uniform(k0, (c,), f32, 0.5, 1.5),
            beta=0.1 * jax.random.normal(k1, (c,), f32),
            mean=0.1 * jax.random.normal(k2, (c,), f32),
            var=jax.random.uniform(k3, (c,), f32, 0.5, 1.5),
        )

    bn0 = bn(ks[0], ks[1], ks[2], ks[3], in_planes)
    bn1 = bn(ks[4], ks[5], ks[6], ks[7], out_planes)
    p = {
        "bn0_gamma": bn0["gamma"], "bn0_beta": bn0["beta"],
        "bn0_mean": bn0["mean"], "bn0_var": bn0["var"],
        "bn1_gamma": bn1["gamma"], "bn1_beta": bn1["beta"],
        "bn1_mean": bn1["mean"], "bn1_var": bn1["var"],
        "conv0_w": jax.random.normal(ks[8], (3, 3, in_planes, out_planes), f32)
        * (1.0 / math.sqrt(9 * in_planes)),
        "conv1_w": jax.random.normal(ks[9], (3, 3, out_planes, out_planes), f32)
        * (1.0 / math.sqrt(9 * out_planes)),
    }
    if has_shortcut:
        p["shortcut_w"] = jax.random.normal(
            ks[10], (1, 1, in_planes, out_planes), f32) * (1.0 / math.sqrt(in_planes))
    return p


# ----------------------------------------------------------------------------
# Pure-JAX reference (for correctness check only)
# ----------------------------------------------------------------------------
def _ref_conv(x, w, stride):
    return jax.lax.conv_general_dilated(
        x, w, (stride, stride), "VALID",
        dimension_numbers=("NHWC", "HWIO", "NHWC"))


def ref_block(x, p, stride, has_shortcut):
    s0, b0 = _fold_bn(p["bn0_gamma"], p["bn0_beta"], p["bn0_mean"], p["bn0_var"])
    act = jnp.maximum(x * s0 + b0, 0.0)
    if has_shortcut:
        x = act
    if stride == 1:
        v = jnp.pad(act, ((0, 0), (1, 1), (1, 1), (0, 0)))
    else:
        v = jnp.pad(act, ((0, 0), (0, 1), (0, 1), (0, 0)))
    out = _ref_conv(v, p["conv0_w"], stride)
    s1, b1 = _fold_bn(p["bn1_gamma"], p["bn1_beta"], p["bn1_mean"], p["bn1_var"])
    out = jnp.maximum(out * s1 + b1, 0.0)
    out = _ref_conv(jnp.pad(out, ((0, 0), (1, 1), (1, 1), (0, 0))), p["conv1_w"], 1)
    residual = _ref_conv(x, p["shortcut_w"], stride) if has_shortcut else x
    return residual + out


def ref_block_group(x_nchw, params_list, strides, shortcuts):
    x = jnp.transpose(x_nchw, (0, 2, 3, 1))
    for p, s, sc in zip(params_list, strides, shortcuts):
        x = ref_block(x, p, s, sc)
    return jnp.transpose(x, (0, 3, 1, 2))


# ----------------------------------------------------------------------------
if __name__ == "__main__":
    # _BlockGroup(num_blocks=2, in_planes=4, out_planes=8, stride=2)
    num_blocks, in_planes, out_planes, stride = 2, 4, 8, 2

    key = jax.random.PRNGKey(0)
    kx, *kblocks = jax.random.split(key, num_blocks + 1)

    x = jax.random.normal(kx, (2, 4, 16, 16), jnp.float32)  # NCHW, like PyTorch

    params_list, strides, shortcuts = [], [], []
    for i in range(num_blocks):
        bi_in = in_planes if i == 0 else out_planes
        bi_stride = stride if i == 0 else 1
        has_sc = bi_in != out_planes
        params_list.append(init_block_params(kblocks[i], bi_in, out_planes, has_sc))
        strides.append(bi_stride)
        shortcuts.append(has_sc)

    fwd = jax.jit(lambda xx: block_group_forward(xx, params_list, strides, shortcuts))
    out = jax.block_until_ready(fwd(x))

    ref = jax.block_until_ready(ref_block_group(x, params_list, strides, shortcuts))
    assert out.shape == ref.shape == (2, out_planes, 8, 8), out.shape
    err = float(jnp.max(jnp.abs(out - ref)))
    assert jnp.allclose(out, ref, atol=2e-4, rtol=2e-4), err

    print("KERNEL_OK")
</pallas_src>

<mosaic_0001>
module attributes {stable_mosaic.version = 11 : i64} {
  func.func @kernel(%arg0: memref<128x16xf32, #tpu.memory_space<vmem>>, %arg1: memref<1x16xf32, #tpu.memory_space<vmem>>, %arg2: memref<1x16xf32, #tpu.memory_space<vmem>>, %arg3: memref<64x8xf32, #tpu.memory_space<vmem>>, %arg4: memref<1x8xf32, #tpu.memory_space<vmem>>, %arg5: memref<1x8xf32, #tpu.memory_space<vmem>>, %arg6: memref<72x8xf32, #tpu.memory_space<vmem>>, %arg7: memref<4x8xf32, #tpu.memory_space<vmem>>, %arg8: memref<1x8xf32, #tpu.memory_space<vmem>>, %arg9: memref<1x8xf32, #tpu.memory_space<vmem>>, %arg10: memref<72x8xf32, #tpu.memory_space<vmem>>, %arg11: memref<1x8xf32, #tpu.memory_space<vmem>>, %arg12: memref<1x8xf32, #tpu.memory_space<vmem>>, %arg13: memref<72x8xf32, #tpu.memory_space<vmem>>, %arg14: memref<128x8xf32, #tpu.memory_space<vmem>>, %arg15: memref<9x9x16xf32, #tpu.memory_space<vmem>>, %arg16: memref<128x64xf32, #tpu.memory_space<vmem>>, %arg17: memref<10x10x8xf32, #tpu.memory_space<vmem>>, %arg18: memref<128x72xf32, #tpu.memory_space<vmem>>, %arg19: memref<10x10x8xf32, #tpu.memory_space<vmem>>, %arg20: memref<128x72xf32, #tpu.memory_space<vmem>>, %arg21: memref<10x10x8xf32, #tpu.memory_space<vmem>>, %arg22: memref<128x72xf32, #tpu.memory_space<vmem>>) attributes {dimension_semantics = [], scalar_prefetch = 0 : i64, scratch_operands = 8 : i64, tpu.core_type = #tpu.core_type<tc>} {
    %c0 = arith.constant 0 : index
    %c0_0 = arith.constant 0 : index
    %0 = vector.load %arg0[%c0, %c0_0] : memref<128x16xf32, #tpu.memory_space<vmem>>, vector<128x16xf32>
    %c0_1 = arith.constant 0 : index
    %c0_2 = arith.constant 0 : index
    %1 = vector.load %arg1[%c0_1, %c0_2] : memref<1x16xf32, #tpu.memory_space<vmem>>, vector<1x16xf32>
    %c0_3 = arith.constant 0 : index
    %c0_4 = arith.constant 0 : index
    %2 = vector.load %arg2[%c0_3, %c0_4] : memref<1x16xf32, #tpu.memory_space<vmem>>, vector<1x16xf32>
    %c0_5 = arith.constant 0 : index
    %c0_6 = arith.constant 0 : index
    %3 = vector.load %arg4[%c0_5, %c0_6] : memref<1x8xf32, #tpu.memory_space<vmem>>, vector<1x8xf32>
    %c0_7 = arith.constant 0 : index
    %c0_8 = arith.constant 0 : index
    %4 = vector.load %arg5[%c0_7, %c0_8] : memref<1x8xf32, #tpu.memory_space<vmem>>, vector<1x8xf32>
    %5 = vector.broadcast %1 : vector<1x16xf32> to vector<128x16xf32>
    %6 = arith.mulf %0, %5 : vector<128x16xf32>
    %7 = vector.broadcast %2 : vector<1x16xf32> to vector<128x16xf32>
    %8 = arith.addf %6, %7 : vector<128x16xf32>
    %cst = arith.constant 0.000000e+00 : f32
    %9 = vector.broadcast %cst : f32 to vector<128x16xf32>
    %10 = arith.maximumf %8, %9 : vector<128x16xf32>
    %cst_9 = arith.constant 0.000000e+00 : f32
    %11 = vector.broadcast %cst_9 : f32 to vector<1x9x16xf32>
    %c8 = arith.constant 8 : index
    %c0_10 = arith.constant 0 : index
    %c0_11 = arith.constant 0 : index
    %12 = vector.load %arg15[%c8, %c0_10, %c0_11] : memref<9x9x16xf32, #tpu.memory_space<vmem>>, vector<1x9x16xf32>
    tpu.vector_store %arg15[%c8, %c0_10, %c0_11], %11 {strides = array<i32>} : memref<9x9x16xf32, #tpu.memory_space<vmem>>, vector<1x9x16xf32>,
    %cst_12 = arith.constant 0.000000e+00 : f32
    %13 = vector.broadcast %cst_12 : f32 to vector<9x1x16xf32>
    %c0_13 = arith.constant 0 : index
    %c8_14 = arith.constant 8 : index
    %c0_15 = arith.constant 0 : index
    %14 = vector.load %arg15[%c0_13, %c8_14, %c0_15] : memref<9x9x16xf32, #tpu.memory_space<vmem>>, vector<9x1x16xf32>
    tpu.vector_store %arg15[%c0_13, %c8_14, %c0_15], %13 {strides = array<i32>} : memref<9x9x16xf32, #tpu.memory_space<vmem>>, vector<9x1x16xf32>,
    %15 = vector.extract_strided_slice %10 {offsets = [0, 0], sizes = [64, 16], strides = [1, 1]} : vector<128x16xf32> to vector<64x16xf32>
    %16 = vector.shape_cast %15 : vector<64x16xf32> to vector<8x8x16xf32>
    %c0_16 = arith.constant 0 : index
    %c0_17 = arith.constant 0 : index
    %c0_18 = arith.constant 0 : index
    %17 = vector.load %arg15[%c0_16, %c0_17, %c0_18] : memref<9x9x16xf32, #tpu.memory_space<vmem>>, vector<8x8x16xf32>
    tpu.vector_store %arg15[%c0_16, %c0_17, %c0_18], %16 {strides = array<i32>} : memref<9x9x16xf32, #tpu.memory_space<vmem>>, vector<8x8x16xf32>,
    %c0_19 = arith.constant 0 : index
    %c0_20 = arith.constant 0 : index
    %c0_21 = arith.constant 0 : index
    %18 = vector.load %arg15[%c0_19, %c0_20, %c0_21] : memref<9x9x16xf32, #tpu.memory_space<vmem>>, vector<8x8x16xf32>
    %19 = vector.shape_cast %18 : vector<8x8x16xf32> to vector<64x16xf32>
    %c0_22 = arith.constant 0 : index
    %c0_23 = arith.constant 0 : index
    %20 = vector.load %arg16[%c0_22, %c0_23] : memref<128x64xf32, #tpu.memory_space<vmem>>, vector<64x16xf32>
    tpu.vector_store %arg16[%c0_22, %c0_23], %19 {strides = array<i32>} : memref<128x64xf32, #tpu.memory_space<vmem>>, vector<64x16xf32>,
    %c0_24 = arith.constant 0 : index
    %c1 = arith.constant 1 : index
    %c0_25 = arith.constant 0 : index
    %21 = vector.load %arg15[%c0_24, %c1, %c0_25] : memref<9x9x16xf32, #tpu.memory_space<vmem>>, vector<8x8x16xf32>
    %22 = vector.shape_cast %21 : vector<8x8x16xf32> to vector<64x16xf32>
    %c0_26 = arith.constant 0 : index
    %c16 = arith.constant 16 : index
    %23 = vector.load %arg16[%c0_26, %c16] : memref<128x64xf32, #tpu.memory_space<vmem>>, vector<64x16xf32>
    tpu.vector_store %arg16[%c0_26, %c16], %22 {strides = array<i32>} : memref<128x64xf32, #tpu.memory_space<vmem>>, vector<64x16xf32>,
    %c1_27 = arith.constant 1 : index
    %c0_28 = arith.constant 0 : index
    %c0_29 = arith.constant 0 : index
    %24 = vector.load %arg15[%c1_27, %c0_28, %c0_29] : memref<9x9x16xf32, #tpu.memory_space<vmem>>, vector<8x8x16xf32>
    %25 = vector.shape_cast %24 : vector<8x8x16xf32> to vector<64x16xf32>
    %c0_30 = arith.constant 0 : index
    %c32 = arith.constant 32 : index
    %26 = vector.load %arg16[%c0_30, %c32] : memref<128x64xf32, #tpu.memory_space<vmem>>, vector<64x16xf32>
    tpu.vector_store %arg16[%c0_30, %c32], %25 {strides = array<i32>} : memref<128x64xf32, #tpu.memory_space<vmem>>, vector<64x16xf32>,
    %c1_31 = arith.constant 1 : index
    %c1_32 = arith.constant 1 : index
    %c0_33 = arith.constant 0 : index
    %27 = vector.load %arg15[%c1_31, %c1_32, %c0_33] : memref<9x9x16xf32, #tpu.memory_space<vmem>>, vector<8x8x16xf32>
    %28 = vector.shape_cast %27 : vector<8x8x16xf32> to vector<64x16xf32>
    %c0_34 = arith.constant 0 : index
    %c48 = arith.constant 48 : index
    %29 = vector.load %arg16[%c0_34, %c48] : memref<128x64xf32, #tpu.memory_space<vmem>>, vector<64x16xf32>
    tpu.vector_store %arg16[%c0_34, %c48], %28 {strides = array<i32>} : memref<128x64xf32, #tpu.memory_space<vmem>>, vector<64x16xf32>,
    %30 = vector.extract_strided_slice %10 {offsets = [64, 0], sizes = [64, 16], strides = [1, 1]} : vector<128x16xf32> to vector<64x16xf32>
    %31 = vector.shape_cast %30 : vector<64x16xf32> to vector<8x8x16xf32>
    %c0_35 = arith.constant 0 : index
    %c0_36 = arith.constant 0 : index
    %c0_37 = arith.constant 0 : index
    %32 = vector.load %arg15[%c0_35, %c0_36, %c0_37] : memref<9x9x16xf32, #tpu.memory_space<vmem>>, vector<8x8x16xf32>
    tpu.vector_store %arg15[%c0_35, %c0_36, %c0_37], %31 {strides = array<i32>} : memref<9x9x16xf32, #tpu.memory_space<vmem>>, vector<8x8x16xf32>,
    %c0_38 = arith.constant 0 : index
    %c0_39 = arith.constant 0 : index
    %c0_40 = arith.constant 0 : index
    %33 = vector.load %arg15[%c0_38, %c0_39, %c0_40] : memref<9x9x16xf32, #tpu.memory_space<vmem>>, vector<8x8x16xf32>
    %34 = vector.shape_cast %33 : vector<8x8x16xf32> to vector<64x16xf32>
    %c64 = arith.constant 64 : index
    %c0_41 = arith.constant 0 : index
    %35 = vector.load %arg16[%c64, %c0_41] : memref<128x64xf32, #tpu.memory_space<vmem>>, vector<64x16xf32>
    tpu.vector_store %arg16[%c64, %c0_41], %34 {strides = array<i32>} : memref<128x64xf32, #tpu.memory_space<vmem>>, vector<64x16xf32>,
    %c0_42 = arith.constant 0 : index
    %c1_43 = arith.constant 1 : index
    %c0_44 = arith.constant 0 : index
    %36 = vector.load %arg15[%c0_42, %c1_43, %c0_44] : memref<9x9x16xf32, #tpu.memory_space<vmem>>, vector<8x8x16xf32>
    %37 = vector.shape_cast %36 : vector<8x8x16xf32> to vector<64x16xf32>
    %c64_45 = arith.constant 64 : index
    %c16_46 = arith.constant 16 : index
    %38 = vector.load %arg16[%c64_45, %c16_46] : memref<128x64xf32, #tpu.memory_space<vmem>>, vector<64x16xf32>
    tpu.vector_store %arg16[%c64_45, %c16_46], %37 {strides = array<i32>} : memref<128x64xf32, #tpu.memory_space<vmem>>, vector<64x16xf32>,
    %c1_47 = arith.constant 1 : index
    %c0_48 = arith.constant 0 : index
    %c0_49 = arith.constant 0 : index
    %39 = vector.load %arg15[%c1_47, %c0_48, %c0_49] : memref<9x9x16xf32, #tpu.memory_space<vmem>>, vector<8x8x16xf32>
    %40 = vector.shape_cast %39 : vector<8x8x16xf32> to vector<64x16xf32>
    %c64_50 = arith.constant 64 : index
    %c32_51 = arith.constant 32 : index
    %41 = vector.load %arg16[%c64_50, %c32_51] : memref<128x64xf32, #tpu.memory_space<vmem>>, vector<64x16xf32>
    tpu.vector_store %arg16[%c64_50, %c32_51], %40 {strides = array<i32>} : memref<128x64xf32, #tpu.memory_space<vmem>>, vector<64x16xf32>,
    %c1_52 = arith.constant 1 : index
    %c1_53 = arith.constant 1 : index
    %c0_54 = arith.constant 0 : index
    %42 = vector.load %arg15[%c1_52, %c1_53, %c0_54] : memref<9x9x16xf32, #tpu.memory_space<vmem>>, vector<8x8x16xf32>
    %43 = vector.shape_cast %42 : vector<8x8x16xf32> to vector<64x16xf32>
    %c64_55 = arith.constant 64 : index
    %c48_56 = arith.constant 48 : index
    %44 = vector.load %arg16[%c64_55, %c48_56] : memref<128x64xf32, #tpu.memory_space<vmem>>, vector<64x16xf32>
    tpu.vector_store %arg16[%c64_55, %c48_56], %43 {strides = array<i32>} : memref<128x64xf32, #tpu.memory_space<vmem>>, vector<64x16xf32>,
    %c0_57 = arith.constant 0 : index
    %c0_58 = arith.constant 0 : index
    %45 = vector.load %arg16[%c0_57, %c0_58] : memref<128x64xf32, #tpu.memory_space<vmem>>, vector<128x64xf32>
    %c0_59 = arith.constant 0 : index
    %c0_60 = arith.constant 0 : index
    %46 = vector.load %arg3[%c0_59, %c0_60] : memref<64x8xf32, #tpu.memory_space<vmem>>, vector<64x8xf32>
    %cst_61 = arith.constant dense<0.000000e+00> : vector<128x8xf32>
    %47 = tpu.matmul %45, %46, %cst_61 {dimension_numbers = #tpu.dot_dimension_numbers<[1], [0], [0], [1], [0, 0, 1, 1], [], []>} : vector<128x64xf32>, vector<64x8xf32>, vector<128x8xf32> -> vector<128x8xf32>
    %48 = vector.broadcast %3 : vector<1x8xf32> to vector<128x8xf32>
    %49 = arith.mulf %47, %48 : vector<128x8xf32>
    %50 = vector.broadcast %4 : vector<1x8xf32> to vector<128x8xf32>
    %51 = arith.addf %49, %50 : vector<128x8xf32>
    %cst_62 = arith.constant 0.000000e+00 : f32
    %52 = vector.broadcast %cst_62 : f32 to vector<128x8xf32>
    %53 = arith.maximumf %51, %52 : vector<128x8xf32>
    %cst_63 = arith.constant 0.000000e+00 : f32
    %54 = vector.broadcast %cst_63 : f32 to vector<1x10x8xf32>
    %c0_64 = arith.constant 0 : index
    %c0_65 = arith.constant 0 : index
    %c0_66 = arith.constant 0 : index
    %55 = vector.load %arg17[%c0_64, %c0_65, %c0_66] : memref<10x10x8xf32, #tpu.memory_space<vmem>>, vector<1x10x8xf32>
    tpu.vector_store %arg17[%c0_64, %c0_65, %c0_66], %54 {strides = array<i32>} : memref<10x10x8xf32, #tpu.memory_space<vmem>>, vector<1x10x8xf32>,
    %cst_67 = arith.constant 0.000000e+00 : f32
    %56 = vector.broadcast %cst_67 : f32 to vector<1x10x8xf32>
    %c9 = arith.constant 9 : index
    %c0_68 = arith.constant 0 : index
    %c0_69 = arith.constant 0 : index
    %57 = vector.load %arg17[%c9, %c0_68, %c0_69] : memref<10x10x8xf32, #tpu.memory_space<vmem>>, vector<1x10x8xf32>
    tpu.vector_store %arg17[%c9, %c0_68, %c0_69], %56 {strides = array<i32>} : memref<10x10x8xf32, #tpu.memory_space<vmem>>, vector<1x10x8xf32>,
    %cst_70 = arith.constant 0.000000e+00 : f32
    %58 = vector.broadcast %cst_70 : f32 to vector<10x1x8xf32>
    %c0_71 = arith.constant 0 : index
    %c0_72 = arith.constant 0 : index
    %c0_73 = arith.constant 0 : index
    %59 = vector.load %arg17[%c0_71, %c0_72, %c0_73] : memref<10x10x8xf32, #tpu.memory_space<vmem>>, vector<10x1x8xf32>
    tpu.vector_store %arg17[%c0_71, %c0_72, %c0_73], %58 {strides = array<i32>} : memref<10x10x8xf32, #tpu.memory_space<vmem>>, vector<10x1x8xf32>,
    %cst_74 = arith.constant 0.000000e+00 : f32
    %60 = vector.broadcast %cst_74 : f32 to vector<10x1x8xf32>
    %c0_75 = arith.constant 0 : index
    %c9_76 = arith.constant 9 : index
    %c0_77 = arith.constant 0 : index
    %61 = vector.load %arg17[%c0_75, %c9_76, %c0_77] : memref<10x10x8xf32, #tpu.memory_space<vmem>>, vector<10x1x8xf32>
    tpu.vector_store %arg17[%c0_75, %c9_76, %c0_77], %60 {strides = array<i32>} : memref<10x10x8xf32, #tpu.memory_space<vmem>>, vector<10x1x8xf32>,
    %62 = vector.extract_strided_slice %53 {offsets = [0, 0], sizes = [64, 8], strides = [1, 1]} : vector<128x8xf32> to vector<64x8xf32>
    %63 = vector.shape_cast %62 : vector<64x8xf32> to vector<8x8x8xf32>
    %c1_78 = arith.constant 1 : index
    %c1_79 = arith.constant 1 : index
    %c0_80 = arith.constant 0 : index
    %64 = vector.load %arg17[%c1_78, %c1_79, %c0_80] : memref<10x10x8xf32, #tpu.memory_space<vmem>>, vector<8x8x8xf32>
    tpu.vector_store %arg17[%c1_78, %c1_79, %c0_80], %63 {strides = array<i32>} : memref<10x10x8xf32, #tpu.memory_space<vmem>>, vector<8x8x8xf32>,
    %c0_81 = arith.constant 0 : index
    %c0_82 = arith.constant 0 : index
    %c0_83 = arith.constant 0 : index
    %65 = vector.load %arg17[%c0_81, %c0_82, %c0_83] : memref<10x10x8xf32, #tpu.memory_space<vmem>>, vector<8x8x8xf32>
    %66 = vector.shape_cast %65 : vector<8x8x8xf32> to vector<64x8xf32>
    %c0_84 = arith.constant 0 : index
    %c0_85 = arith.constant 0 : index
    %67 = vector.load %arg18[%c0_84, %c0_85] : memref<128x72xf32, #tpu.memory_space<vmem>>, vector<64x8xf32>
    tpu.vector_store %arg18[%c0_84, %c0_85], %66 {strides = array<i32>} : memref<128x72xf32, #tpu.memory_space<vmem>>, vector<64x8xf32>,
    %c0_86 = arith.constant 0 : index
    %c1_87 = arith.constant 1 : index
    %c0_88 = arith.constant 0 : index
    %68 = vector.load %arg17[%c0_86, %c1_87, %c0_88] : memref<10x10x8xf32, #tpu.memory_space<vmem>>, vector<8x8x8xf32>
    %69 = vector.shape_cast %68 : vector<8x8x8xf32> to vector<64x8xf32>
    %c0_89 = arith.constant 0 : index
    %c8_90 = arith.constant 8 : index
    %70 = vector.load %arg18[%c0_89, %c8_90] : memref<128x72xf32, #tpu.memory_space<vmem>>, vector<64x8xf32>
    tpu.vector_store %arg18[%c0_89, %c8_90], %69 {strides = array<i32>} : memref<128x72xf32, #tpu.memory_space<vmem>>, vector<64x8xf32>,
    %c0_91 = arith.constant 0 : index
    %c2 = arith.constant 2 : index
    %c0_92 = arith.constant 0 : index
    %71 = vector.load %arg17[%c0_91, %c2, %c0_92] : memref<10x10x8xf32, #tpu.memory_space<vmem>>, vector<8x8x8xf32>
    %72 = vector.shape_cast %71 : vector<8x8x8xf32> to vector<64x8xf32>
    %c0_93 = arith.constant 0 : index
    %c16_94 = arith.constant 16 : index
    %73 = vector.load %arg18[%c0_93, %c16_94] : memref<128x72xf32, #tpu.memory_space<vmem>>, vector<64x8xf32>
    tpu.vector_store %arg18[%c0_93, %c16_94], %72 {strides = array<i32>} : memref<128x72xf32, #tpu.memory_space<vmem>>, vector<64x8xf32>,
    %c1_95 = arith.constant 1 : index
    %c0_96 = arith.constant 0 : index
    %c0_97 = arith.constant 0 : index
    %74 = vector.load %arg17[%c1_95, %c0_96, %c0_97] : memref<10x10x8xf32, #tpu.memory_space<vmem>>, vector<8x8x8xf32>
    %75 = vector.shape_cast %74 : vector<8x8x8xf32> to vector<64x8xf32>
    %c0_98 = arith.constant 0 : index
    %c24 = arith.constant 24 : index
    %76 = vector.load %arg18[%c0_98, %c24] : memref<128x72xf32, #tpu.memory_space<vmem>>, vector<64x8xf32>
    tpu.vector_store %arg18[%c0_98, %c24], %75 {strides = array<i32>} : memref<128x72xf32, #tpu.memory_space<vmem>>, vector<64x8xf32>,
    %c1_99 = arith.constant 1 : index
    %c1_100 = arith.constant 1 : index
    %c0_101 = arith.constant 0 : index
    %77 = vector.load %arg17[%c1_99, %c1_100, %c0_101] : memref<10x10x8xf32, #tpu.memory_space<vmem>>, vector<8x8x8xf32>
    %78 = vector.shape_cast %77 : vector<8x8x8xf32> to vector<64x8xf32>
    %c0_102 = arith.constant 0 : index
    %c32_103 = arith.constant 32 : index
    %79 = vector.load %arg18[%c0_102, %c32_103] : memref<128x72xf32, #tpu.memory_space<vmem>>, vector<64x8xf32>
    tpu.vector_store %arg18[%c0_102, %c32_103], %78 {strides = array<i32>} : memref<128x72xf32, #tpu.memory_space<vmem>>, vector<64x8xf32>,
    %c1_104 = arith.constant 1 : index
    %c2_105 = arith.constant 2 : index
    %c0_106 = arith.constant 0 : index
    %80 = vector.load %arg17[%c1_104, %c2_105, %c0_106] : memref<10x10x8xf32, #tpu.memory_space<vmem>>, vector<8x8x8xf32>
    %81 = vector.shape_cast %80 : vector<8x8x8xf32> to vector<64x8xf32>
    %c0_107 = arith.constant 0 : index
    %c40 = arith.constant 40 : index
    %82 = vector.load %arg18[%c0_107, %c40] : memref<128x72xf32, #tpu.memory_space<vmem>>, vector<64x8xf32>
    tpu.vector_store %arg18[%c0_107, %c40], %81 {strides = array<i32>} : memref<128x72xf32, #tpu.memory_space<vmem>>, vector<64x8xf32>,
    %c2_108 = arith.constant 2 : index
    %c0_109 = arith.constant 0 : index
    %c0_110 = arith.constant 0 : index
    %83 = vector.load %arg17[%c2_108, %c0_109, %c0_110] : memref<10x10x8xf32, #tpu.memory_space<vmem>>, vector<8x8x8xf32>
    %84 = vector.shape_cast %83 : vector<8x8x8xf32> to vector<64x8xf32>
    %c0_111 = arith.constant 0 : index
    %c48_112 = arith.constant 48 : index
    %85 = vector.load %arg18[%c0_111, %c48_112] : memref<128x72xf32, #tpu.memory_space<vmem>>, vector<64x8xf32>
    tpu.vector_store %arg18[%c0_111, %c48_112], %84 {strides = array<i32>} : memref<128x72xf32, #tpu.memory_space<vmem>>, vector<64x8xf32>,
    %c2_113 = arith.constant 2 : index
    %c1_114 = arith.constant 1 : index
    %c0_115 = arith.constant 0 : index
    %86 = vector.load %arg17[%c2_113, %c1_114, %c0_115] : memref<10x10x8xf32, #tpu.memory_space<vmem>>, vector<8x8x8xf32>
    %87 = vector.shape_cast %86 : vector<8x8x8xf32> to vector<64x8xf32>
    %c0_116 = arith.constant 0 : index
    %c56 = arith.constant 56 : index
    %88 = vector.load %arg18[%c0_116, %c56] : memref<128x72xf32, #tpu.memory_space<vmem>>, vector<64x8xf32>
    tpu.vector_store %arg18[%c0_116, %c56], %87 {strides = array<i32>} : memref<128x72xf32, #tpu.memory_space<vmem>>, vector<64x8xf32>,
    %c2_117 = arith.constant 2 : index
    %c2_118 = arith.constant 2 : index
    %c0_119 = arith.constant 0 : index
    %89 = vector.load %arg17[%c2_117, %c2_118, %c0_119] : memref<10x10x8xf32, #tpu.memory_space<vmem>>, vector<8x8x8xf32>
    %90 = vector.shape_cast %89 : vector<8x8x8xf32> to vector<64x8xf32>
    %c0_120 = arith.constant 0 : index
    %c64_121 = arith.constant 64 : index
    %91 = vector.load %arg18[%c0_120, %c64_121] : memref<128x72xf32, #tpu.memory_space<vmem>>, vector<64x8xf32>
    tpu.vector_store %arg18[%c0_120, %c64_121], %90 {strides = array<i32>} : memref<128x72xf32, #tpu.memory_space<vmem>>, vector<64x8xf32>,
    %92 = vector.extract_strided_slice %53 {offsets = [64, 0], sizes = [64, 8], strides = [1, 1]} : vector<128x8xf32> to vector<64x8xf32>
    %93 = vector.shape_cast %92 : vector<64x8xf32> to vector<8x8x8xf32>
    %c1_122 = arith.constant 1 : index
    %c1_123 = arith.constant 1 : index
    %c0_124 = arith.constant 0 : index
    %94 = vector.load %arg17[%c1_122, %c1_123, %c0_124] : memref<10x10x8xf32, #tpu.memory_space<vmem>>, vector<8x8x8xf32>
    tpu.vector_store %arg17[%c1_122, %c1_123, %c0_124], %93 {strides = array<i32>} : memref<10x10x8xf32, #tpu.memory_space<vmem>>, vector<8x8x8xf32>,
    %c0_125 = arith.constant 0 : index
    %c0_126 = arith.constant 0 : index
    %c0_127 = arith.constant 0 : index
    %95 = vector.load %arg17[%c0_125, %c0_126, %c0_127] : memref<10x10x8xf32, #tpu.memory_space<vmem>>, vector<8x8x8xf32>
    %96 = vector.shape_cast %95 : vector<8x8x8xf32> to vector<64x8xf32>
    %c64_128 = arith.constant 64 : index
    %c0_129 = arith.constant 0 : index
    %97 = vector.load %arg18[%c64_128, %c0_129] : memref<128x72xf32, #tpu.memory_space<vmem>>, vector<64x8xf32>
    tpu.vector_store %arg18[%c64_128, %c0_129], %96 {strides = array<i32>} : memref<128x72xf32, #tpu.memory_space<vmem>>, vector<64x8xf32>,
    %c0_130 = arith.constant 0 : index
    %c1_131 = arith.constant 1 : index
    %c0_132 = arith.constant 0 : index
    %98 = vector.load %arg17[%c0_130, %c1_131, %c0_132] : memref<10x10x8xf32, #tpu.memory_space<vmem>>, vector<8x8x8xf32>
    %99 = vector.shape_cast %98 : vector<8x8x8xf32> to vector<64x8xf32>
    %c64_133 = arith.constant 64 : index
    %c8_134 = arith.constant 8 : index
    %100 = vector.load %arg18[%c64_133, %c8_134] : memref<128x72xf32, #tpu.memory_space<vmem>>, vector<64x8xf32>
    tpu.vector_store %arg18[%c64_133, %c8_134], %99 {strides = array<i32>} : memref<128x72xf32, #tpu.memory_space<vmem>>, vector<64x8xf32>,
    %c0_135 = arith.constant 0 : index
    %c2_136 = arith.constant 2 : index
    %c0_137 = arith.constant 0 : index
    %101 = vector.load %arg17[%c0_135, %c2_136, %c0_137] : memref<10x10x8xf32, #tpu.memory_space<vmem>>, vector<8x8x8xf32>
    %102 = vector.shape_cast %101 : vector<8x8x8xf32> to vector<64x8xf32>
    %c64_138 = arith.constant 64 : index
    %c16_139 = arith.constant 16 : index
    %103 = vector.load %arg18[%c64_138, %c16_139] : memref<128x72xf32, #tpu.memory_space<vmem>>, vector<64x8xf32>
    tpu.vector_store %arg18[%c64_138, %c16_139], %102 {strides = array<i32>} : memref<128x72xf32, #tpu.memory_space<vmem>>, vector<64x8xf32>,
    %c1_140 = arith.constant 1 : index
    %c0_141 = arith.constant 0 : index
    %c0_142 = arith.constant 0 : index
    %104 = vector.load %arg17[%c1_140, %c0_141, %c0_142] : memref<10x10x8xf32, #tpu.memory_space<vmem>>, vector<8x8x8xf32>
    %105 = vector.shape_cast %104 : vector<8x8x8xf32> to vector<64x8xf32>
    %c64_143 = arith.constant 64 : index
    %c24_144 = arith.constant 24 : index
    %106 = vector.load %arg18[%c64_143, %c24_144] : memref<128x72xf32, #tpu.memory_space<vmem>>, vector<64x8xf32>
    tpu.vector_store %arg18[%c64_143, %c24_144], %105 {strides = array<i32>} : memref<128x72xf32, #tpu.memory_space<vmem>>, vector<64x8xf32>,
    %c1_145 = arith.constant 1 : index
    %c1_146 = arith.constant 1 : index
    %c0_147 = arith.constant 0 : index
    %107 = vector.load %arg17[%c1_145, %c1_146, %c0_147] : memref<10x10x8xf32, #tpu.memory_space<vmem>>, vector<8x8x8xf32>
    %108 = vector.shape_cast %107 : vector<8x8x8xf32> to vector<64x8xf32>
    %c64_148 = arith.constant 64 : index
    %c32_149 = arith.constant 32 : index
    %109 = vector.load %arg18[%c64_148, %c32_149] : memref<128x72xf32, #tpu.memory_space<vmem>>, vector<64x8xf32>
    tpu.vector_store %arg18[%c64_148, %c32_149], %108 {strides = array<i32>} : memref<128x72xf32, #tpu.memory_space<vmem>>, vector<64x8xf32>,
    %c1_150 = arith.constant 1 : index
    %c2_151 = arith.constant 2 : index
    %c0_152 = arith.constant 0 : index
    %110 = vector.load %arg17[%c1_150, %c2_151, %c0_152] : memref<10x10x8xf32, #tpu.memory_space<vmem>>, vector<8x8x8xf32>
    %111 = vector.shape_cast %110 : vector<8x8x8xf32> to vector<64x8xf32>
    %c64_153 = arith.constant 64 : index
    %c40_154 = arith.constant 40 : index
    %112 = vector.load %arg18[%c64_153, %c40_154] : memref<128x72xf32, #tpu.memory_space<vmem>>, vector<64x8xf32>
    tpu.vector_store %arg18[%c64_153, %c40_154], %111 {strides = array<i32>} : memref<128x72xf32, #tpu.memory_space<vmem>>, vector<64x8xf32>,
    %c2_155 = arith.constant 2 : index
    %c0_156 = arith.constant 0 : index
    %c0_157 = arith.constant 0 : index
    %113 = vector.load %arg17[%c2_155, %c0_156, %c0_157] : memref<10x10x8xf32, #tpu.memory_space<vmem>>, vector<8x8x8xf32>
    %114 = vector.shape_cast %113 : vector<8x8x8xf32> to vector<64x8xf32>
    %c64_158 = arith.constant 64 : index
    %c48_159 = arith.constant 48 : index
    %115 = vector.load %arg18[%c64_158, %c48_159] : memref<128x72xf32, #tpu.memory_space<vmem>>, vector<64x8xf32>
    tpu.vector_store %arg18[%c64_158, %c48_159], %114 {strides = array<i32>} : memref<128x72xf32, #tpu.memory_space<vmem>>, vector<64x8xf32>,
    %c2_160 = arith.constant 2 : index
    %c1_161 = arith.constant 1 : index
    %c0_162 = arith.constant 0 : index
    %116 = vector.load %arg17[%c2_160, %c1_161, %c0_162] : memref<10x10x8xf32, #tpu.memory_space<vmem>>, vector<8x8x8xf32>
    %117 = vector.shape_cast %116 : vector<8x8x8xf32> to vector<64x8xf32>
    %c64_163 = arith.constant 64 : index
    %c56_164 = arith.constant 56 : index
    %118 = vector.load %arg18[%c64_163, %c56_164] : memref<128x72xf32, #tpu.memory_space<vmem>>, vector<64x8xf32>
    tpu.vector_store %arg18[%c64_163, %c56_164], %117 {strides = array<i32>} : memref<128x72xf32, #tpu.memory_space<vmem>>, vector<64x8xf32>,
    %c2_165 = arith.constant 2 : index
    %c2_166 = arith.constant 2 : index
    %c0_167 = arith.constant 0 : index
    %119 = vector.load %arg17[%c2_165, %c2_166, %c0_167] : memref<10x10x8xf32, #tpu.memory_space<vmem>>, vector<8x8x8xf32>
    %120 = vector.shape_cast %119 : vector<8x8x8xf32> to vector<64x8xf32>
    %c64_168 = arith.constant 64 : index
    %c64_169 = arith.constant 64 : index
    %121 = vector.load %arg18[%c64_168, %c64_169] : memref<128x72xf32, #tpu.memory_space<vmem>>, vector<64x8xf32>
    tpu.vector_store %arg18[%c64_168, %c64_169], %120 {strides = array<i32>} : memref<128x72xf32, #tpu.memory_space<vmem>>, vector<64x8xf32>,
    %c0_170 = arith.constant 0 : index
    %c0_171 = arith.constant 0 : index
    %122 = vector.load %arg18[%c0_170, %c0_171] : memref<128x72xf32, #tpu.memory_space<vmem>>, vector<128x72xf32>
    %c0_172 = arith.constant 0 : index
    %c0_173 = arith.constant 0 : index
    %123 = vector.load %arg6[%c0_172, %c0_173] : memref<72x8xf32, #tpu.memory_space<vmem>>, vector<72x8xf32>
    %cst_174 = arith.constant dense<0.000000e+00> : vector<128x8xf32>
    %124 = tpu.matmul %122, %123, %cst_174 {dimension_numbers = #tpu.dot_dimension_numbers<[1], [0], [0], [1], [0, 0, 1, 1], [], []>} : vector<128x72xf32>, vector<72x8xf32>, vector<128x8xf32> -> vector<128x8xf32>
    %125 = vector.extract_strided_slice %10 {offsets = [0, 0], sizes = [128, 4], strides = [1, 1]} : vector<128x16xf32> to vector<128x4xf32>
    %c0_175 = arith.constant 0 : index
    %c0_176 = arith.constant 0 : index
    %126 = vector.load %arg7[%c0_175, %c0_176] : memref<4x8xf32, #tpu.memory_space<vmem>>, vector<4x8xf32>
    %cst_177 = arith.constant dense<0.000000e+00> : vector<128x8xf32>
    %127 = tpu.matmul %125, %126, %cst_177 {dimension_numbers = #tpu.dot_dimension_numbers<[1], [0], [0], [1], [0, 0, 1, 1], [], []>} : vector<128x4xf32>, vector<4x8xf32>, vector<128x8xf32> -> vector<128x8xf32>
    %128 = arith.addf %124, %127 : vector<128x8xf32>
    %c0_178 = arith.constant 0 : index
    %c0_179 = arith.constant 0 : index
    %129 = vector.load %arg8[%c0_178, %c0_179] : memref<1x8xf32, #tpu.memory_space<vmem>>, vector<1x8xf32>
    %c0_180 = arith.constant 0 : index
    %c0_181 = arith.constant 0 : index
    %130 = vector.load %arg9[%c0_180, %c0_181] : memref<1x8xf32, #tpu.memory_space<vmem>>, vector<1x8xf32>
    %c0_182 = arith.constant 0 : index
    %c0_183 = arith.constant 0 : index
    %131 = vector.load %arg11[%c0_182, %c0_183] : memref<1x8xf32, #tpu.memory_space<vmem>>, vector<1x8xf32>
    %c0_184 = arith.constant 0 : index
    %c0_185 = arith.constant 0 : index
    %132 = vector.load %arg12[%c0_184, %c0_185] : memref<1x8xf32, #tpu.memory_space<vmem>>, vector<1x8xf32>
    %133 = vector.broadcast %129 : vector<1x8xf32> to vector<128x8xf32>
    %134 = arith.mulf %128, %133 : vector<128x8xf32>
    %135 = vector.broadcast %130 : vector<1x8xf32> to vector<128x8xf32>
    %136 = arith.addf %134, %135 : vector<128x8xf32>
    %cst_186 = arith.constant 0.000000e+00 : f32
    %137 = vector.broadcast %cst_186 : f32 to vector<128x8xf32>
    %138 = arith.maximumf %136, %137 : vector<128x8xf32>
    %cst_187 = arith.constant 0.000000e+00 : f32
    %139 = vector.broadcast %cst_187 : f32 to vector<1x10x8xf32>
    %c0_188 = arith.constant 0 : index
    %c0_189 = arith.constant 0 : index
    %c0_190 = arith.constant 0 : index
    %140 = vector.load %arg19[%c0_188, %c0_189, %c0_190] : memref<10x10x8xf32, #tpu.memory_space<vmem>>, vector<1x10x8xf32>
    tpu.vector_store %arg19[%c0_188, %c0_189, %c0_190], %139 {strides = array<i32>} : memref<10x10x8xf32, #tpu.memory_space<vmem>>, vector<1x10x8xf32>,
    %cst_191 = arith.constant 0.000000e+00 : f32
    %141 = vector.broadcast %cst_191 : f32 to vector<1x10x8xf32>
    %c9_192 = arith.constant 9 : index
    %c0_193 = arith.constant 0 : index
    %c0_194 = arith.constant 0 : index
    %142 = vector.load %arg19[%c9_192, %c0_193, %c0_194] : memref<10x10x8xf32, #tpu.memory_space<vmem>>, vector<1x10x8xf32>
    tpu.vector_store %arg19[%c9_192, %c0_193, %c0_194], %141 {strides = array<i32>} : memref<10x10x8xf32, #tpu.memory_space<vmem>>, vector<1x10x8xf32>,
    %cst_195 = arith.constant 0.000000e+00 : f32
    %143 = vector.broadcast %cst_195 : f32 to vector<10x1x8xf32>
    %c0_196 = arith.constant 0 : index
    %c0_197 = arith.constant 0 : index
    %c0_198 = arith.constant 0 : index
    %144 = vector.load %arg19[%c0_196, %c0_197, %c0_198] : memref<10x10x8xf32, #tpu.memory_space<vmem>>, vector<10x1x8xf32>
    tpu.vector_store %arg19[%c0_196, %c0_197, %c0_198], %143 {strides = array<i32>} : memref<10x10x8xf32, #tpu.memory_space<vmem>>, vector<10x1x8xf32>,
    %cst_199 = arith.constant 0.000000e+00 : f32
    %145 = vector.broadcast %cst_199 : f32 to vector<10x1x8xf32>
    %c0_200 = arith.constant 0 : index
    %c9_201 = arith.constant 9 : index
    %c0_202 = arith.constant 0 : index
    %146 = vector.load %arg19[%c0_200, %c9_201, %c0_202] : memref<10x10x8xf32, #tpu.memory_space<vmem>>, vector<10x1x8xf32>
    tpu.vector_store %arg19[%c0_200, %c9_201, %c0_202], %145 {strides = array<i32>} : memref<10x10x8xf32, #tpu.memory_space<vmem>>, vector<10x1x8xf32>,
    %147 = vector.extract_strided_slice %138 {offsets = [0, 0], sizes = [64, 8], strides = [1, 1]} : vector<128x8xf32> to vector<64x8xf32>
    %148 = vector.shape_cast %147 : vector<64x8xf32> to vector<8x8x8xf32>
    %c1_203 = arith.constant 1 : index
    %c1_204 = arith.constant 1 : index
    %c0_205 = arith.constant 0 : index
    %149 = vector.load %arg19[%c1_203, %c1_204, %c0_205] : memref<10x10x8xf32, #tpu.memory_space<vmem>>, vector<8x8x8xf32>
    tpu.vector_store %arg19[%c1_203, %c1_204, %c0_205], %148 {strides = array<i32>} : memref<10x10x8xf32, #tpu.memory_space<vmem>>, vector<8x8x8xf32>,
    %c0_206 = arith.constant 0 : index
    %c0_207 = arith.constant 0 : index
    %c0_208 = arith.constant 0 : index
    %150 = vector.load %arg19[%c0_206, %c0_207, %c0_208] : memref<10x10x8xf32, #tpu.memory_space<vmem>>, vector<8x8x8xf32>
    %151 = vector.shape_cast %150 : vector<8x8x8xf32> to vector<64x8xf32>
    %c0_209 = arith.constant 0 : index
    %c0_210 = arith.constant 0 : index
    %152 = vector.load %arg20[%c0_209, %c0_210] : memref<128x72xf32, #tpu.memory_space<vmem>>, vector<64x8xf32>
    tpu.vector_store %arg20[%c0_209, %c0_210], %151 {strides = array<i32>} : memref<128x72xf32, #tpu.memory_space<vmem>>, vector<64x8xf32>,
    %c0_211 = arith.constant 0 : index
    %c1_212 = arith.constant 1 : index
    %c0_213 = arith.constant 0 : index
    %153 = vector.load %arg19[%c0_211, %c1_212, %c0_213] : memref<10x10x8xf32, #tpu.memory_space<vmem>>, vector<8x8x8xf32>
    %154 = vector.shape_cast %153 : vector<8x8x8xf32> to vector<64x8xf32>
    %c0_214 = arith.constant 0 : index
    %c8_215 = arith.constant 8 : index
    %155 = vector.load %arg20[%c0_214, %c8_215] : memref<128x72xf32, #tpu.memory_space<vmem>>, vector<64x8xf32>
    tpu.vector_store %arg20[%c0_214, %c8_215], %154 {strides = array<i32>} : memref<128x72xf32, #tpu.memory_space<vmem>>, vector<64x8xf32>,
    %c0_216 = arith.constant 0 : index
    %c2_217 = arith.constant 2 : index
    %c0_218 = arith.constant 0 : index
    %156 = vector.load %arg19[%c0_216, %c2_217, %c0_218] : memref<10x10x8xf32, #tpu.memory_space<vmem>>, vector<8x8x8xf32>
    %157 = vector.shape_cast %156 : vector<8x8x8xf32> to vector<64x8xf32>
    %c0_219 = arith.constant 0 : index
    %c16_220 = arith.constant 16 : index
    %158 = vector.load %arg20[%c0_219, %c16_220] : memref<128x72xf32, #tpu.memory_space<vmem>>, vector<64x8xf32>
    tpu.vector_store %arg20[%c0_219, %c16_220], %157 {strides = array<i32>} : memref<128x72xf32, #tpu.memory_space<vmem>>, vector<64x8xf32>,
    %c1_221 = arith.constant 1 : index
    %c0_222 = arith.constant 0 : index
    %c0_223 = arith.constant 0 : index
    %159 = vector.load %arg19[%c1_221, %c0_222, %c0_223] : memref<10x10x8xf32, #tpu.memory_space<vmem>>, vector<8x8x8xf32>
    %160 = vector.shape_cast %159 : vector<8x8x8xf32> to vector<64x8xf32>
    %c0_224 = arith.constant 0 : index
    %c24_225 = arith.constant 24 : index
    %161 = vector.load %arg20[%c0_224, %c24_225] : memref<128x72xf32, #tpu.memory_space<vmem>>, vector<64x8xf32>
    tpu.vector_store %arg20[%c0_224, %c24_225], %160 {strides = array<i32>} : memref<128x72xf32, #tpu.memory_space<vmem>>, vector<64x8xf32>,
    %c1_226 = arith.constant 1 : index
    %c1_227 = arith.constant 1 : index
    %c0_228 = arith.constant 0 : index
    %162 = vector.load %arg19[%c1_226, %c1_227, %c0_228] : memref<10x10x8xf32, #tpu.memory_space<vmem>>, vector<8x8x8xf32>
    %163 = vector.shape_cast %162 : vector<8x8x8xf32> to vector<64x8xf32>
    %c0_229 = arith.constant 0 : index
    %c32_230 = arith.constant 32 : index
    %164 = vector.load %arg20[%c0_229, %c32_230] : memref<128x72xf32, #tpu.memory_space<vmem>>, vector<64x8xf32>
    tpu.vector_store %arg20[%c0_229, %c32_230], %163 {strides = array<i32>} : memref<128x72xf32, #tpu.memory_space<vmem>>, vector<64x8xf32>,
    %c1_231 = arith.constant 1 : index
    %c2_232 = arith.constant 2 : index
    %c0_233 = arith.constant 0 : index
    %165 = vector.load %arg19[%c1_231, %c2_232, %c0_233] : memref<10x10x8xf32, #tpu.memory_space<vmem>>, vector<8x8x8xf32>
    %166 = vector.shape_cast %165 : vector<8x8x8xf32> to vector<64x8xf32>
    %c0_234 = arith.constant 0 : index
    %c40_235 = arith.constant 40 : index
    %167 = vector.load %arg20[%c0_234, %c40_235] : memref<128x72xf32, #tpu.memory_space<vmem>>, vector<64x8xf32>
    tpu.vector_store %arg20[%c0_234, %c40_235], %166 {strides = array<i32>} : memref<128x72xf32, #tpu.memory_space<vmem>>, vector<64x8xf32>,
    %c2_236 = arith.constant 2 : index
    %c0_237 = arith.constant 0 : index
    %c0_238 = arith.constant 0 : index
    %168 = vector.load %arg19[%c2_236, %c0_237, %c0_238] : memref<10x10x8xf32, #tpu.memory_space<vmem>>, vector<8x8x8xf32>
    %169 = vector.shape_cast %168 : vector<8x8x8xf32> to vector<64x8xf32>
    %c0_239 = arith.constant 0 : index
    %c48_240 = arith.constant 48 : index
    %170 = vector.load %arg20[%c0_239, %c48_240] : memref<128x72xf32, #tpu.memory_space<vmem>>, vector<64x8xf32>
    tpu.vector_store %arg20[%c0_239, %c48_240], %169 {strides = array<i32>} : memref<128x72xf32, #tpu.memory_space<vmem>>, vector<64x8xf32>,
    %c2_241 = arith.constant 2 : index
    %c1_242 = arith.constant 1 : index
    %c0_243 = arith.constant 0 : index
    %171 = vector.load %arg19[%c2_241, %c1_242, %c0_243] : memref<10x10x8xf32, #tpu.memory_space<vmem>>, vector<8x8x8xf32>
    %172 = vector.shape_cast %171 : vector<8x8x8xf32> to vector<64x8xf32>
    %c0_244 = arith.constant 0 : index
    %c56_245 = arith.constant 56 : index
    %173 = vector.load %arg20[%c0_244, %c56_245] : memref<128x72xf32, #tpu.memory_space<vmem>>, vector<64x8xf32>
    tpu.vector_store %arg20[%c0_244, %c56_245], %172 {strides = array<i32>} : memref<128x72xf32, #tpu.memory_space<vmem>>, vector<64x8xf32>,
    %c2_246 = arith.constant 2 : index
    %c2_247 = arith.constant 2 : index
    %c0_248 = arith.constant 0 : index
    %174 = vector.load %arg19[%c2_246, %c2_247, %c0_248] : memref<10x10x8xf32, #tpu.memory_space<vmem>>, vector<8x8x8xf32>
    %175 = vector.shape_cast %174 : vector<8x8x8xf32> to vector<64x8xf32>
    %c0_249 = arith.constant 0 : index
    %c64_250 = arith.constant 64 : index
    %176 = vector.load %arg20[%c0_249, %c64_250] : memref<128x72xf32, #tpu.memory_space<vmem>>, vector<64x8xf32>
    tpu.vector_store %arg20[%c0_249, %c64_250], %175 {strides = array<i32>} : memref<128x72xf32, #tpu.memory_space<vmem>>, vector<64x8xf32>,
    %177 = vector.extract_strided_slice %138 {offsets = [64, 0], sizes = [64, 8], strides = [1, 1]} : vector<128x8xf32> to vector<64x8xf32>
    %178 = vector.shape_cast %177 : vector<64x8xf32> to vector<8x8x8xf32>
    %c1_251 = arith.constant 1 : index
    %c1_252 = arith.constant 1 : index
    %c0_253 = arith.constant 0 : index
    %179 = vector.load %arg19[%c1_251, %c1_252, %c0_253] : memref<10x10x8xf32, #tpu.memory_space<vmem>>, vector<8x8x8xf32>
    tpu.vector_store %arg19[%c1_251, %c1_252, %c0_253], %178 {strides = array<i32>} : memref<10x10x8xf32, #tpu.memory_space<vmem>>, vector<8x8x8xf32>,
    %c0_254 = arith.constant 0 : index
    %c0_255 = arith.constant 0 : index
    %c0_256 = arith.constant 0 : index
    %180 = vector.load %arg19[%c0_254, %c0_255, %c0_256] : memref<10x10x8xf32, #tpu.memory_space<vmem>>, vector<8x8x8xf32>
    %181 = vector.shape_cast %180 : vector<8x8x8xf32> to vector<64x8xf32>
    %c64_257 = arith.constant 64 : index
    %c0_258 = arith.constant 0 : index
    %182 = vector.load %arg20[%c64_257, %c0_258] : memref<128x72xf32, #tpu.memory_space<vmem>>, vector<64x8xf32>
    tpu.vector_store %arg20[%c64_257, %c0_258], %181 {strides = array<i32>} : memref<128x72xf32, #tpu.memory_space<vmem>>, vector<64x8xf32>,
    %c0_259 = arith.constant 0 : index
    %c1_260 = arith.constant 1 : index
    %c0_261 = arith.constant 0 : index
    %183 = vector.load %arg19[%c0_259, %c1_260, %c0_261] : memref<10x10x8xf32, #tpu.memory_space<vmem>>, vector<8x8x8xf32>
    %184 = vector.shape_cast %183 : vector<8x8x8xf32> to vector<64x8xf32>
    %c64_262 = arith.constant 64 : index
    %c8_263 = arith.constant 8 : index
    %185 = vector.load %arg20[%c64_262, %c8_263] : memref<128x72xf32, #tpu.memory_space<vmem>>, vector<64x8xf32>
    tpu.vector_store %arg20[%c64_262, %c8_263], %184 {strides = array<i32>} : memref<128x72xf32, #tpu.memory_space<vmem>>, vector<64x8xf32>,
    %c0_264 = arith.constant 0 : index
    %c2_265 = arith.constant 2 : index
    %c0_266 = arith.constant 0 : index
    %186 = vector.load %arg19[%c0_264, %c2_265, %c0_266] : memref<10x10x8xf32, #tpu.memory_space<vmem>>, vector<8x8x8xf32>
    %187 = vector.shape_cast %186 : vector<8x8x8xf32> to vector<64x8xf32>
    %c64_267 = arith.constant 64 : index
    %c16_268 = arith.constant 16 : index
    %188 = vector.load %arg20[%c64_267, %c16_268] : memref<128x72xf32, #tpu.memory_space<vmem>>, vector<64x8xf32>
    tpu.vector_store %arg20[%c64_267, %c16_268], %187 {strides = array<i32>} : memref<128x72xf32, #tpu.memory_space<vmem>>, vector<64x8xf32>,
    %c1_269 = arith.constant 1 : index
    %c0_270 = arith.constant 0 : index
    %c0_271 = arith.constant 0 : index
    %189 = vector.load %arg19[%c1_269, %c0_270, %c0_271] : memref<10x10x8xf32, #tpu.memory_space<vmem>>, vector<8x8x8xf32>
    %190 = vector.shape_cast %189 : vector<8x8x8xf32> to vector<64x8xf32>
    %c64_272 = arith.constant 64 : index
    %c24_273 = arith.constant 24 : index
    %191 = vector.load %arg20[%c64_272, %c24_273] : memref<128x72xf32, #tpu.memory_space<vmem>>, vector<64x8xf32>
    tpu.vector_store %arg20[%c64_272, %c24_273], %190 {strides = array<i32>} : memref<128x72xf32, #tpu.memory_space<vmem>>, vector<64x8xf32>,
    %c1_274 = arith.constant 1 : index
    %c1_275 = arith.constant 1 : index
    %c0_276 = arith.constant 0 : index
    %192 = vector.load %arg19[%c1_274, %c1_275, %c0_276] : memref<10x10x8xf32, #tpu.memory_space<vmem>>, vector<8x8x8xf32>
    %193 = vector.shape_cast %192 : vector<8x8x8xf32> to vector<64x8xf32>
    %c64_277 = arith.constant 64 : index
    %c32_278 = arith.constant 32 : index
    %194 = vector.load %arg20[%c64_277, %c32_278] : memref<128x72xf32, #tpu.memory_space<vmem>>, vector<64x8xf32>
    tpu.vector_store %arg20[%c64_277, %c32_278], %193 {strides = array<i32>} : memref<128x72xf32, #tpu.memory_space<vmem>>, vector<64x8xf32>,
    %c1_279 = arith.constant 1 : index
    %c2_280 = arith.constant 2 : index
    %c0_281 = arith.constant 0 : index
    %195 = vector.load %arg19[%c1_279, %c2_280, %c0_281] : memref<10x10x8xf32, #tpu.memory_space<vmem>>, vector<8x8x8xf32>
    %196 = vector.shape_cast %195 : vector<8x8x8xf32> to vector<64x8xf32>
    %c64_282 = arith.constant 64 : index
    %c40_283 = arith.constant 40 : index
    %197 = vector.load %arg20[%c64_282, %c40_283] : memref<128x72xf32, #tpu.memory_space<vmem>>, vector<64x8xf32>
    tpu.vector_store %arg20[%c64_282, %c40_283], %196 {strides = array<i32>} : memref<128x72xf32, #tpu.memory_space<vmem>>, vector<64x8xf32>,
    %c2_284 = arith.constant 2 : index
    %c0_285 = arith.constant 0 : index
    %c0_286 = arith.constant 0 : index
    %198 = vector.load %arg19[%c2_284, %c0_285, %c0_286] : memref<10x10x8xf32, #tpu.memory_space<vmem>>, vector<8x8x8xf32>
    %199 = vector.shape_cast %198 : vector<8x8x8xf32> to vector<64x8xf32>
    %c64_287 = arith.constant 64 : index
    %c48_288 = arith.constant 48 : index
    %200 = vector.load %arg20[%c64_287, %c48_288] : memref<128x72xf32, #tpu.memory_space<vmem>>, vector<64x8xf32>
    tpu.vector_store %arg20[%c64_287, %c48_288], %199 {strides = array<i32>} : memref<128x72xf32, #tpu.memory_space<vmem>>, vector<64x8xf32>,
    %c2_289 = arith.constant 2 : index
    %c1_290 = arith.constant 1 : index
    %c0_291 = arith.constant 0 : index
    %201 = vector.load %arg19[%c2_289, %c1_290, %c0_291] : memref<10x10x8xf32, #tpu.memory_space<vmem>>, vector<8x8x8xf32>
    %202 = vector.shape_cast %201 : vector<8x8x8xf32> to vector<64x8xf32>
    %c64_292 = arith.constant 64 : index
    %c56_293 = arith.constant 56 : index
    %203 = vector.load %arg20[%c64_292, %c56_293] : memref<128x72xf32, #tpu.memory_space<vmem>>, vector<64x8xf32>
    tpu.vector_store %arg20[%c64_292, %c56_293], %202 {strides = array<i32>} : memref<128x72xf32, #tpu.memory_space<vmem>>, vector<64x8xf32>,
    %c2_294 = arith.constant 2 : index
    %c2_295 = arith.constant 2 : index
    %c0_296 = arith.constant 0 : index
    %204 = vector.load %arg19[%c2_294, %c2_295, %c0_296] : memref<10x10x8xf32, #tpu.memory_space<vmem>>, vector<8x8x8xf32>
    %205 = vector.shape_cast %204 : vector<8x8x8xf32> to vector<64x8xf32>
    %c64_297 = arith.constant 64 : index
    %c64_298 = arith.constant 64 : index
    %206 = vector.load %arg20[%c64_297, %c64_298] : memref<128x72xf32, #tpu.memory_space<vmem>>, vector<64x8xf32>
    tpu.vector_store %arg20[%c64_297, %c64_298], %205 {strides = array<i32>} : memref<128x72xf32, #tpu.memory_space<vmem>>, vector<64x8xf32>,
    %c0_299 = arith.constant 0 : index
    %c0_300 = arith.constant 0 : index
    %207 = vector.load %arg20[%c0_299, %c0_300] : memref<128x72xf32, #tpu.memory_space<vmem>>, vector<128x72xf32>
    %c0_301 = arith.constant 0 : index
    %c0_302 = arith.constant 0 : index
    %208 = vector.load %arg10[%c0_301, %c0_302] : memref<72x8xf32, #tpu.memory_space<vmem>>, vector<72x8xf32>
    %cst_303 = arith.constant dense<0.000000e+00> : vector<128x8xf32>
    %209 = tpu.matmul %207, %208, %cst_303 {dimension_numbers = #tpu.dot_dimension_numbers<[1], [0], [0], [1], [0, 0, 1, 1], [], []>} : vector<128x72xf32>, vector<72x8xf32>, vector<128x8xf32> -> vector<128x8xf32>
    %210 = vector.broadcast %131 : vector<1x8xf32> to vector<128x8xf32>
    %211 = arith.mulf %209, %210 : vector<128x8xf32>
    %212 = vector.broadcast %132 : vector<1x8xf32> to vector<128x8xf32>
    %213 = arith.addf %211, %212 : vector<128x8xf32>
    %cst_304 = arith.constant 0.000000e+00 : f32
    %214 = vector.broadcast %cst_304 : f32 to vector<128x8xf32>
    %215 = arith.maximumf %213, %214 : vector<128x8xf32>
    %cst_305 = arith.constant 0.000000e+00 : f32
    %216 = vector.broadcast %cst_305 : f32 to vector<1x10x8xf32>
    %c0_306 = arith.constant 0 : index
    %c0_307 = arith.constant 0 : index
    %c0_308 = arith.constant 0 : index
    %217 = vector.load %arg21[%c0_306, %c0_307, %c0_308] : memref<10x10x8xf32, #tpu.memory_space<vmem>>, vector<1x10x8xf32>
    tpu.vector_store %arg21[%c0_306, %c0_307, %c0_308], %216 {strides = array<i32>} : memref<10x10x8xf32, #tpu.memory_space<vmem>>, vector<1x10x8xf32>,
    %cst_309 = arith.constant 0.000000e+00 : f32
    %218 = vector.broadcast %cst_309 : f32 to vector<1x10x8xf32>
    %c9_310 = arith.constant 9 : index
    %c0_311 = arith.constant 0 : index
    %c0_312 = arith.constant 0 : index
    %219 = vector.load %arg21[%c9_310, %c0_311, %c0_312] : memref<10x10x8xf32, #tpu.memory_space<vmem>>, vector<1x10x8xf32>
    tpu.vector_store %arg21[%c9_310, %c0_311, %c0_312], %218 {strides = array<i32>} : memref<10x10x8xf32, #tpu.memory_space<vmem>>, vector<1x10x8xf32>,
    %cst_313 = arith.constant 0.000000e+00 : f32
    %220 = vector.broadcast %cst_313 : f32 to vector<10x1x8xf32>
    %c0_314 = arith.constant 0 : index
    %c0_315 = arith.constant 0 : index
    %c0_316 = arith.constant 0 : index
    %221 = vector.load %arg21[%c0_314, %c0_315, %c0_316] : memref<10x10x8xf32, #tpu.memory_space<vmem>>, vector<10x1x8xf32>
    tpu.vector_store %arg21[%c0_314, %c0_315, %c0_316], %220 {strides = array<i32>} : memref<10x10x8xf32, #tpu.memory_space<vmem>>, vector<10x1x8xf32>,
    %cst_317 = arith.constant 0.000000e+00 : f32
    %222 = vector.broadcast %cst_317 : f32 to vector<10x1x8xf32>
    %c0_318 = arith.constant 0 : index
    %c9_319 = arith.constant 9 : index
    %c0_320 = arith.constant 0 : index
    %223 = vector.load %arg21[%c0_318, %c9_319, %c0_320] : memref<10x10x8xf32, #tpu.memory_space<vmem>>, vector<10x1x8xf32>
    tpu.vector_store %arg21[%c0_318, %c9_319, %c0_320], %222 {strides = array<i32>} : memref<10x10x8xf32, #tpu.memory_space<vmem>>, vector<10x1x8xf32>,
    %224 = vector.extract_strided_slice %215 {offsets = [0, 0], sizes = [64, 8], strides = [1, 1]} : vector<128x8xf32> to vector<64x8xf32>
    %225 = vector.shape_cast %224 : vector<64x8xf32> to vector<8x8x8xf32>
    %c1_321 = arith.constant 1 : index
    %c1_322 = arith.constant 1 : index
    %c0_323 = arith.constant 0 : index
    %226 = vector.load %arg21[%c1_321, %c1_322, %c0_323] : memref<10x10x8xf32, #tpu.memory_space<vmem>>, vector<8x8x8xf32>
    tpu.vector_store %arg21[%c1_321, %c1_322, %c0_323], %225 {strides = array<i32>} : memref<10x10x8xf32, #tpu.memory_space<vmem>>, vector<8x8x8xf32>,
    %c0_324 = arith.constant 0 : index
    %c0_325 = arith.constant 0 : index
    %c0_326 = arith.constant 0 : index
    %227 = vector.load %arg21[%c0_324, %c0_325, %c0_326] : memref<10x10x8xf32, #tpu.memory_space<vmem>>, vector<8x8x8xf32>
    %228 = vector.shape_cast %227 : vector<8x8x8xf32> to vector<64x8xf32>
    %c0_327 = arith.constant 0 : index
    %c0_328 = arith.constant 0 : index
    %229 = vector.load %arg22[%c0_327, %c0_328] : memref<128x72xf32, #tpu.memory_space<vmem>>, vector<64x8xf32>
    tpu.vector_store %arg22[%c0_327, %c0_328], %228 {strides = array<i32>} : memref<128x72xf32, #tpu.memory_space<vmem>>, vector<64x8xf32>,
    %c0_329 = arith.constant 0 : index
    %c1_330 = arith.constant 1 : index
    %c0_331 = arith.constant 0 : index
    %230 = vector.load %arg21[%c0_329, %c1_330, %c0_331] : memref<10x10x8xf32, #tpu.memory_space<vmem>>, vector<8x8x8xf32>
    %231 = vector.shape_cast %230 : vector<8x8x8xf32> to vector<64x8xf32>
    %c0_332 = arith.constant 0 : index
    %c8_333 = arith.constant 8 : index
    %232 = vector.load %arg22[%c0_332, %c8_333] : memref<128x72xf32, #tpu.memory_space<vmem>>, vector<64x8xf32>
    tpu.vector_store %arg22[%c0_332, %c8_333], %231 {strides = array<i32>} : memref<128x72xf32, #tpu.memory_space<vmem>>, vector<64x8xf32>,
    %c0_334 = arith.constant 0 : index
    %c2_335 = arith.constant 2 : index
    %c0_336 = arith.constant 0 : index
    %233 = vector.load %arg21[%c0_334, %c2_335, %c0_336] : memref<10x10x8xf32, #tpu.memory_space<vmem>>, vector<8x8x8xf32>
    %234 = vector.shape_cast %233 : vector<8x8x8xf32> to vector<64x8xf32>
    %c0_337 = arith.constant 0 : index
    %c16_338 = arith.constant 16 : index
    %235 = vector.load %arg22[%c0_337, %c16_338] : memref<128x72xf32, #tpu.memory_space<vmem>>, vector<64x8xf32>
    tpu.vector_store %arg22[%c0_337, %c16_338], %234 {strides = array<i32>} : memref<128x72xf32, #tpu.memory_space<vmem>>, vector<64x8xf32>,
    %c1_339 = arith.constant 1 : index
    %c0_340 = arith.constant 0 : index
    %c0_341 = arith.constant 0 : index
    %236 = vector.load %arg21[%c1_339, %c0_340, %c0_341] : memref<10x10x8xf32, #tpu.memory_space<vmem>>, vector<8x8x8xf32>
    %237 = vector.shape_cast %236 : vector<8x8x8xf32> to vector<64x8xf32>
    %c0_342 = arith.constant 0 : index
    %c24_343 = arith.constant 24 : index
    %238 = vector.load %arg22[%c0_342, %c24_343] : memref<128x72xf32, #tpu.memory_space<vmem>>, vector<64x8xf32>
    tpu.vector_store %arg22[%c0_342, %c24_343], %237 {strides = array<i32>} : memref<128x72xf32, #tpu.memory_space<vmem>>, vector<64x8xf32>,
    %c1_344 = arith.constant 1 : index
    %c1_345 = arith.constant 1 : index
    %c0_346 = arith.constant 0 : index
    %239 = vector.load %arg21[%c1_344, %c1_345, %c0_346] : memref<10x10x8xf32, #tpu.memory_space<vmem>>, vector<8x8x8xf32>
    %240 = vector.shape_cast %239 : vector<8x8x8xf32> to vector<64x8xf32>
    %c0_347 = arith.constant 0 : index
    %c32_348 = arith.constant 32 : index
    %241 = vector.load %arg22[%c0_347, %c32_348] : memref<128x72xf32, #tpu.memory_space<vmem>>, vector<64x8xf32>
    tpu.vector_store %arg22[%c0_347, %c32_348], %240 {strides = array<i32>} : memref<128x72xf32, #tpu.memory_space<vmem>>, vector<64x8xf32>,
    %c1_349 = arith.constant 1 : index
    %c2_350 = arith.constant 2 : index
    %c0_351 = arith.constant 0 : index
    %242 = vector.load %arg21[%c1_349, %c2_350, %c0_351] : memref<10x10x8xf32, #tpu.memory_space<vmem>>, vector<8x8x8xf32>
    %243 = vector.shape_cast %242 : vector<8x8x8xf32> to vector<64x8xf32>
    %c0_352 = arith.constant 0 : index
    %c40_353 = arith.constant 40 : index
    %244 = vector.load %arg22[%c0_352, %c40_353] : memref<128x72xf32, #tpu.memory_space<vmem>>, vector<64x8xf32>
    tpu.vector_store %arg22[%c0_352, %c40_353], %243 {strides = array<i32>} : memref<128x72xf32, #tpu.memory_space<vmem>>, vector<64x8xf32>,
    %c2_354 = arith.constant 2 : index
    %c0_355 = arith.constant 0 : index
    %c0_356 = arith.constant 0 : index
    %245 = vector.load %arg21[%c2_354, %c0_355, %c0_356] : memref<10x10x8xf32, #tpu.memory_space<vmem>>, vector<8x8x8xf32>
    %246 = vector.shape_cast %245 : vector<8x8x8xf32> to vector<64x8xf32>
    %c0_357 = arith.constant 0 : index
    %c48_358 = arith.constant 48 : index
    %247 = vector.load %arg22[%c0_357, %c48_358] : memref<128x72xf32, #tpu.memory_space<vmem>>, vector<64x8xf32>
    tpu.vector_store %arg22[%c0_357, %c48_358], %246 {strides = array<i32>} : memref<128x72xf32, #tpu.memory_space<vmem>>, vector<64x8xf32>,
    %c2_359 = arith.constant 2 : index
    %c1_360 = arith.constant 1 : index
    %c0_361 = arith.constant 0 : index
    %248 = vector.load %arg21[%c2_359, %c1_360, %c0_361] : memref<10x10x8xf32, #tpu.memory_space<vmem>>, vector<8x8x8xf32>
    %249 = vector.shape_cast %248 : vector<8x8x8xf32> to vector<64x8xf32>
    %c0_362 = arith.constant 0 : index
    %c56_363 = arith.constant 56 : index
    %250 = vector.load %arg22[%c0_362, %c56_363] : memref<128x72xf32, #tpu.memory_space<vmem>>, vector<64x8xf32>
    tpu.vector_store %arg22[%c0_362, %c56_363], %249 {strides = array<i32>} : memref<128x72xf32, #tpu.memory_space<vmem>>, vector<64x8xf32>,
    %c2_364 = arith.constant 2 : index
    %c2_365 = arith.constant 2 : index
    %c0_366 = arith.constant 0 : index
    %251 = vector.load %arg21[%c2_364, %c2_365, %c0_366] : memref<10x10x8xf32, #tpu.memory_space<vmem>>, vector<8x8x8xf32>
    %252 = vector.shape_cast %251 : vector<8x8x8xf32> to vector<64x8xf32>
    %c0_367 = arith.constant 0 : index
    %c64_368 = arith.constant 64 : index
    %253 = vector.load %arg22[%c0_367, %c64_368] : memref<128x72xf32, #tpu.memory_space<vmem>>, vector<64x8xf32>
    tpu.vector_store %arg22[%c0_367, %c64_368], %252 {strides = array<i32>} : memref<128x72xf32, #tpu.memory_space<vmem>>, vector<64x8xf32>,
    %254 = vector.extract_strided_slice %215 {offsets = [64, 0], sizes = [64, 8], strides = [1, 1]} : vector<128x8xf32> to vector<64x8xf32>
    %255 = vector.shape_cast %254 : vector<64x8xf32> to vector<8x8x8xf32>
    %c1_369 = arith.constant 1 : index
    %c1_370 = arith.constant 1 : index
    %c0_371 = arith.constant 0 : index
    %256 = vector.load %arg21[%c1_369, %c1_370, %c0_371] : memref<10x10x8xf32, #tpu.memory_space<vmem>>, vector<8x8x8xf32>
    tpu.vector_store %arg21[%c1_369, %c1_370, %c0_371], %255 {strides = array<i32>} : memref<10x10x8xf32, #tpu.memory_space<vmem>>, vector<8x8x8xf32>,
    %c0_372 = arith.constant 0 : index
    %c0_373 = arith.constant 0 : index
    %c0_374 = arith.constant 0 : index
    %257 = vector.load %arg21[%c0_372, %c0_373, %c0_374] : memref<10x10x8xf32, #tpu.memory_space<vmem>>, vector<8x8x8xf32>
    %258 = vector.shape_cast %257 : vector<8x8x8xf32> to vector<64x8xf32>
    %c64_375 = arith.constant 64 : index
    %c0_376 = arith.constant 0 : index
    %259 = vector.load %arg22[%c64_375, %c0_376] : memref<128x72xf32, #tpu.memory_space<vmem>>, vector<64x8xf32>
    tpu.vector_store %arg22[%c64_375, %c0_376], %258 {strides = array<i32>} : memref<128x72xf32, #tpu.memory_space<vmem>>, vector<64x8xf32>,
    %c0_377 = arith.constant 0 : index
    %c1_378 = arith.constant 1 : index
    %c0_379 = arith.constant 0 : index
    %260 = vector.load %arg21[%c0_377, %c1_378, %c0_379] : memref<10x10x8xf32, #tpu.memory_space<vmem>>, vector<8x8x8xf32>
    %261 = vector.shape_cast %260 : vector<8x8x8xf32> to vector<64x8xf32>
    %c64_380 = arith.constant 64 : index
    %c8_381 = arith.constant 8 : index
    %262 = vector.load %arg22[%c64_380, %c8_381] : memref<128x72xf32, #tpu.memory_space<vmem>>, vector<64x8xf32>
    tpu.vector_store %arg22[%c64_380, %c8_381], %261 {strides = array<i32>} : memref<128x72xf32, #tpu.memory_space<vmem>>, vector<64x8xf32>,
    %c0_382 = arith.constant 0 : index
    %c2_383 = arith.constant 2 : index
    %c0_384 = arith.constant 0 : index
    %263 = vector.load %arg21[%c0_382, %c2_383, %c0_384] : memref<10x10x8xf32, #tpu.memory_space<vmem>>, vector<8x8x8xf32>
    %264 = vector.shape_cast %263 : vector<8x8x8xf32> to vector<64x8xf32>
    %c64_385 = arith.constant 64 : index
    %c16_386 = arith.constant 16 : index
    %265 = vector.load %arg22[%c64_385, %c16_386] : memref<128x72xf32, #tpu.memory_space<vmem>>, vector<64x8xf32>
    tpu.vector_store %arg22[%c64_385, %c16_386], %264 {strides = array<i32>} : memref<128x72xf32, #tpu.memory_space<vmem>>, vector<64x8xf32>,
    %c1_387 = arith.constant 1 : index
    %c0_388 = arith.constant 0 : index
    %c0_389 = arith.constant 0 : index
    %266 = vector.load %arg21[%c1_387, %c0_388, %c0_389] : memref<10x10x8xf32, #tpu.memory_space<vmem>>, vector<8x8x8xf32>
    %267 = vector.shape_cast %266 : vector<8x8x8xf32> to vector<64x8xf32>
    %c64_390 = arith.constant 64 : index
    %c24_391 = arith.constant 24 : index
    %268 = vector.load %arg22[%c64_390, %c24_391] : memref<128x72xf32, #tpu.memory_space<vmem>>, vector<64x8xf32>
    tpu.vector_store %arg22[%c64_390, %c24_391], %267 {strides = array<i32>} : memref<128x72xf32, #tpu.memory_space<vmem>>, vector<64x8xf32>,
    %c1_392 = arith.constant 1 : index
    %c1_393 = arith.constant 1 : index
    %c0_394 = arith.constant 0 : index
    %269 = vector.load %arg21[%c1_392, %c1_393, %c0_394] : memref<10x10x8xf32, #tpu.memory_space<vmem>>, vector<8x8x8xf32>
    %270 = vector.shape_cast %269 : vector<8x8x8xf32> to vector<64x8xf32>
    %c64_395 = arith.constant 64 : index
    %c32_396 = arith.constant 32 : index
    %271 = vector.load %arg22[%c64_395, %c32_396] : memref<128x72xf32, #tpu.memory_space<vmem>>, vector<64x8xf32>
    tpu.vector_store %arg22[%c64_395, %c32_396], %270 {strides = array<i32>} : memref<128x72xf32, #tpu.memory_space<vmem>>, vector<64x8xf32>,
    %c1_397 = arith.constant 1 : index
    %c2_398 = arith.constant 2 : index
    %c0_399 = arith.constant 0 : index
    %272 = vector.load %arg21[%c1_397, %c2_398, %c0_399] : memref<10x10x8xf32, #tpu.memory_space<vmem>>, vector<8x8x8xf32>
    %273 = vector.shape_cast %272 : vector<8x8x8xf32> to vector<64x8xf32>
    %c64_400 = arith.constant 64 : index
    %c40_401 = arith.constant 40 : index
    %274 = vector.load %arg22[%c64_400, %c40_401] : memref<128x72xf32, #tpu.memory_space<vmem>>, vector<64x8xf32>
    tpu.vector_store %arg22[%c64_400, %c40_401], %273 {strides = array<i32>} : memref<128x72xf32, #tpu.memory_space<vmem>>, vector<64x8xf32>,
    %c2_402 = arith.constant 2 : index
    %c0_403 = arith.constant 0 : index
    %c0_404 = arith.constant 0 : index
    %275 = vector.load %arg21[%c2_402, %c0_403, %c0_404] : memref<10x10x8xf32, #tpu.memory_space<vmem>>, vector<8x8x8xf32>
    %276 = vector.shape_cast %275 : vector<8x8x8xf32> to vector<64x8xf32>
    %c64_405 = arith.constant 64 : index
    %c48_406 = arith.constant 48 : index
    %277 = vector.load %arg22[%c64_405, %c48_406] : memref<128x72xf32, #tpu.memory_space<vmem>>, vector<64x8xf32>
    tpu.vector_store %arg22[%c64_405, %c48_406], %276 {strides = array<i32>} : memref<128x72xf32, #tpu.memory_space<vmem>>, vector<64x8xf32>,
    %c2_407 = arith.constant 2 : index
    %c1_408 = arith.constant 1 : index
    %c0_409 = arith.constant 0 : index
    %278 = vector.load %arg21[%c2_407, %c1_408, %c0_409] : memref<10x10x8xf32, #tpu.memory_space<vmem>>, vector<8x8x8xf32>
    %279 = vector.shape_cast %278 : vector<8x8x8xf32> to vector<64x8xf32>
    %c64_410 = arith.constant 64 : index
    %c56_411 = arith.constant 56 : index
    %280 = vector.load %arg22[%c64_410, %c56_411] : memref<128x72xf32, #tpu.memory_space<vmem>>, vector<64x8xf32>
    tpu.vector_store %arg22[%c64_410, %c56_411], %279 {strides = array<i32>} : memref<128x72xf32, #tpu.memory_space<vmem>>, vector<64x8xf32>,
    %c2_412 = arith.constant 2 : index
    %c2_413 = arith.constant 2 : index
    %c0_414 = arith.constant 0 : index
    %281 = vector.load %arg21[%c2_412, %c2_413, %c0_414] : memref<10x10x8xf32, #tpu.memory_space<vmem>>, vector<8x8x8xf32>
    %282 = vector.shape_cast %281 : vector<8x8x8xf32> to vector<64x8xf32>
    %c64_415 = arith.constant 64 : index
    %c64_416 = arith.constant 64 : index
    %283 = vector.load %arg22[%c64_415, %c64_416] : memref<128x72xf32, #tpu.memory_space<vmem>>, vector<64x8xf32>
    tpu.vector_store %arg22[%c64_415, %c64_416], %282 {strides = array<i32>} : memref<128x72xf32, #tpu.memory_space<vmem>>, vector<64x8xf32>,
    %c0_417 = arith.constant 0 : index
    %c0_418 = arith.constant 0 : index
    %284 = vector.load %arg22[%c0_417, %c0_418] : memref<128x72xf32, #tpu.memory_space<vmem>>, vector<128x72xf32>
    %c0_419 = arith.constant 0 : index
    %c0_420 = arith.constant 0 : index
    %285 = vector.load %arg13[%c0_419, %c0_420] : memref<72x8xf32, #tpu.memory_space<vmem>>, vector<72x8xf32>
    %cst_421 = arith.constant dense<0.000000e+00> : vector<128x8xf32>
    %286 = tpu.matmul %284, %285, %cst_421 {dimension_numbers = #tpu.dot_dimension_numbers<[1], [0], [0], [1], [0, 0, 1, 1], [], []>} : vector<128x72xf32>, vector<72x8xf32>, vector<128x8xf32> -> vector<128x8xf32>
    %287 = arith.addf %286, %128 : vector<128x8xf32>
    %c0_422 = arith.constant 0 : index
    %c0_423 = arith.constant 0 : index
    %288 = vector.load %arg14[%c0_422, %c0_423] : memref<128x8xf32, #tpu.memory_space<vmem>>, vector<128x8xf32>
    tpu.vector_store %arg14[%c0_422, %c0_423], %287 {strides = array<i32>} : memref<128x8xf32, #tpu.memory_space<vmem>>, vector<128x8xf32>,
    return
  }
}

</mosaic_0001>

<bundles_post_ra>
// kernel: tile.14
= control target key start
LH: loop header
LB: loop body
LE: loop exit
PB: predicated region body
PF: predicated region fallthrough
CT: control target
= control target key end

     0   :  { %vm8_vm0 = vcmask 31744   ;;  %s40_s8 = smov 4   ;;  %s41_s9 = smov 8   ;;  %vm14_vm1 = vcmask 130144   ;;  %vm20_vm2 = vcmask 97344   ;;  %vm26_vm3 = vcmask 64544   ;;  %s58_s0 = inlined_call_operand.vmem [shape: f32[4,4], index: 0, kind: input, shape index: {}]   ;;  %s59_s1 = inlined_call_operand.vmem [shape: f32[1,16], index: 1, kind: output, shape index: {}]  }
   0x1   :  { %v5_v0 = vld [vmem:[%s58_s0] sm:$0xf]  ;;  %s39_s0 = smov 12  }
   0x2   :  { %6 = vst [vmem:[#allocation1] sm:$0xf] %v5_v0 }
   0x9   :  { %v11_v1 = vld [vmem:[#allocation1 + $0x3] sm:$0x1]   ;;  %v23_v2 = vld [vmem:[#allocation1 + $0x1] sm:$0x1]   ;;  %v7_v3 = vld [vmem:[#allocation1] sm:$0x1]  }
   0xa   :  { %12 = vrot.lane.b32.xlu0 %v11_v1, %s39_s0  ;;  %24 = vrot.lane.b32.xlu1 %v23_v2, %s40_s8  ;;  %v17_v4 = vld [vmem:[#allocation1 + $0x2] sm:$0x1]   ;;  %9 = vst.msk [vmem:[#allocation0] sm:$0x1] %vm8_vm0, %v7_v3  }
   0xe   :  { %18 = vrot.lane.b32.xlu0 %v17_v4, %s41_s9 }
  0x7c   :  { %v13_v5 = vpop.permute.xlu0 %12   ;;  %v25_v6 = vpop.permute.xlu1 %24  }
  0x7d   :  { %15 = vst.msk [vmem:[#allocation0] sm:$0x1] %vm14_vm1, %v13_v5  }
  0x80   :  { %v19_v7 = vpop.permute.xlu0 %18  }
  0x81   :  { %21 = vst.msk [vmem:[#allocation0] sm:$0x1] %vm20_vm2, %v19_v7  }
  0x82   :  { %27 = vst.msk [vmem:[#allocation0] sm:$0x1] %vm26_vm3, %v25_v6  }
  0x89   :  { %v32_v8 = vld [vmem:[#allocation0] sm:$0x1] }
  0x8a   :  { %35 = vst [vmem:[%s59_s1] sm:$0x1] %v32_v8 }

// kernel: tile.10
= control target key start
LH: loop header
LB: loop body
LE: loop exit
PB: predicated region body
PF: predicated region fallthrough
CT: control target
= control target key end

     0   :  { %s22_s0 = inlined_call_operand.vmem [shape: f32[4], index: 0, kind: input, shape index: {}]   ;;  %s23_s1 = inlined_call_operand.vmem [shape: f32[4,4], index: 1, kind: output, shape index: {}]  }
   0x1   :  { %v4_v0 = vld [vmem:[%s22_s0] ss:$0 sm:$0xff] }
   0x2   :  { %5 = vst [vmem:[%s23_s1] sm:$0xf] %v4_v0 }

// kernel: _lambda_.1
= control target key start
LH: loop header
LB: loop body
LE: loop exit
PB: predicated region body
PF: predicated region fallthrough
CT: control target
= control target key end

     0   :  { %vm128_vm0 = vcmask 130048   ;;  %vm130_vm1 = vcmask 122880   ;;  %v4721_v3 = vmov 0.0   ;;  %s4722_s22 = smov 16   ;;  %s4723_s23 = smov 32   ;;  %vm759_vm2 = vcmask 64512   ;;  %s6862_s0 = inlined_call_operand.vmem [shape: f32[128,16], index: 0, kind: input, shape index: {}]   ;;  %s6863_s1 = inlined_call_operand.vmem [shape: f32[1,16], index: 1, kind: input, shape index: {}]   ;;  %s6864_s2 = inlined_call_operand.vmem [shape: f32[1,16], index: 2, kind: input, shape index: {}]   ;;  %s6865_s3 = inlined_call_operand.vmem [shape: f32[64,8], index: 3, kind: input, shape index: {}]   ;;  %s6866_s4 = inlined_call_operand.vmem [shape: f32[1,8], index: 4, kind: input, shape index: {}]   ;;  %s6867_s5 = inlined_call_operand.vmem [shape: f32[1,8], index: 5, kind: input, shape index: {}]   ;;  %s6868_s7 = inlined_call_operand.vmem [shape: f32[4,8], index: 7, kind: input, shape index: {}]   ;;  %s6869_s6 = inlined_call_operand.vmem [shape: f32[72,8], index: 6, kind: input, shape index: {}]   ;;  %s6870_s8 = inlined_call_operand.vmem [shape: f32[1,8], index: 8, kind: input, shape index: {}]   ;;  %s6871_s9 = inlined_call_operand.vmem [shape: f32[1,8], index: 9, kind: input, shape index: {}]   ;;  %s6872_s10 = inlined_call_operand.vmem [shape: f32[72,8], index: 10, kind: input, shape index: {}]   ;;  %s6873_s11 = inlined_call_operand.vmem [shape: f32[1,8], index: 11, kind: input, shape index: {}]   ;;  %s6874_s12 = inlined_call_operand.vmem [shape: f32[1,8], index: 12, kind: input, shape index: {}]   ;;  %s6875_s13 = inlined_call_operand.vmem [shape: f32[72,8], index: 13, kind: input, shape index: {}]   ;;  %s6876_s14 = inlined_call_operand.vmem [shape: f32[128,8], index: 14, kind: output, shape index: {}]  }
   0x1   :  { %v47_v0 = vld [vmem:[%s6862_s0] sm:$0xff]  ;;  %132 = vst.msk [vmem:[#allocation2 + $0x8] sm:$0x1] %vm130_vm1, %v4721_v3  ;;  %131 = vst.msk [vmem:[#allocation2 + $0x88] sm:$0x1] %vm130_vm1, %v4721_v3  ;;  %v48_v6 = vld [vmem:[%s6862_s0 + $0x8] sm:$0xff] }
   0x2   :  { %v55_v1 = vld [vmem:[%s6862_s0 + $0x40] sm:$0xff]  ;;  %129 = vst.msk [vmem:[#allocation2 + $0x80] sm:$0xff] %vm128_vm0, %v4721_v3  ;;  %v49_v7 = vld [vmem:[%s6862_s0 + $0x10] sm:$0xff]  ;;  %v56_v10 = vld [vmem:[%s6862_s0 + $0x48] sm:$0xff]  ;;  %vm761_vm3 = vcmask 58368   ;;  %vm766_vm4 = vcmask 57344  }
   0x3   :  { %v4814_v2 = vld [vmem:[%s6863_s1] ss:$0 sm:$0xff]  ;;  %133 = vst.msk [vmem:[#allocation2 + $0x18] sm:$0x1] %vm130_vm1, %v4721_v3  ;;  %134 = vst.msk [vmem:[#allocation2 + $0x28] sm:$0x1] %vm130_vm1, %v4721_v3 }
   0x4   :  { %135 = vst.msk [vmem:[#allocation2 + $0x38] sm:$0x1] %vm130_vm1, %v4721_v3  ;;  %136 = vst.msk [vmem:[#allocation2 + $0x48] sm:$0x1] %vm130_vm1, %v4721_v3  ;;  %v4839_v4 = vld [vmem:[%s6864_s2] ss:$0 sm:$0xff]  ;;  %v73_v5 = vmul.f32 %v4814_v2, %v47_v0  ;;  %v74_v8 = vmul.f32 %v4814_v2, %v48_v6  ;;  %v75_v9 = vmul.f32 %v4814_v2, %v49_v7 }
   0x5   :  { %137 = vst.msk [vmem:[#allocation2 + $0x58] sm:$0x1] %vm130_vm1, %v4721_v3  ;;  %138 = vst.msk [vmem:[#allocation2 + $0x68] sm:$0x1] %vm130_vm1, %v4721_v3  ;;  %v57_v11 = vld [vmem:[%s6862_s0 + $0x50] sm:$0xff]  ;;  %v50_v12 = vld [vmem:[%s6862_s0 + $0x18] sm:$0xff]  ;;  %v81_v13 = vmul.f32 %v4814_v2, %v55_v1  ;;  %v82_v15 = vmul.f32 %v4814_v2, %v56_v10 }
   0x6   :  { %139 = vst.msk [vmem:[#allocation2 + $0x78] sm:$0x1] %vm130_vm1, %v4721_v3  ;;  %140 = vst.msk [vmem:[#allocation2 + $0x88] sm:$0x1] %vm130_vm1, %v4721_v3  ;;  %v4863_v14 = vadd.f32 %v4839_v4, %v73_v5  ;;  %v51_v16 = vld [vmem:[%s6862_s0 + $0x20] sm:$0xff]  ;;  %v4870_v17 = vadd.f32 %v4839_v4, %v74_v8  ;;  %v4873_v18 = vadd.f32 %v4839_v4, %v75_v9  ;;  %v52_v22 = vld [vmem:[%s6862_s0 + $0x28] sm:$0xff] }
   0x7   :  { %v76_v19 = vmul.f32 %v4814_v2, %v50_v12  ;;  %v77_v20 = vmul.f32 %v4814_v2, %v51_v16  ;;  %v59_v21 = vld [vmem:[%s6862_s0 + $0x60] sm:$0xff]  ;;  %v83_v24 = vmul.f32 %v4814_v2, %v57_v11  ;;  %v53_v25 = vld [vmem:[%s6862_s0 + $0x30] sm:$0xff]  ;;  %v504_v26 = vld [vmem:[%s6865_s3 + $0x38] sm:$0xff]  ;;  %v4906_v33 = vadd.f32 %v4839_v4, %v81_v13  ;;  %760 = vst.msk [vmem:[#allocation4] sm:$0xff] %vm759_vm2, %v4721_v3  ;;  %s4726_s29 = smov 56   ;;  %s4727_s30 = smov 64  }
   0x8   :  { %v111_v23 = vmax.f32 %v4863_v14, 0.0  ;;  %v503_v27 = vld [vmem:[%s6865_s3 + $0x30] sm:$0xff]  ;;  %v112_v28 = vmax.f32 %v4870_v17, 0.0  ;;  %v113_v29 = vmax.f32 %v4873_v18, 0.0  ;;  %v54_v32 = vld [vmem:[%s6862_s0 + $0x38] sm:$0xff]  ;;  %4502 = vmatprep.subr.mxu0 %v504_v26  ;;  %v85_v34 = vmul.f32 %v4814_v2, %v59_v21  ;;  %v502_v37 = vld [vmem:[%s6865_s3 + $0x28] sm:$0xff] }
   0x9   :  { %v4897_v30 = vadd.f32 %v4839_v4, %v76_v19  ;;  %v4900_v31 = vadd.f32 %v4839_v4, %v77_v20  ;;  %v78_v35 = vmul.f32 %v4814_v2, %v52_v22  ;;  %v61_v36 = vld [vmem:[%s6862_s0 + $0x70] sm:$0xff]  ;;  %4503 = vmatpush3.msra.mxu0 %v504_v26  ;;  %v58_v38 = vld [vmem:[%s6862_s0 + $0x58] sm:$0xff]  ;;  %v4929_v39 = vadd.f32 %v4839_v4, %v82_v15  ;;  %v501_v46 = vld [vmem:[%s6865_s3 + $0x20] sm:$0xff]  ;;  %s4728_s1 = smov 24  }
   0xa   :  { %141 = vst.msk [vmem:[#allocation2] sm:$0xff] %vm128_vm0, %v111_v23  ;;  %142 = vst.msk [vmem:[#allocation2 + $0x10] sm:$0xff] %vm128_vm0, %v112_v28  ;;  %v79_v42 = vmul.f32 %v4814_v2, %v53_v25  ;;  %4504 = vmatprep.subr.mxu0 %v503_v27  ;;  %v4935_v43 = vadd.f32 %v4839_v4, %v83_v24  ;;  %v80_v45 = vmul.f32 %v4814_v2, %v54_v32  ;;  %v500_v54 = vld [vmem:[%s6865_s3 + $0x18] sm:$0xff]  ;;  %v499_v60 = vld [vmem:[%s6865_s3 + $0x10] sm:$0xff]  ;;  %vm205_vm5 = vcmask 261248  }
   0xb   :  { %143 = vst.msk [vmem:[#allocation2 + $0x20] sm:$0xff] %vm128_vm0, %v113_v29  ;;  %v114_v40 = vmax.f32 %v4897_v30, 0.0  ;;  %v115_v41 = vmax.f32 %v4900_v31, 0.0  ;;  %v4938_v44 = vadd.f32 %v4839_v4, %v78_v35  ;;  %4505 = vmatpush3.msra.mxu0 %v503_v27  ;;  %v87_v48 = vmul.f32 %v4814_v2, %v61_v36  ;;  %v498_v0 = vld [vmem:[%s6865_s3 + $0x8] sm:$0xff]  ;;  %v497_v10 = vld [vmem:[%s6865_s3] sm:$0xff]  ;;  %s4724_s3 = smov 48  }
   0xc   :  { %v4951_v47 = vadd.f32 %v4839_v4, %v79_v42  ;;  %4506 = vmatprep.subr.mxu0 %v502_v37  ;;  %v84_v49 = vmul.f32 %v4814_v2, %v58_v38  ;;  %v119_v50 = vmax.f32 %v4906_v33, 0.0  ;;  %v4957_v51 = vadd.f32 %v4839_v4, %v85_v34  ;;  %v60_v32 = vld [vmem:[%s6862_s0 + $0x68] sm:$0xff]  ;;  %v62_v42 = vld [vmem:[%s6862_s0 + $0x78] sm:$0xff]  ;;  %762 = vst.msk [vmem:[#allocation4 + $0x8] sm:$0x3] %vm761_vm3, %v4721_v3  ;;  %s4725_s0 = smov 8  }
   0xd   :  { %144 = vst.msk [vmem:[#allocation2 + $0x30] sm:$0xff] %vm128_vm0, %v114_v40  ;;  %145 = vst.msk [vmem:[#allocation2 + $0x40] sm:$0xff] %vm128_vm0, %v115_v41  ;;  %v116_v52 = vmax.f32 %v4938_v44, 0.0  ;;  %v4961_v53 = vadd.f32 %v4839_v4, %v80_v45  ;;  %4507 = vmatpush3.msra.mxu0 %v502_v37  ;;  %v120_v55 = vmax.f32 %v4929_v39, 0.0  ;;  %v121_v58 = vmax.f32 %v4935_v43, 0.0 }
   0xe   :  { %v117_v56 = vmax.f32 %v4951_v47, 0.0  ;;  %4508 = vmatprep.subr.mxu0 %v501_v46  ;;  %v4969_v57 = vadd.f32 %v4839_v4, %v84_v49  ;;  %v4983_v63 = vadd.f32 %v4839_v4, %v87_v48  ;;  %v123_v8 = vmax.f32 %v4957_v51, 0.0  ;;  %764 = vst.msk [vmem:[#allocation4 + $0x90] sm:$0xff] %vm759_vm2, %v4721_v3  ;;  %2095 = vst.msk [vmem:[#allocation6] sm:$0xff] %vm759_vm2, %v4721_v3 }
   0xf   :  { %146 = vst.msk [vmem:[#allocation2 + $0x50] sm:$0xff] %vm128_vm0, %v116_v52  ;;  %v118_v59 = vmax.f32 %v4961_v53, 0.0  ;;  %4509 = vmatpush3.msra.mxu0 %v501_v46  ;;  %v86_v35 = vmul.f32 %v4814_v2, %v60_v32  ;;  %v88_v45 = vmul.f32 %v4814_v2, %v62_v42  ;;  %v5071_v2 = vld [vmem:[#allocation2 + $0x80] sm:$0xff]  ;;  %vm255_vm6 = vcmask 392448  }
  0x10   :  { %147 = vst.msk [vmem:[#allocation2 + $0x60] sm:$0xff] %vm128_vm0, %v117_v56  ;;  %4510 = vmatprep.subr.mxu0 %v500_v54  ;;  %v122_v1 = vmax.f32 %v4969_v57, 0.0  ;;  %v125_v16 = vmax.f32 %v4983_v63, 0.0  ;;  %vm304_vm7 = vcmask 523648   ;;  %vm505_vm8 = vcmask 523264  }
  0x11   :  { %v165_v61 = vld [vmem:[#allocation2 + $0x1] sm:$0xff]  ;;  %v215_v5 = vld [vmem:[#allocation2 + $0x10] sm:$0xff]  ;;  %148 = vst.msk [vmem:[#allocation2 + $0x70] sm:$0xff] %vm128_vm0, %v118_v59  ;;  %4511 = vmatpush3.msra.mxu0 %v500_v54  ;;  %v5043_v36 = vadd.f32 %v4839_v4, %v86_v35  ;;  %v5060_v48 = vadd.f32 %v4839_v4, %v88_v45  ;;  %vm852_vm9 = vcmask 130112   ;;  %vm901_vm10 = vcmask 195712  }
  0x12   :  { %v149_v62 = vld [vmem:[#allocation2] sm:$0xff]  ;;  %181 = vrot.lane.b32.xlu0 %v165_v61, %s4722_s22  ;;  %v166_v6 = vld [vmem:[#allocation2 + $0x11] sm:$0xff]  ;;  %231 = vrot.lane.b32.xlu1 %v215_v5, %s4723_s23  ;;  %158 = vst.msk [vmem:[#allocation3 + $0x8] sm:$0xff] %vm128_vm0, %v215_v5  ;;  %vm1688_vm11 = vcmask 1043456   ;;  %vm1639_vm12 = vcmask 31744   ;;  %vm950_vm13 = vcmask 261312  }
  0x13   :  { %313 = vst.msk [vmem:[#allocation2] sm:$0xff] %vm128_vm0, %v119_v50  ;;  %157 = vst.msk [vmem:[#allocation3] sm:$0xff] %vm128_vm0, %v149_v62  ;;  %v216_v7 = vld [vmem:[#allocation2 + $0x20] sm:$0xff]  ;;  %4512 = vmatprep.subr.mxu0 %v499_v60  ;;  %v124_v37 = vmax.f32 %v5043_v36, 0.0  ;;  %v126_v49 = vmax.f32 %v5060_v48, 0.0  ;;  %4544 = vmatprep.mubr.msk.f32.mxu1 %vm1639_vm12, %v111_v23  ;;  %vm999_vm14 = vcmask 326912  }
  0x14   :  { %314 = vst.msk [vmem:[#allocation2 + $0x10] sm:$0xff] %vm128_vm0, %v120_v55  ;;  %v265_v9 = vld [vmem:[#allocation2 + $0x21] sm:$0xff]  ;;  %159 = vst.msk [vmem:[#allocation3 + $0x10] sm:$0xff] %vm128_vm0, %v216_v7  ;;  %v168_v11 = vld [vmem:[#allocation2 + $0x31] sm:$0xff]  ;;  %4513 = vmatpush3.msra.mxu0 %v499_v60  ;;  %vm1048_vm15 = vcmask 392512   ;;  %vm1147_vm1 = vcmask 523712  }
  0x15   :  { %315 = vst.msk [vmem:[#allocation2 + $0x20] sm:$0xff] %vm128_vm0, %v121_v58  ;;  %v217_v12 = vld [vmem:[#allocation2 + $0x30] sm:$0xff]  ;;  %v218_v13 = vld [vmem:[#allocation2 + $0x40] sm:$0xff]  ;;  %4514 = vmatprep.subr.mxu0 %v498_v0 }
  0x16   :  { %v267_v15 = vld [vmem:[#allocation2 + $0x41] sm:$0xff]  ;;  %161 = vst.msk [vmem:[#allocation3 + $0x20] sm:$0xff] %vm128_vm0, %v218_v13  ;;  %160 = vst.msk [vmem:[#allocation3 + $0x18] sm:$0xff] %vm128_vm0, %v217_v12  ;;  %183 = vrot.lane.b32.xlu0 %v166_v6, %s4722_s22  ;;  %4515 = vmatpush3.msra.mxu0 %v498_v0  ;;  %v219_v19 = vld [vmem:[#allocation2 + $0x50] sm:$0xff] }
  0x17   :  { %316 = vst.msk [vmem:[#allocation2 + $0x30] sm:$0xff] %vm128_vm0, %v122_v1  ;;  %317 = vst.msk [vmem:[#allocation2 + $0x40] sm:$0xff] %vm128_vm0, %v123_v8  ;;  %233 = vrot.lane.b32.xlu1 %v216_v7, %s4723_s23  ;;  %4516 = vmatprep.subr.mxu0 %v497_v10  ;;  %v220_v20 = vld [vmem:[#allocation2 + $0x60] sm:$0xff]  ;;  %v170_v38 = vld [vmem:[#allocation2 + $0x51] sm:$0xff] }
  0x18   :  { %v269_v21 = vld [vmem:[#allocation2 + $0x61] sm:$0xff]  ;;  %4517 = vmatpush3.msra.mxu0 %v497_v10  ;;  %162 = vst.msk [vmem:[#allocation3 + $0x28] sm:$0xff] %vm128_vm0, %v219_v19  ;;  %163 = vst.msk [vmem:[#allocation3 + $0x30] sm:$0xff] %vm128_vm0, %v220_v20  ;;  %v221_v22 = vld [vmem:[#allocation2 + $0x70] sm:$0xff] }
  0x19   :  { %319 = vst.msk [vmem:[#allocation2 + $0x60] sm:$0xff] %vm128_vm0, %v125_v16  ;;  %164 = vst.msk [vmem:[#allocation3 + $0x38] sm:$0xff] %vm128_vm0, %v221_v22  ;;  %v172_v54 = vld [vmem:[#allocation2 + $0x71] sm:$0xff]  ;;  %v5077_v60 = vld [vmem:[#allocation2 + $0x81] sm:$0xff] }
  0x1a   :  { %280 = vrot.lane.b32.xlu0 %v166_v6, %s4724_s3  ;;  %318 = vst.msk [vmem:[#allocation2 + $0x50] sm:$0xff] %vm128_vm0, %v124_v37  ;;  %320 = vst.msk [vmem:[#allocation2 + $0x70] sm:$0xff] %vm128_vm0, %v126_v49  ;;  %v321_v4 = vld [vmem:[#allocation2] sm:$0xff] }
  0x1b   :  { %v385_v24 = vld [vmem:[#allocation2 + $0x10] sm:$0xff]  ;;  %282 = vrot.lane.b32.xlu1 %v265_v9, %s4724_s3  ;;  %329 = vst.msk [vmem:[#allocation3 + $0x40] sm:$0xff] %vm128_vm0, %v321_v4  ;;  %v337_v62 = vld [vmem:[#allocation2 + $0x1] sm:$0xff] }
  0x1c   :  { %v386_v25 = vld [vmem:[#allocation2 + $0x20] sm:$0xff]  ;;  %330 = vst.msk [vmem:[#allocation3 + $0x48] sm:$0xff] %vm128_vm0, %v385_v24  ;;  %v338_v0 = vld [vmem:[#allocation2 + $0x11] sm:$0xff] }
  0x1d   :  { %331 = vst.msk [vmem:[#allocation3 + $0x50] sm:$0xff] %vm128_vm0, %v386_v25  ;;  %v434_v5 = vld [vmem:[#allocation2 + $0x21] sm:$0xff] }
  0x1e   :  { %v387_v26 = vld [vmem:[#allocation2 + $0x30] sm:$0xff]  ;;  %v388_v27 = vld [vmem:[#allocation2 + $0x40] sm:$0xff]  ;;  %185 = vrot.lane.b32.xlu0 %v265_v9, %s4722_s22  ;;  %765 = vst.msk [vmem:[#allocation4 + $0x98] sm:$0x3] %vm761_vm3, %v4721_v3  ;;  %2096 = vst.msk [vmem:[#allocation6 + $0x8] sm:$0x3] %vm761_vm3, %v4721_v3 }
  0x1f   :  { %332 = vst.msk [vmem:[#allocation3 + $0x58] sm:$0xff] %vm128_vm0, %v387_v26  ;;  %333 = vst.msk [vmem:[#allocation3 + $0x60] sm:$0xff] %vm128_vm0, %v388_v27  ;;  %187 = vrot.lane.b32.xlu1 %v168_v11, %s4722_s22  ;;  %v340_v6 = vld [vmem:[#allocation2 + $0x31] sm:$0xff]  ;;  %v436_v7 = vld [vmem:[#allocation2 + $0x41] sm:$0xff] }
  0x20   :  { %v390_v34 = vld [vmem:[#allocation2 + $0x60] sm:$0xff]  ;;  %2098 = vst.msk [vmem:[#allocation6 + $0x90] sm:$0xff] %vm759_vm2, %v4721_v3  ;;  %3216 = vst.msk [vmem:[#allocation8] sm:$0xff] %vm759_vm2, %v4721_v3 }
  0x21   :  { %335 = vst.msk [vmem:[#allocation3 + $0x70] sm:$0xff] %vm128_vm0, %v390_v34  ;;  %v389_v46 = vld [vmem:[#allocation2 + $0x50] sm:$0xff]  ;;  %v5102_v10 = vld [vmem:[#allocation2 + $0x61] sm:$0xff] }
  0x22   :  { %235 = vrot.lane.b32.xlu0 %v217_v12, %s4723_s23  ;;  %334 = vst.msk [vmem:[#allocation3 + $0x68] sm:$0xff] %vm128_vm0, %v389_v46  ;;  %v5079_v61 = vld [vmem:[#allocation2 + $0x70] sm:$0xff] }
  0x23   :  { %237 = vrot.lane.b32.xlu1 %v218_v13, %s4723_s23  ;;  %336 = vst.msk [vmem:[#allocation3 + $0x78] sm:$0xff] %vm128_vm0, %v5079_v61  ;;  %v342_v9 = vld [vmem:[#allocation2 + $0x51] sm:$0xff]  ;;  %vm1098_vm0 = vcmask 458112  }
  0x24   :  { %2099 = vst.msk [vmem:[#allocation6 + $0x98] sm:$0x3] %vm761_vm3, %v4721_v3  ;;  %3217 = vst.msk [vmem:[#allocation8 + $0x8] sm:$0x3] %vm761_vm3, %v4721_v3  ;;  %v812_v12 = vld [vmem:[#allocation4 + $0x1] sm:$0xff] }
  0x25   :  { %3219 = vst.msk [vmem:[#allocation8 + $0x90] sm:$0xff] %vm759_vm2, %v4721_v3 }
  0x26   :  { %284 = vrot.lane.b32.xlu0 %v168_v11, %s4724_s3  ;;  %3220 = vst.msk [vmem:[#allocation8 + $0x98] sm:$0x3] %vm761_vm3, %v4721_v3  ;;  %v344_v11 = vld [vmem:[#allocation2 + $0x71] sm:$0xff]  ;;  %vm1196_vm3 = vcmask 589312  }
  0x27   :  { %286 = vrot.lane.b32.xlu1 %v267_v15, %s4724_s3  ;;  %768 = vst.msk [vmem:[#allocation4 + $0x10] sm:$0x1] %vm766_vm4, %v4721_v3  ;;  %769 = vst.msk [vmem:[#allocation4 + $0x20] sm:$0x1] %vm766_vm4, %v4721_v3 }
  0x28   :  { %770 = vst.msk [vmem:[#allocation4 + $0x30] sm:$0x1] %vm766_vm4, %v4721_v3  ;;  %771 = vst.msk [vmem:[#allocation4 + $0x40] sm:$0x1] %vm766_vm4, %v4721_v3 }
  0x29   :  { %772 = vst.msk [vmem:[#allocation4 + $0x50] sm:$0x1] %vm766_vm4, %v4721_v3  ;;  %773 = vst.msk [vmem:[#allocation4 + $0x60] sm:$0x1] %vm766_vm4, %v4721_v3 }
  0x2a   :  { %189 = vrot.lane.b32.xlu0 %v267_v15, %s4722_s22  ;;  %774 = vst.msk [vmem:[#allocation4 + $0x70] sm:$0x1] %vm766_vm4, %v4721_v3  ;;  %775 = vst.msk [vmem:[#allocation4 + $0x80] sm:$0x1] %vm766_vm4, %v4721_v3 }
  0x2b   :  { %191 = vrot.lane.b32.xlu1 %v170_v38, %s4722_s22  ;;  %778 = vst.msk [vmem:[#allocation4 + $0x19] sm:$0x1] %vm766_vm4, %v4721_v3  ;;  %779 = vst.msk [vmem:[#allocation4 + $0x29] sm:$0x1] %vm766_vm4, %v4721_v3 }
  0x2c   :  { %780 = vst.msk [vmem:[#allocation4 + $0x39] sm:$0x1] %vm766_vm4, %v4721_v3  ;;  %781 = vst.msk [vmem:[#allocation4 + $0x49] sm:$0x1] %vm766_vm4, %v4721_v3 }
  0x2d   :  { %782 = vst.msk [vmem:[#allocation4 + $0x59] sm:$0x1] %vm766_vm4, %v4721_v3  ;;  %783 = vst.msk [vmem:[#allocation4 + $0x69] sm:$0x1] %vm766_vm4, %v4721_v3 }
  0x2e   :  { %239 = vrot.lane.b32.xlu0 %v219_v19, %s4723_s23  ;;  %784 = vst.msk [vmem:[#allocation4 + $0x79] sm:$0x1] %vm766_vm4, %v4721_v3  ;;  %785 = vst.msk [vmem:[#allocation4 + $0x89] sm:$0x1] %vm766_vm4, %v4721_v3 }
  0x2f   :  { %241 = vrot.lane.b32.xlu1 %v220_v20, %s4723_s23  ;;  %2101 = vst.msk [vmem:[#allocation6 + $0x10] sm:$0x1] %vm766_vm4, %v4721_v3  ;;  %2102 = vst.msk [vmem:[#allocation6 + $0x20] sm:$0x1] %vm766_vm4, %v4721_v3 }
  0x30   :  { %2103 = vst.msk [vmem:[#allocation6 + $0x30] sm:$0x1] %vm766_vm4, %v4721_v3  ;;  %2104 = vst.msk [vmem:[#allocation6 + $0x40] sm:$0x1] %vm766_vm4, %v4721_v3 }
  0x31   :  { %2105 = vst.msk [vmem:[#allocation6 + $0x50] sm:$0x1] %vm766_vm4, %v4721_v3  ;;  %2106 = vst.msk [vmem:[#allocation6 + $0x60] sm:$0x1] %vm766_vm4, %v4721_v3 }
  0x32   :  { %288 = vrot.lane.b32.xlu0 %v170_v38, %s4724_s3  ;;  %2107 = vst.msk [vmem:[#allocation6 + $0x70] sm:$0x1] %vm766_vm4, %v4721_v3  ;;  %2108 = vst.msk [vmem:[#allocation6 + $0x80] sm:$0x1] %vm766_vm4, %v4721_v3 }
  0x33   :  { %290 = vrot.lane.b32.xlu1 %v269_v21, %s4724_s3  ;;  %2111 = vst.msk [vmem:[#allocation6 + $0x19] sm:$0x1] %vm766_vm4, %v4721_v3  ;;  %2112 = vst.msk [vmem:[#allocation6 + $0x29] sm:$0x1] %vm766_vm4, %v4721_v3 }
  0x34   :  { %2113 = vst.msk [vmem:[#allocation6 + $0x39] sm:$0x1] %vm766_vm4, %v4721_v3  ;;  %2114 = vst.msk [vmem:[#allocation6 + $0x49] sm:$0x1] %vm766_vm4, %v4721_v3 }
  0x35   :  { %2115 = vst.msk [vmem:[#allocation6 + $0x59] sm:$0x1] %vm766_vm4, %v4721_v3  ;;  %2116 = vst.msk [vmem:[#allocation6 + $0x69] sm:$0x1] %vm766_vm4, %v4721_v3 }
  0x36   :  { %193 = vrot.lane.b32.xlu0 %v269_v21, %s4722_s22  ;;  %2117 = vst.msk [vmem:[#allocation6 + $0x79] sm:$0x1] %vm766_vm4, %v4721_v3  ;;  %2118 = vst.msk [vmem:[#allocation6 + $0x89] sm:$0x1] %vm766_vm4, %v4721_v3 }
  0x37   :  { %195 = vrot.lane.b32.xlu1 %v172_v54, %s4722_s22  ;;  %3222 = vst.msk [vmem:[#allocation8 + $0x10] sm:$0x1] %vm766_vm4, %v4721_v3  ;;  %3223 = vst.msk [vmem:[#allocation8 + $0x20] sm:$0x1] %vm766_vm4, %v4721_v3 }
  0x38   :  { %3224 = vst.msk [vmem:[#allocation8 + $0x30] sm:$0x1] %vm766_vm4, %v4721_v3  ;;  %3225 = vst.msk [vmem:[#allocation8 + $0x40] sm:$0x1] %vm766_vm4, %v4721_v3 }
  0x39   :  { %3226 = vst.msk [vmem:[#allocation8 + $0x50] sm:$0x1] %vm766_vm4, %v4721_v3  ;;  %3227 = vst.msk [vmem:[#allocation8 + $0x60] sm:$0x1] %vm766_vm4, %v4721_v3 }
  0x3a   :  { %243 = vrot.lane.b32.xlu0 %v221_v22, %s4723_s23  ;;  %3228 = vst.msk [vmem:[#allocation8 + $0x70] sm:$0x1] %vm766_vm4, %v4721_v3  ;;  %3229 = vst.msk [vmem:[#allocation8 + $0x80] sm:$0x1] %vm766_vm4, %v4721_v3 }
  0x3b   :  { %245 = vrot.lane.b32.xlu1 %v5071_v2, %s4723_s23  ;;  %3232 = vst.msk [vmem:[#allocation8 + $0x19] sm:$0x1] %vm766_vm4, %v4721_v3  ;;  %3233 = vst.msk [vmem:[#allocation8 + $0x29] sm:$0x1] %vm766_vm4, %v4721_v3 }
  0x3c   :  { %3234 = vst.msk [vmem:[#allocation8 + $0x39] sm:$0x1] %vm766_vm4, %v4721_v3  ;;  %3235 = vst.msk [vmem:[#allocation8 + $0x49] sm:$0x1] %vm766_vm4, %v4721_v3 }
  0x3d   :  { %3236 = vst.msk [vmem:[#allocation8 + $0x59] sm:$0x1] %vm766_vm4, %v4721_v3  ;;  %3237 = vst.msk [vmem:[#allocation8 + $0x69] sm:$0x1] %vm766_vm4, %v4721_v3 }
  0x3e   :  { %292 = vrot.lane.b32.xlu0 %v172_v54, %s4724_s3  ;;  %3238 = vst.msk [vmem:[#allocation8 + $0x79] sm:$0x1] %vm766_vm4, %v4721_v3  ;;  %3239 = vst.msk [vmem:[#allocation8 + $0x89] sm:$0x1] %vm766_vm4, %v4721_v3 }
  0x3f   :  { %294 = vrot.lane.b32.xlu1 %v5077_v60, %s4724_s3  ;;  %777 = vst.msk [vmem:[#allocation4 + $0x9] sm:$0x1] %vm766_vm4, %v4721_v3  ;;  %767 = vst.msk [vmem:[#allocation4] sm:$0x1] %vm766_vm4, %v4721_v3 }
  0x40   :  { %776 = vst.msk [vmem:[#allocation4 + $0x90] sm:$0x1] %vm766_vm4, %v4721_v3  ;;  %786 = vst.msk [vmem:[#allocation4 + $0x99] sm:$0x1] %vm766_vm4, %v4721_v3 }
  0x41   :  { %2100 = vst.msk [vmem:[#allocation6] sm:$0x1] %vm766_vm4, %v4721_v3  ;;  %2109 = vst.msk [vmem:[#allocation6 + $0x90] sm:$0x1] %vm766_vm4, %v4721_v3 }
  0x42   :  { %353 = vrot.lane.b32.xlu0 %v337_v62, %s4722_s22  ;;  %2110 = vst.msk [vmem:[#allocation6 + $0x9] sm:$0x1] %vm766_vm4, %v4721_v3  ;;  %2119 = vst.msk [vmem:[#allocation6 + $0x99] sm:$0x1] %vm766_vm4, %v4721_v3 }
  0x43   :  { %355 = vrot.lane.b32.xlu1 %v338_v0, %s4722_s22  ;;  %3221 = vst.msk [vmem:[#allocation8] sm:$0x1] %vm766_vm4, %v4721_v3  ;;  %3230 = vst.msk [vmem:[#allocation8 + $0x90] sm:$0x1] %vm766_vm4, %v4721_v3 }
  0x44   :  { %3231 = vst.msk [vmem:[#allocation8 + $0x9] sm:$0x1] %vm766_vm4, %v4721_v3  ;;  %3240 = vst.msk [vmem:[#allocation8 + $0x99] sm:$0x1] %vm766_vm4, %v4721_v3  ;;  %vm1837_vm4 = vcmask 588800  }
  0x46   :  { %401 = vrot.lane.b32.xlu0 %v385_v24, %s4723_s23  ;;  %v861_v3 = vld [vmem:[#allocation4 + $0x2] sm:$0xff] }
  0x47   :  { %403 = vrot.lane.b32.xlu1 %v386_v25, %s4723_s23 }
  0x4a   :  { %449 = vrot.lane.b32.xlu0 %v338_v0, %s4724_s3 }
  0x4b   :  { %451 = vrot.lane.b32.xlu1 %v434_v5, %s4724_s3 }
  0x4e   :  { %357 = vrot.lane.b32.xlu0 %v434_v5, %s4722_s22 }
  0x4f   :  { %359 = vrot.lane.b32.xlu1 %v340_v6, %s4722_s22 }
  0x52   :  { %405 = vrot.lane.b32.xlu0 %v387_v26, %s4723_s23 }
  0x53   :  { %407 = vrot.lane.b32.xlu1 %v388_v27, %s4723_s23 }
  0x56   :  { %453 = vrot.lane.b32.xlu0 %v340_v6, %s4724_s3 }
  0x57   :  { %455 = vrot.lane.b32.xlu1 %v436_v7, %s4724_s3 }
  0x5a   :  { %361 = vrot.lane.b32.xlu0 %v436_v7, %s4722_s22 }
  0x5b   :  { %363 = vrot.lane.b32.xlu1 %v342_v9, %s4722_s22 }
  0x5e   :  { %409 = vrot.lane.b32.xlu0 %v389_v46, %s4723_s23 }
  0x5f   :  { %411 = vrot.lane.b32.xlu1 %v390_v34, %s4723_s23 }
  0x62   :  { %457 = vrot.lane.b32.xlu0 %v342_v9, %s4724_s3 }
  0x63   :  { %459 = vrot.lane.b32.xlu1 %v5102_v10, %s4724_s3 }
  0x66   :  { %365 = vrot.lane.b32.xlu0 %v5102_v10, %s4722_s22 }
  0x67   :  { %367 = vrot.lane.b32.xlu1 %v344_v11, %s4722_s22 }
  0x6a   :  { %413 = vrot.lane.b32.xlu0 %v5079_v61, %s4723_s23 }
  0x6b   :  { %415 = vrot.lane.b32.xlu1 %v5071_v2, %s4723_s23 }
  0x6e   :  { %461 = vrot.lane.b32.xlu0 %v344_v11, %s4724_s3 }
  0x6f   :  { %463 = vrot.lane.b32.xlu1 %v5077_v60, %s4724_s3 }
  0x72   :  { %828 = vrot.lane.b32.xlu0 %v812_v12, %s4725_s0 }
  0x73   :  { %1245 = vrot.lane.b32.xlu1 %v812_v12, %s4725_s0 }
  0x76   :  { %877 = vrot.lane.b32.xlu0 %v861_v3, %s4722_s22 }
  0x77   :  { %1293 = vrot.lane.b32.xlu1 %v861_v3, %s4722_s22 }
  0x84   :  { %v182_v13 = vpop.permute.xlu0 %181  ;;  %v232_v15 = vpop.permute.xlu1 %231 }
  0x85   :  { %206 = vst.msk [vmem:[#allocation3] sm:$0xff] %vm205_vm5, %v182_v13 }
  0x86   :  { %256 = vst.msk [vmem:[#allocation3] sm:$0xff] %vm255_vm6, %v232_v15 }
  0x88   :  { %v184_v19 = vpop.permute.xlu0 %183 }
  0x89   :  { %207 = vst.msk [vmem:[#allocation3 + $0x8] sm:$0xff] %vm205_vm5, %v184_v19  ;;  %v234_v20 = vpop.permute.xlu1 %233 }
  0x8a   :  { %257 = vst.msk [vmem:[#allocation3 + $0x8] sm:$0xff] %vm255_vm6, %v234_v20 }
  0x8c   :  { %v281_v21 = vpop.permute.xlu0 %280 }
  0x8d   :  { %305 = vst.msk [vmem:[#allocation3] sm:$0xff] %vm304_vm7, %v281_v21  ;;  %v283_v22 = vpop.permute.xlu1 %282 }
  0x8e   :  { %306 = vst.msk [vmem:[#allocation3 + $0x8] sm:$0xff] %vm304_vm7, %v283_v22 }
  0x90   :  { %v186_v24 = vpop.permute.xlu0 %185 }
  0x91   :  { %208 = vst.msk [vmem:[#allocation3 + $0x10] sm:$0xff] %vm205_vm5, %v186_v24  ;;  %v188_v25 = vpop.permute.xlu1 %187 }
  0x92   :  { %209 = vst.msk [vmem:[#allocation3 + $0x18] sm:$0xff] %vm205_vm5, %v188_v25 }
  0x94   :  { %v481_v26 = vld [vmem:[#allocation3] sm:$0xff]  ;;  %v236_v27 = vpop.permute.xlu0 %235 }
  0x95   :  { %4518 = vmatprep.mubr.msk.f32.mxu0 %vm505_vm8, %v481_v26  ;;  %v482_v32 = vld [vmem:[#allocation3 + $0x8] sm:$0xff]  ;;  %258 = vst.msk [vmem:[#allocation3 + $0x10] sm:$0xff] %vm255_vm6, %v236_v27  ;;  %v238_v34 = vpop.permute.xlu1 %237 }
  0x96   :  { %4519 = vmatmul.mubr.msk.f32.vlgmr.msra.gmra.mxu0 %vm505_vm8, %v482_v32  ;;  %259 = vst.msk [vmem:[#allocation3 + $0x18] sm:$0xff] %vm255_vm6, %v238_v34 }
  0x98   :  { %v285_v35 = vpop.permute.xlu0 %284 }
  0x99   :  { %307 = vst.msk [vmem:[#allocation3 + $0x10] sm:$0xff] %vm304_vm7, %v285_v35  ;;  %v287_v38 = vpop.permute.xlu1 %286 }
  0x9a   :  { %308 = vst.msk [vmem:[#allocation3 + $0x18] sm:$0xff] %vm304_vm7, %v287_v38 }
  0x9c   :  { %v190_v42 = vpop.permute.xlu0 %189 }
  0x9d   :  { %210 = vst.msk [vmem:[#allocation3 + $0x20] sm:$0xff] %vm205_vm5, %v190_v42  ;;  %v192_v45 = vpop.permute.xlu1 %191 }
  0x9e   :  { %211 = vst.msk [vmem:[#allocation3 + $0x28] sm:$0xff] %vm205_vm5, %v192_v45 }
  0xa0   :  { %v483_v46 = vld [vmem:[#allocation3 + $0x10] sm:$0xff]  ;;  %v240_v54 = vpop.permute.xlu0 %239 }
  0xa1   :  { %4521 = vmatprep.mubr.msk.f32.mxu0 %vm505_vm8, %v483_v46  ;;  %v484_v2 = vld [vmem:[#allocation3 + $0x18] sm:$0xff]  ;;  %260 = vst.msk [vmem:[#allocation3 + $0x20] sm:$0xff] %vm255_vm6, %v240_v54  ;;  %v242_v4 = vpop.permute.xlu1 %241 }
  0xa2   :  { %4522 = vmatmul.mubr.msk.f32.gmra.mxu0 %vm505_vm8, %v484_v2  ;;  %261 = vst.msk [vmem:[#allocation3 + $0x28] sm:$0xff] %vm255_vm6, %v242_v4 }
  0xa4   :  { %v289_v60 = vpop.permute.xlu0 %288 }
  0xa5   :  { %309 = vst.msk [vmem:[#allocation3 + $0x20] sm:$0xff] %vm304_vm7, %v289_v60  ;;  %v291_v61 = vpop.permute.xlu1 %290 }
  0xa6   :  { %310 = vst.msk [vmem:[#allocation3 + $0x28] sm:$0xff] %vm304_vm7, %v291_v61 }
  0xa8   :  { %v194_v62 = vpop.permute.xlu0 %193 }
  0xa9   :  { %212 = vst.msk [vmem:[#allocation3 + $0x30] sm:$0xff] %vm205_vm5, %v194_v62  ;;  %v196_v0 = vpop.permute.xlu1 %195 }
  0xaa   :  { %213 = vst.msk [vmem:[#allocation3 + $0x38] sm:$0xff] %vm205_vm5, %v196_v0  ;;  %v1065_v0 = vld [vmem:[#allocation4 + $0x90] sm:$0xff] }
  0xab   :  { %1088 = vrot.lane.b32.xlu0 %v1065_v0, %s4724_s3  ;;  %1499 = vrot.lane.b32.xlu1 %v1065_v0, %s4724_s3 }
  0xac   :  { %v485_v5 = vld [vmem:[#allocation3 + $0x20] sm:$0xff]  ;;  %v244_v6 = vpop.permute.xlu0 %243 }
  0xad   :  { %4524 = vmatprep.mubr.msk.f32.mxu0 %vm505_vm8, %v485_v5  ;;  %v486_v7 = vld [vmem:[#allocation3 + $0x28] sm:$0xff]  ;;  %262 = vst.msk [vmem:[#allocation3 + $0x30] sm:$0xff] %vm255_vm6, %v244_v6  ;;  %v246_v9 = vpop.permute.xlu1 %245 }
  0xae   :  { %4525 = vmatmul.mubr.msk.f32.gmra.mxu0 %vm505_vm8, %v486_v7  ;;  %263 = vst.msk [vmem:[#allocation3 + $0x38] sm:$0xff] %vm255_vm6, %v246_v9  ;;  %v1114_v9 = vld [vmem:[#allocation4 + $0x91] sm:$0xff] }
  0xaf   :  { %1137 = vrot.lane.b32.xlu0 %v1114_v9, %s4726_s29  ;;  %1547 = vrot.lane.b32.xlu1 %v1114_v9, %s4726_s29 }
  0xb0   :  { %v293_v10 = vpop.permute.xlu0 %292 }
  0xb1   :  { %311 = vst.msk [vmem:[#allocation3 + $0x30] sm:$0xff] %vm304_vm7, %v293_v10  ;;  %v295_v11 = vpop.permute.xlu1 %294 }
  0xb2   :  { %312 = vst.msk [vmem:[#allocation3 + $0x38] sm:$0xff] %vm304_vm7, %v295_v11 }
  0xb4   :  { %v354_v12 = vpop.permute.xlu0 %353 }
  0xb5   :  { %377 = vst.msk [vmem:[#allocation3 + $0x40] sm:$0xff] %vm205_vm5, %v354_v12  ;;  %v356_v3 = vpop.permute.xlu1 %355  ;;  %v1163_v12 = vld [vmem:[#allocation4 + $0x92] sm:$0xff] }
  0xb6   :  { %378 = vst.msk [vmem:[#allocation3 + $0x48] sm:$0xff] %vm205_vm5, %v356_v3  ;;  %1186 = vrot.lane.b32.xlu0 %v1163_v12, %s4727_s30 }
  0xb8   :  { %v487_v13 = vld [vmem:[#allocation3 + $0x30] sm:$0xff]  ;;  %v402_v15 = vpop.permute.xlu0 %401 }
  0xb9   :  { %4527 = vmatprep.mubr.msk.f32.mxu0 %vm505_vm8, %v487_v13  ;;  %v488_v19 = vld [vmem:[#allocation3 + $0x38] sm:$0xff]  ;;  %425 = vst.msk [vmem:[#allocation3 + $0x40] sm:$0xff] %vm255_vm6, %v402_v15  ;;  %v404_v20 = vpop.permute.xlu1 %403 }
  0xba   :  { %4528 = vmatmul.mubr.msk.f32.gmra.mxu0 %vm505_vm8, %v488_v19  ;;  %426 = vst.msk [vmem:[#allocation3 + $0x48] sm:$0xff] %vm255_vm6, %v404_v20  ;;  %v796_v20 = vld [vmem:[#allocation4] sm:$0xff] }
  0xbb   :  { %804 = vst.msk [vmem:[#allocation5] sm:$0xff] %vm759_vm2, %v796_v20  ;;  %1221 = vst.msk [vmem:[#allocation5 + $0x40] sm:$0xff] %vm759_vm2, %v796_v20  ;;  %v1636_v20 = vld [vmem:[%s6869_s6 + $0x38] sm:$0xff] }
  0xbc   :  { %v450_v21 = vpop.permute.xlu0 %449 }
  0xbd   :  { %473 = vst.msk [vmem:[#allocation3 + $0x40] sm:$0xff] %vm304_vm7, %v450_v21  ;;  %v452_v22 = vpop.permute.xlu1 %451 }
  0xbe   :  { %474 = vst.msk [vmem:[#allocation3 + $0x48] sm:$0xff] %vm304_vm7, %v452_v22 }
  0xc0   :  { %v358_v24 = vpop.permute.xlu0 %357 }
  0xc1   :  { %379 = vst.msk [vmem:[#allocation3 + $0x50] sm:$0xff] %vm205_vm5, %v358_v24  ;;  %v360_v25 = vpop.permute.xlu1 %359 }
  0xc2   :  { %380 = vst.msk [vmem:[#allocation3 + $0x58] sm:$0xff] %vm205_vm5, %v360_v25 }
  0xc4   :  { %v489_v26 = vld [vmem:[#allocation3 + $0x40] sm:$0xff]  ;;  %v406_v27 = vpop.permute.xlu0 %405 }
  0xc5   :  { %4530 = vmatprep.mubr.msk.f32.mxu0 %vm505_vm8, %v489_v26  ;;  %v490_v32 = vld [vmem:[#allocation3 + $0x48] sm:$0xff]  ;;  %427 = vst.msk [vmem:[#allocation3 + $0x50] sm:$0xff] %vm255_vm6, %v406_v27  ;;  %v408_v34 = vpop.permute.xlu1 %407  ;;  %v5337_v26 = vld [vmem:[%s6866_s4] ss:$0 sm:$0xff] }
  0xc6   :  { %4531 = vmatmul.mubr.msk.f32.gmra.mxu0 %vm505_vm8, %v490_v32  ;;  %428 = vst.msk [vmem:[#allocation3 + $0x58] sm:$0xff] %vm255_vm6, %v408_v34  ;;  %v5342_v27 = vld [vmem:[%s6867_s5] ss:$0 sm:$0xff] }
  0xc8   :  { %v454_v35 = vpop.permute.xlu0 %453 }
  0xc9   :  { %475 = vst.msk [vmem:[#allocation3 + $0x50] sm:$0xff] %vm304_vm7, %v454_v35  ;;  %v456_v38 = vpop.permute.xlu1 %455 }
  0xca   :  { %476 = vst.msk [vmem:[#allocation3 + $0x58] sm:$0xff] %vm304_vm7, %v456_v38 }
  0xcc   :  { %v362_v42 = vpop.permute.xlu0 %361 }
  0xcd   :  { %381 = vst.msk [vmem:[#allocation3 + $0x60] sm:$0xff] %vm205_vm5, %v362_v42  ;;  %v364_v45 = vpop.permute.xlu1 %363 }
  0xce   :  { %382 = vst.msk [vmem:[#allocation3 + $0x68] sm:$0xff] %vm205_vm5, %v364_v45 }
  0xd0   :  { %v491_v46 = vld [vmem:[#allocation3 + $0x50] sm:$0xff]  ;;  %v410_v54 = vpop.permute.xlu0 %409 }
  0xd1   :  { %4533 = vmatprep.mubr.msk.f32.mxu0 %vm505_vm8, %v491_v46  ;;  %v492_v2 = vld [vmem:[#allocation3 + $0x58] sm:$0xff]  ;;  %429 = vst.msk [vmem:[#allocation3 + $0x60] sm:$0xff] %vm255_vm6, %v410_v54  ;;  %v412_v4 = vpop.permute.xlu1 %411 }
  0xd2   :  { %4534 = vmatmul.mubr.msk.f32.gmra.mxu0 %vm505_vm8, %v492_v2  ;;  %430 = vst.msk [vmem:[#allocation3 + $0x68] sm:$0xff] %vm255_vm6, %v412_v4 }
  0xd4   :  { %v458_v60 = vpop.permute.xlu0 %457 }
  0xd5   :  { %477 = vst.msk [vmem:[#allocation3 + $0x60] sm:$0xff] %vm304_vm7, %v458_v60  ;;  %v460_v61 = vpop.permute.xlu1 %459  ;;  %v1638_v60 = vld [vmem:[%s6868_s7] sm:$0xf]  ;;  %s4729_s7 = smov 40  }
  0xd6   :  { %478 = vst.msk [vmem:[#allocation3 + $0x68] sm:$0xff] %vm304_vm7, %v460_v61  ;;  %4542 = vmatprep.subr.msk.mxu1 %vm1688_vm11, %v1638_v60 }
  0xd7   :  { %4543 = vmatpush3.msk.msra.mxu1 %vm1688_vm11, %v1638_v60 }
  0xd8   :  { %v366_v62 = vpop.permute.xlu0 %365  ;;  %4545 = vmatmul.mubr.msk.f32.vlgmr.msra.gmra.mxu1 %vm1639_vm12, %v112_v28 }
  0xd9   :  { %383 = vst.msk [vmem:[#allocation3 + $0x70] sm:$0xff] %vm205_vm5, %v366_v62  ;;  %v368_v5 = vpop.permute.xlu1 %367  ;;  %4547 = vmatprep.mubr.msk.f32.mxu1 %vm1639_vm12, %v113_v29 }
  0xda   :  { %384 = vst.msk [vmem:[#allocation3 + $0x78] sm:$0xff] %vm205_vm5, %v368_v5 }
  0xdc   :  { %v493_v6 = vld [vmem:[#allocation3 + $0x60] sm:$0xff]  ;;  %v414_v7 = vpop.permute.xlu0 %413  ;;  %4548 = vmatmul.mubr.msk.f32.gmra.mxu1 %vm1639_vm12, %v114_v40 }
  0xdd   :  { %4536 = vmatprep.mubr.msk.f32.mxu0 %vm505_vm8, %v493_v6  ;;  %v494_v10 = vld [vmem:[#allocation3 + $0x68] sm:$0xff]  ;;  %431 = vst.msk [vmem:[#allocation3 + $0x70] sm:$0xff] %vm255_vm6, %v414_v7  ;;  %v416_v11 = vpop.permute.xlu1 %415  ;;  %4550 = vmatprep.mubr.msk.f32.mxu1 %vm1639_vm12, %v115_v41 }
  0xde   :  { %4537 = vmatmul.mubr.msk.f32.gmra.mxu0 %vm505_vm8, %v494_v10  ;;  %432 = vst.msk [vmem:[#allocation3 + $0x78] sm:$0xff] %vm255_vm6, %v416_v11 }
  0xe0   :  { %v462_v3 = vpop.permute.xlu0 %461  ;;  %4551 = vmatmul.mubr.msk.f32.gmra.mxu1 %vm1639_vm12, %v116_v52 }
  0xe1   :  { %479 = vst.msk [vmem:[#allocation3 + $0x70] sm:$0xff] %vm304_vm7, %v462_v3  ;;  %v464_v13 = vpop.permute.xlu1 %463  ;;  %4553 = vmatprep.mubr.msk.f32.mxu1 %vm1639_vm12, %v117_v56 }
  0xe2   :  { %480 = vst.msk [vmem:[#allocation3 + $0x78] sm:$0xff] %vm304_vm7, %v464_v13 }
  0xe4   :  { %v829_v21 = vpop.permute.xlu0 %828  ;;  %4554 = vmatmul.mubr.msk.f32.gmra.mxu1 %vm1639_vm12, %v118_v59 }
  0xe5   :  { %853 = vst.msk [vmem:[#allocation5] sm:$0xff] %vm852_vm9, %v829_v21  ;;  %v1246_v22 = vpop.permute.xlu1 %1245  ;;  %4556 = vmatprep.mubr.msk.f32.mxu1 %vm1639_vm12, %v119_v50  ;;  %v1635_v21 = vld [vmem:[%s6869_s6 + $0x30] sm:$0xff] }
  0xe6   :  { %1269 = vst.msk [vmem:[#allocation5 + $0x40] sm:$0xff] %vm852_vm9, %v1246_v22 }
  0xe8   :  { %v495_v15 = vld [vmem:[#allocation3 + $0x70] sm:$0xff]  ;;  %v878_v24 = vpop.permute.xlu0 %877  ;;  %4557 = vmatmul.mubr.msk.f32.gmra.mxu1 %vm1639_vm12, %v120_v55 }
  0xe9   :  { %4539 = vmatprep.mubr.msk.f32.mxu0 %vm505_vm8, %v495_v15  ;;  %v496_v19 = vld [vmem:[#allocation3 + $0x78] sm:$0xff]  ;;  %902 = vst.msk [vmem:[#allocation5] sm:$0xff] %vm901_vm10, %v878_v24  ;;  %v1294_v25 = vpop.permute.xlu1 %1293  ;;  %4559 = vmatprep.mubr.msk.f32.mxu1 %vm1639_vm12, %v121_v58  ;;  %v1637_v15 = vld [vmem:[%s6869_s6 + $0x40] sm:$0xff] }
  0xea   :  { %4540 = vmatmul.mubr.msk.f32.gmra.mxu0 %vm505_vm8, %v496_v19  ;;  %1317 = vst.msk [vmem:[#allocation5 + $0x40] sm:$0xff] %vm901_vm10, %v1294_v25  ;;  %4568 = vmatprep.subr.mxu1 %v1637_v15  ;;  %v1634_v25 = vld [vmem:[%s6869_s6 + $0x28] sm:$0xff] }
  0xeb   :  { %4569 = vmatpush3.msra.mxu1 %v1637_v15 }
  0xec   :  { %4560 = vmatmul.mubr.msk.f32.gmra.mxu1 %vm1639_vm12, %v122_v1  ;;  %4570 = vmatprep.subr.mxu1 %v1636_v20 }
  0xed   :  { %4562 = vmatprep.mubr.msk.f32.mxu1 %vm1639_vm12, %v123_v8  ;;  %4571 = vmatpush3.msra.mxu1 %v1636_v20 }
  0xee   :  { %4572 = vmatprep.subr.mxu1 %v1635_v21 }
  0xef   :  { %4573 = vmatpush3.msra.mxu1 %v1635_v21 }
  0xf0   :  { %4563 = vmatmul.mubr.msk.f32.gmra.mxu1 %vm1639_vm12, %v124_v37  ;;  %4574 = vmatprep.subr.mxu1 %v1634_v25 }
  0xf1   :  { %4565 = vmatprep.mubr.msk.f32.mxu1 %vm1639_vm12, %v125_v16  ;;  %4575 = vmatpush3.msra.mxu1 %v1634_v25 }
  0xf4   :  { %4566 = vmatmul.mubr.msk.f32.gmra.mxu1 %vm1639_vm12, %v126_v49 }
 0x156   :  { %v4520_v32 = vpop.f32.mrf.mxu0 }
 0x157   :  { %v706_v34 = vmul.f32 %v4520_v32, %v5337_v26 }
 0x158   :  { %v620_v35 = vpop.f32.mrf.mxu0 }
 0x159   :  { %v728_v38 = vadd.f32 %v5342_v27, %v706_v34  ;;  %v705_v42 = vmul.f32 %v5337_v26, %v620_v35 }
 0x15b   :  { %v744_v45 = vmax.f32 %v728_v38, 0.0  ;;  %v727_v46 = vadd.f32 %v5342_v27, %v705_v42  ;;  %v1633_v42 = vld [vmem:[%s6869_s6 + $0x20] sm:$0xff] }
 0x15c   :  { %4576 = vmatprep.subr.mxu1 %v1633_v42 }
 0x15d   :  { %789 = vst.msk [vmem:[#allocation4 + $0x21] sm:$0xff] %vm759_vm2, %v744_v45  ;;  %v743_v54 = vmax.f32 %v727_v46, 0.0  ;;  %4577 = vmatpush3.msra.mxu1 %v1633_v42 }
 0x15f   :  { %788 = vst.msk [vmem:[#allocation4 + $0x11] sm:$0xff] %vm759_vm2, %v743_v54 }
 0x162   :  { %v4523_v2 = vpop.f32.mrf.mxu0 }
 0x163   :  { %v708_v4 = vmul.f32 %v4523_v2, %v5337_v26 }
 0x164   :  { %v960_v61 = vld [vmem:[#allocation4 + $0x21] sm:$0xff]  ;;  %v630_v0 = vpop.f32.mrf.mxu0 }
 0x165   :  { %v911_v62 = vld [vmem:[#allocation4 + $0x20] sm:$0xff]  ;;  %977 = vrot.lane.b32.xlu0 %v960_v61, %s4723_s23  ;;  %v730_v5 = vadd.f32 %v5342_v27, %v708_v4  ;;  %v707_v6 = vmul.f32 %v5337_v26, %v630_v0  ;;  %v1632_v4 = vld [vmem:[%s6869_s6 + $0x18] sm:$0xff]  ;;  %v1630_v0 = vld [vmem:[%s6869_s6 + $0x8] sm:$0xff] }
 0x166   :  { %928 = vrot.lane.b32.xlu1 %v911_v62, %s4728_s1  ;;  %806 = vst.msk [vmem:[#allocation5 + $0x10] sm:$0xff] %vm759_vm2, %v911_v62  ;;  %v910_v7 = vld [vmem:[#allocation4 + $0x10] sm:$0xff]  ;;  %v1009_v11 = vld [vmem:[#allocation4 + $0x22] sm:$0xff]  ;;  %4578 = vmatprep.subr.mxu1 %v1632_v4 }
 0x167   :  { %v746_v9 = vmax.f32 %v730_v5, 0.0  ;;  %v729_v10 = vadd.f32 %v5342_v27, %v707_v6  ;;  %805 = vst.msk [vmem:[#allocation5 + $0x8] sm:$0xff] %vm759_vm2, %v910_v7  ;;  %v959_v23 = vld [vmem:[#allocation4 + $0x11] sm:$0xff]  ;;  %4579 = vmatpush3.msra.mxu1 %v1632_v4 }
 0x168   :  { %v862_v1 = vld [vmem:[#allocation4 + $0x12] sm:$0xff] }
 0x169   :  { %791 = vst.msk [vmem:[#allocation4 + $0x41] sm:$0xff] %vm759_vm2, %v746_v9  ;;  %1026 = vrot.lane.b32.xlu0 %v1009_v11, %s4729_s7  ;;  %v745_v14 = vmax.f32 %v729_v10, 0.0  ;;  %v1629_v9 = vld [vmem:[%s6869_s6] sm:$0xff] }
 0x16a   :  { %832 = vrot.lane.b32.xlu1 %v960_v61, %s4725_s0 }
 0x16b   :  { %790 = vst.msk [vmem:[#allocation4 + $0x31] sm:$0xff] %vm759_vm2, %v745_v14 }
 0x16d   :  { %926 = vrot.lane.b32.xlu0 %v910_v7, %s4728_s1 }
 0x16e   :  { %881 = vrot.lane.b32.xlu1 %v1009_v11, %s4722_s22  ;;  %v4526_v17 = vpop.f32.mrf.mxu0 }
 0x16f   :  { %v710_v18 = vmul.f32 %v4526_v17, %v5337_v26 }
 0x170   :  { %v5386_v28 = vld [vmem:[#allocation4 + $0x40] sm:$0xff]  ;;  %v640_v29 = vpop.f32.mrf.mxu0 }
 0x171   :  { %975 = vrot.lane.b32.xlu0 %v959_v23, %s4723_s23  ;;  %808 = vst.msk [vmem:[#allocation5 + $0x20] sm:$0xff] %vm759_vm2, %v5386_v28  ;;  %v732_v30 = vadd.f32 %v5342_v27, %v710_v18  ;;  %v709_v31 = vmul.f32 %v5337_v26, %v640_v29  ;;  %v5412_v52 = vld [vmem:[#allocation4 + $0x41] sm:$0xff] }
 0x172   :  { %1074 = vrot.lane.b32.xlu1 %v911_v62, %s4724_s3  ;;  %v5397_v40 = vld [vmem:[#allocation4 + $0x30] sm:$0xff]  ;;  %v5424_v33 = vld [vmem:[#allocation4 + $0x42] sm:$0xff] }
 0x173   :  { %v748_v41 = vmax.f32 %v732_v30, 0.0  ;;  %v731_v44 = vadd.f32 %v5342_v27, %v709_v31  ;;  %807 = vst.msk [vmem:[#allocation5 + $0x18] sm:$0xff] %vm759_vm2, %v5397_v40  ;;  %v5442_v57 = vld [vmem:[#allocation4 + $0x31] sm:$0xff] }
 0x174   :  { %v5459_v12 = vld [vmem:[#allocation4 + $0x32] sm:$0xff] }
 0x175   :  { %932 = vrot.lane.b32.xlu0 %v5386_v28, %s4728_s1  ;;  %793 = vst.msk [vmem:[#allocation4 + $0x61] sm:$0xff] %vm759_vm2, %v748_v41  ;;  %v747_v47 = vmax.f32 %v731_v44, 0.0 }
 0x176   :  { %1123 = vrot.lane.b32.xlu1 %v960_v61, %s4726_s29  ;;  %v1631_v61 = vld [vmem:[%s6869_s6 + $0x10] sm:$0xff] }
 0x177   :  { %792 = vst.msk [vmem:[#allocation4 + $0x51] sm:$0xff] %vm759_vm2, %v747_v47  ;;  %4580 = vmatprep.subr.mxu1 %v1631_v61 }
 0x178   :  { %4581 = vmatpush3.msra.mxu1 %v1631_v61 }
 0x179   :  { %836 = vrot.lane.b32.xlu0 %v5412_v52, %s4725_s0  ;;  %4582 = vmatprep.subr.mxu1 %v1630_v0 }
 0x17a   :  { %1172 = vrot.lane.b32.xlu1 %v1009_v11, %s4727_s30  ;;  %v4529_v50 = vpop.f32.mrf.mxu0  ;;  %4583 = vmatpush3.msra.mxu1 %v1630_v0 }
 0x17b   :  { %v712_v53 = vmul.f32 %v4529_v50, %v5337_v26  ;;  %4584 = vmatprep.subr.mxu1 %v1629_v9 }
 0x17c   :  { %v5430_v39 = vld [vmem:[#allocation4 + $0x60] sm:$0xff]  ;;  %v650_v55 = vpop.f32.mrf.mxu0  ;;  %4585 = vmatpush3.msra.mxu1 %v1629_v9 }
 0x17d   :  { %1030 = vrot.lane.b32.xlu0 %v5424_v33, %s4729_s7  ;;  %810 = vst.msk [vmem:[#allocation5 + $0x30] sm:$0xff] %vm759_vm2, %v5430_v39  ;;  %v734_v43 = vadd.f32 %v5342_v27, %v712_v53  ;;  %v711_v56 = vmul.f32 %v5337_v26, %v650_v55  ;;  %v5516_v45 = vld [vmem:[#allocation4 + $0x61] sm:$0xff] }
 0x17e   :  { %830 = vrot.lane.b32.xlu1 %v959_v23, %s4725_s0  ;;  %v5444_v58 = vld [vmem:[#allocation4 + $0x50] sm:$0xff]  ;;  %v1013_v62 = vld [vmem:[#allocation4 + $0x62] sm:$0xff] }
 0x17f   :  { %v750_v59 = vmax.f32 %v734_v43, 0.0  ;;  %v733_v51 = vadd.f32 %v5342_v27, %v711_v56  ;;  %809 = vst.msk [vmem:[#allocation5 + $0x28] sm:$0xff] %vm759_vm2, %v5444_v58  ;;  %v817_v5 = vld [vmem:[#allocation4 + $0x51] sm:$0xff] }
 0x180   :  { %v866_v18 = vld [vmem:[#allocation4 + $0x52] sm:$0xff] }
 0x181   :  { %834 = vrot.lane.b32.xlu0 %v5442_v57, %s4725_s0  ;;  %795 = vst.msk [vmem:[#allocation4 + $0x81] sm:$0xff] %vm759_vm2, %v750_v59  ;;  %v749_v8 = vmax.f32 %v733_v51, 0.0 }
 0x182   :  { %879 = vrot.lane.b32.xlu1 %v862_v1, %s4722_s22 }
 0x183   :  { %794 = vst.msk [vmem:[#allocation4 + $0x71] sm:$0xff] %vm759_vm2, %v749_v8 }
 0x185   :  { %883 = vrot.lane.b32.xlu0 %v5459_v12, %s4722_s22 }
 0x186   :  { %1024 = vrot.lane.b32.xlu1 %v862_v1, %s4729_s7  ;;  %v4532_v63 = vpop.f32.mrf.mxu0 }
 0x187   :  { %v714_v16 = vmul.f32 %v4532_v63, %v5337_v26 }
 0x188   :  { %v660_v36 = vpop.f32.mrf.mxu0  ;;  %v917_v55 = vld [vmem:[#allocation4 + $0x80] sm:$0xff] }
 0x189   :  { %1076 = vrot.lane.b32.xlu0 %v5397_v40, %s4724_s3  ;;  %v736_v37 = vadd.f32 %v5342_v27, %v714_v16  ;;  %v713_v48 = vmul.f32 %v5337_v26, %v660_v36  ;;  %v966_v43 = vld [vmem:[#allocation4 + $0x81] sm:$0xff] }
 0x18a   :  { %981 = vrot.lane.b32.xlu1 %v5412_v52, %s4723_s23  ;;  %v5475_v49 = vld [vmem:[#allocation4 + $0x70] sm:$0xff]  ;;  %v1015_v56 = vld [vmem:[#allocation4 + $0x82] sm:$0xff] }
 0x18b   :  { %v752_v3 = vmax.f32 %v736_v37, 0.0  ;;  %v735_v13 = vadd.f32 %v5342_v27, %v713_v48  ;;  %811 = vst.msk [vmem:[#allocation5 + $0x38] sm:$0xff] %vm759_vm2, %v5475_v49  ;;  %v868_v59 = vld [vmem:[#allocation4 + $0x72] sm:$0xff] }
 0x18d   :  { %1125 = vrot.lane.b32.xlu0 %v5442_v57, %s4726_s29  ;;  %1206 = vst.msk [vmem:[#allocation4 + $0x21] sm:$0xff] %vm759_vm2, %v752_v3  ;;  %v751_v19 = vmax.f32 %v735_v13, 0.0 }
 0x18e   :  { %885 = vrot.lane.b32.xlu1 %v5424_v33, %s4722_s22 }
 0x18f   :  { %1205 = vst.msk [vmem:[#allocation4 + $0x11] sm:$0xff] %vm759_vm2, %v751_v19 }
 0x191   :  { %1028 = vrot.lane.b32.xlu0 %v5459_v12, %s4729_s7 }
 0x192   :  { %1078 = vrot.lane.b32.xlu1 %v5386_v28, %s4724_s3  ;;  %v4535_v22 = vpop.f32.mrf.mxu0 }
 0x193   :  { %v716_v24 = vmul.f32 %v4535_v22, %v5337_v26 }
 0x194   :  { %v5503_v32 = vld [vmem:[#allocation4 + $0x20] sm:$0xff]  ;;  %v670_v34 = vpop.f32.mrf.mxu0 }
 0x195   :  { %936 = vrot.lane.b32.xlu0 %v5430_v39, %s4728_s1  ;;  %v738_v35 = vadd.f32 %v5342_v27, %v716_v24  ;;  %v715_v38 = vmul.f32 %v5337_v26, %v670_v34  ;;  %1223 = vst.msk [vmem:[#allocation5 + $0x50] sm:$0xff] %vm759_vm2, %v5503_v32  ;;  %v1422_v36 = vld [vmem:[#allocation4 + $0x22] sm:$0xff] }
 0x196   :  { %1127 = vrot.lane.b32.xlu1 %v5412_v52, %s4726_s29  ;;  %v5518_v46 = vld [vmem:[#allocation4 + $0x10] sm:$0xff] }
 0x197   :  { %v754_v54 = vmax.f32 %v738_v35, 0.0  ;;  %v737_v2 = vadd.f32 %v5342_v27, %v715_v38  ;;  %1222 = vst.msk [vmem:[#allocation5 + $0x48] sm:$0xff] %vm759_vm2, %v5518_v46  ;;  %v1278_v20 = vld [vmem:[#allocation4 + $0x12] sm:$0xff] }
 0x199   :  { %840 = vrot.lane.b32.xlu0 %v5516_v45, %s4725_s0  ;;  %1208 = vst.msk [vmem:[#allocation4 + $0x41] sm:$0xff] %vm759_vm2, %v754_v54  ;;  %v753_v60 = vmax.f32 %v737_v2, 0.0 }
 0x19a   :  { %1176 = vrot.lane.b32.xlu1 %v5424_v33, %s4727_s30 }
 0x19b   :  { %1207 = vst.msk [vmem:[#allocation4 + $0x31] sm:$0xff] %vm759_vm2, %v753_v60 }
 0x19d   :  { %1034 = vrot.lane.b32.xlu0 %v1013_v62, %s4729_s7 }
 0x19e   :  { %930 = vrot.lane.b32.xlu1 %v5397_v40, %s4728_s1  ;;  %v4538_v6 = vpop.f32.mrf.mxu0 }
 0x19f   :  { %v718_v7 = vmul.f32 %v4538_v6, %v5337_v26 }
 0x1a0   :  { %v5545_v10 = vld [vmem:[#allocation4 + $0x40] sm:$0xff]  ;;  %v680_v11 = vpop.f32.mrf.mxu0 }
 0x1a1   :  { %838 = vrot.lane.b32.xlu0 %v817_v5, %s4725_s0  ;;  %v740_v14 = vadd.f32 %v5342_v27, %v718_v7  ;;  %v717_v17 = vmul.f32 %v5337_v26, %v680_v11  ;;  %1225 = vst.msk [vmem:[#allocation5 + $0x60] sm:$0xff] %vm759_vm2, %v5545_v10  ;;  %v5640_v24 = vld [vmem:[#allocation4 + $0x41] sm:$0xff] }
 0x1a2   :  { %979 = vrot.lane.b32.xlu1 %v5442_v57, %s4723_s23  ;;  %v5554_v23 = vld [vmem:[#allocation4 + $0x30] sm:$0xff]  ;;  %v5646_v35 = vld [vmem:[#allocation4 + $0x42] sm:$0xff] }
 0x1a3   :  { %v756_v28 = vmax.f32 %v740_v14, 0.0  ;;  %v739_v29 = vadd.f32 %v5342_v27, %v717_v17  ;;  %1224 = vst.msk [vmem:[#allocation5 + $0x58] sm:$0xff] %vm759_vm2, %v5554_v23  ;;  %v819_v57 = vld [vmem:[#allocation4 + $0x71] sm:$0xff] }
 0x1a4   :  { %v5662_v2 = vld [vmem:[#allocation4 + $0x32] sm:$0xff] }
 0x1a5   :  { %887 = vrot.lane.b32.xlu0 %v866_v18, %s4722_s22  ;;  %1210 = vst.msk [vmem:[#allocation4 + $0x61] sm:$0xff] %vm759_vm2, %v756_v28  ;;  %v755_v30 = vmax.f32 %v739_v29, 0.0 }
 0x1a6   :  { %1174 = vrot.lane.b32.xlu1 %v5459_v12, %s4727_s30  ;;  %v1374_v12 = vld [vmem:[#allocation4 + $0x21] sm:$0xff] }
 0x1a7   :  { %1209 = vst.msk [vmem:[#allocation4 + $0x51] sm:$0xff] %vm759_vm2, %v755_v30 }
 0x1a9   :  { %1080 = vrot.lane.b32.xlu0 %v5444_v58, %s4724_s3 }
 0x1aa   :  { %985 = vrot.lane.b32.xlu1 %v5516_v45, %s4723_s23  ;;  %v4541_v31 = vpop.f32.mrf.mxu0 }
 0x1ab   :  { %v720_v40 = vmul.f32 %v4541_v31, %v5337_v26 }
 0x1ac   :  { %v5569_v41 = vld [vmem:[#allocation4 + $0x60] sm:$0xff]  ;;  %v690_v44 = vpop.f32.mrf.mxu0 }
 0x1ad   :  { %1129 = vrot.lane.b32.xlu0 %v817_v5, %s4726_s29  ;;  %v742_v47 = vadd.f32 %v5342_v27, %v720_v40  ;;  %v719_v52 = vmul.f32 %v5337_v26, %v690_v44  ;;  %1227 = vst.msk [vmem:[#allocation5 + $0x70] sm:$0xff] %vm759_vm2, %v5569_v41  ;;  %v1235_v14 = vld [vmem:[#allocation4 + $0x61] sm:$0xff] }
 0x1ae   :  { %889 = vrot.lane.b32.xlu1 %v1013_v62, %s4722_s22  ;;  %v5577_v33 = vld [vmem:[#allocation4 + $0x50] sm:$0xff]  ;;  %v1426_v28 = vld [vmem:[#allocation4 + $0x62] sm:$0xff] }
 0x1af   :  { %v758_v50 = vmax.f32 %v742_v47, 0.0  ;;  %v741_v53 = vadd.f32 %v5342_v27, %v719_v52  ;;  %1226 = vst.msk [vmem:[#allocation5 + $0x68] sm:$0xff] %vm759_vm2, %v5577_v33  ;;  %v5713_v44 = vld [vmem:[#allocation4 + $0x52] sm:$0xff] }
 0x1b1   :  { %1032 = vrot.lane.b32.xlu0 %v866_v18, %s4729_s7  ;;  %1212 = vst.msk [vmem:[#allocation4 + $0x81] sm:$0xff] %vm759_vm2, %v758_v50  ;;  %v757_v26 = vmax.f32 %v741_v53, 0.0 }
 0x1b2   :  { %1082 = vrot.lane.b32.xlu1 %v5430_v39, %s4724_s3  ;;  %v5603_v39 = vpop.permute.xlu0 %1088 }
 0x1b3   :  { %1211 = vst.msk [vmem:[#allocation4 + $0x71] sm:$0xff] %vm759_vm2, %v757_v26 }
 0x1b5   :  { %940 = vrot.lane.b32.xlu0 %v917_v55, %s4728_s1 }
 0x1b6   :  { %1131 = vrot.lane.b32.xlu1 %v5516_v45, %s4726_s29  ;;  %v5610_v51 = vpop.permute.xlu0 %1137 }
 0x1b9   :  { %989 = vrot.lane.b32.xlu0 %v966_v43, %s4723_s23 }
 0x1ba   :  { %1180 = vrot.lane.b32.xlu1 %v1013_v62, %s4727_s30  ;;  %v5595_v27 = vld [vmem:[#allocation4 + $0x70] sm:$0xff]  ;;  %v5618_v8 = vpop.permute.xlu0 %1186 }
 0x1bb   :  { %1228 = vst.msk [vmem:[#allocation5 + $0x78] sm:$0xff] %vm759_vm2, %v5595_v27 }
 0x1bd   :  { %1038 = vrot.lane.b32.xlu0 %v1015_v56, %s4729_s7 }
 0x1be   :  { %934 = vrot.lane.b32.xlu1 %v5444_v58, %s4728_s1  ;;  %v5608_v58 = vpop.permute.xlu1 %1499 }
 0x1c1   :  { %842 = vrot.lane.b32.xlu0 %v819_v57, %s4725_s0 }
 0x1c2   :  { %983 = vrot.lane.b32.xlu1 %v817_v5, %s4723_s23  ;;  %v5616_v1 = vpop.permute.xlu1 %1547 }
 0x1c5   :  { %891 = vrot.lane.b32.xlu0 %v868_v59, %s4722_s22 }
 0x1c6   :  { %1178 = vrot.lane.b32.xlu1 %v866_v18, %s4727_s30 }
 0x1c9   :  { %1084 = vrot.lane.b32.xlu0 %v5475_v49, %s4724_s3 }
 0x1ca   :  { %1086 = vrot.lane.b32.xlu1 %v917_v55, %s4724_s3 }
 0x1cd   :  { %1133 = vrot.lane.b32.xlu0 %v819_v57, %s4726_s29 }
 0x1ce   :  { %1135 = vrot.lane.b32.xlu1 %v966_v43, %s4726_s29 }
 0x1d1   :  { %1182 = vrot.lane.b32.xlu0 %v868_v59, %s4727_s30 }
 0x1d2   :  { %1184 = vrot.lane.b32.xlu1 %v1015_v56, %s4727_s30 }
 0x1d5   :  { %1343 = vrot.lane.b32.xlu0 %v5503_v32, %s4728_s1 }
 0x1d6   :  { %938 = vrot.lane.b32.xlu1 %v5475_v49, %s4728_s1  ;;  %v1230_v49 = vld [vmem:[#allocation4 + $0x11] sm:$0xff] }
 0x1d7   :  { %v978_v63 = vpop.permute.xlu0 %977 }
 0x1d8   :  { %v929_v16 = vpop.permute.xlu1 %928 }
 0x1d9   :  { %1391 = vrot.lane.b32.xlu0 %v1374_v12, %s4723_s23 }
 0x1da   :  { %987 = vrot.lane.b32.xlu1 %v819_v57, %s4723_s23 }
 0x1db   :  { %v1027_v37 = vpop.permute.xlu0 %1026 }
 0x1dc   :  { %v833_v48 = vpop.permute.xlu1 %832 }
 0x1dd   :  { %855 = vst.msk [vmem:[#allocation5 + $0x10] sm:$0xff] %vm852_vm9, %v833_v48  ;;  %1439 = vrot.lane.b32.xlu0 %v1422_v36, %s4729_s7 }
 0x1de   :  { %1036 = vrot.lane.b32.xlu1 %v868_v59, %s4729_s7 }
 0x1df   :  { %v927_v13 = vpop.permute.xlu0 %926 }
 0x1e0   :  { %v882_v3 = vpop.permute.xlu1 %881  ;;  %951 = vst.msk [vmem:[#allocation5] sm:$0xff] %vm950_vm13, %v927_v13 }
 0x1e1   :  { %904 = vst.msk [vmem:[#allocation5 + $0x10] sm:$0xff] %vm901_vm10, %v882_v3  ;;  %1247 = vrot.lane.b32.xlu0 %v1230_v49, %s4725_s0 }
 0x1e2   :  { %1249 = vrot.lane.b32.xlu1 %v1374_v12, %s4725_s0 }
 0x1e3   :  { %v976_v19 = vpop.permute.xlu0 %975 }
 0x1e4   :  { %v1075_v15 = vpop.permute.xlu1 %1074  ;;  %1000 = vst.msk [vmem:[#allocation5] sm:$0xff] %vm999_vm14, %v976_v19  ;;  %v1236_v19 = vld [vmem:[#allocation4 + $0x71] sm:$0xff] }
 0x1e5   :  { %1295 = vrot.lane.b32.xlu0 %v1278_v20, %s4722_s22 }
 0x1e6   :  { %1297 = vrot.lane.b32.xlu1 %v1422_v36, %s4722_s22 }
 0x1e7   :  { %v933_v22 = vpop.permute.xlu0 %932 }
 0x1e8   :  { %v1124_v21 = vpop.permute.xlu1 %1123 }
 0x1e9   :  { %1347 = vrot.lane.b32.xlu0 %v5545_v10, %s4728_s1 }
 0x1ea   :  { %1485 = vrot.lane.b32.xlu1 %v5503_v32, %s4724_s3  ;;  %v5652_v32 = vld [vmem:[#allocation4 + $0x31] sm:$0xff] }
 0x1eb   :  { %v837_v34 = vpop.permute.xlu0 %836 }
 0x1ec   :  { %v1173_v25 = vpop.permute.xlu1 %1172  ;;  %857 = vst.msk [vmem:[#allocation5 + $0x20] sm:$0xff] %vm852_vm9, %v837_v34 }
 0x1ed   :  { %1253 = vrot.lane.b32.xlu0 %v5640_v24, %s4725_s0 }
 0x1ee   :  { %1533 = vrot.lane.b32.xlu1 %v1374_v12, %s4726_s29 }
 0x1ef   :  { %v1031_v42 = vpop.permute.xlu0 %1030 }
 0x1f0   :  { %v831_v38 = vpop.permute.xlu1 %830 }
 0x1f1   :  { %854 = vst.msk [vmem:[#allocation5 + $0x8] sm:$0xff] %vm852_vm9, %v831_v38  ;;  %1443 = vrot.lane.b32.xlu0 %v5646_v35, %s4729_s7 }
 0x1f2   :  { %1581 = vrot.lane.b32.xlu1 %v1422_v36, %s4727_s30 }
 0x1f3   :  { %v835_v54 = vpop.permute.xlu0 %834 }
 0x1f4   :  { %v880_v45 = vpop.permute.xlu1 %879  ;;  %856 = vst.msk [vmem:[#allocation5 + $0x18] sm:$0xff] %vm852_vm9, %v835_v54 }
 0x1f5   :  { %903 = vst.msk [vmem:[#allocation5 + $0x8] sm:$0xff] %vm901_vm10, %v880_v45  ;;  %1251 = vrot.lane.b32.xlu0 %v5652_v32, %s4725_s0 }
 0x1f6   :  { %952 = vst.msk [vmem:[#allocation5 + $0x8] sm:$0xff] %vm950_vm13, %v929_v16  ;;  %1341 = vrot.lane.b32.xlu1 %v5518_v46, %s4728_s1 }
 0x1f7   :  { %1001 = vst.msk [vmem:[#allocation5 + $0x8] sm:$0xff] %vm999_vm14, %v978_v63  ;;  %v884_v60 = vpop.permute.xlu0 %883  ;;  %v1332_v63 = vld [vmem:[#allocation4 + $0x80] sm:$0xff] }
 0x1f8   :  { %v1025_v4 = vpop.permute.xlu1 %1024  ;;  %1050 = vst.msk [vmem:[#allocation5 + $0x8] sm:$0xff] %vm1048_vm15, %v1027_v37  ;;  %v1380_v37 = vld [vmem:[#allocation4 + $0x81] sm:$0xff] }
 0x1f9   :  { %1049 = vst.msk [vmem:[#allocation5] sm:$0xff] %vm1048_vm15, %v1025_v4  ;;  %1299 = vrot.lane.b32.xlu0 %v5662_v2, %s4722_s22  ;;  %v2145_v4 = vld [vmem:[#allocation6 + $0x1] sm:$0xff] }
 0x1fa   :  { %905 = vst.msk [vmem:[#allocation5 + $0x18] sm:$0xff] %vm901_vm10, %v884_v60  ;;  %1389 = vrot.lane.b32.xlu1 %v1230_v49, %s4723_s23 }
 0x1fb   :  { %1099 = vst.msk [vmem:[#allocation5] sm:$0xff] %vm1098_vm0, %v1075_v15  ;;  %v1077_v61 = vpop.permute.xlu0 %1076 }
 0x1fc   :  { %954 = vst.msk [vmem:[#allocation5 + $0x18] sm:$0xff] %vm950_vm13, %v933_v22  ;;  %v982_v46 = vpop.permute.xlu1 %981 }
 0x1fd   :  { %1148 = vst.msk [vmem:[#allocation5] sm:$0xff] %vm1147_vm1, %v1124_v21  ;;  %1487 = vrot.lane.b32.xlu0 %v5554_v23, %s4724_s3  ;;  %v1284_v21 = vld [vmem:[#allocation4 + $0x72] sm:$0xff] }
 0x1fe   :  { %1197 = vst.msk [vmem:[#allocation5] sm:$0xff] %vm1196_vm3, %v1173_v25  ;;  %1437 = vrot.lane.b32.xlu1 %v1278_v20, %s4729_s7 }
 0x1ff   :  { %1003 = vst.msk [vmem:[#allocation5 + $0x18] sm:$0xff] %vm999_vm14, %v982_v46  ;;  %v1126_v0 = vpop.permute.xlu0 %1125 }
 0x200   :  { %1100 = vst.msk [vmem:[#allocation5 + $0x8] sm:$0xff] %vm1098_vm0, %v1077_v61  ;;  %v886_v62 = vpop.permute.xlu1 %885 }
 0x201   :  { %1052 = vst.msk [vmem:[#allocation5 + $0x18] sm:$0xff] %vm1048_vm15, %v1031_v42  ;;  %1535 = vrot.lane.b32.xlu0 %v5652_v32, %s4726_s29 }
 0x202   :  { %906 = vst.msk [vmem:[#allocation5 + $0x20] sm:$0xff] %vm901_vm10, %v886_v62  ;;  %1395 = vrot.lane.b32.xlu1 %v5640_v24, %s4723_s23 }
 0x203   :  { %1149 = vst.msk [vmem:[#allocation5 + $0x8] sm:$0xff] %vm1147_vm1, %v1126_v0  ;;  %v1029_v7 = vpop.permute.xlu0 %1028 }
 0x204   :  { %v1079_v6 = vpop.permute.xlu1 %1078 }
 0x205   :  { %v1613_v5 = vld [vmem:[#allocation5] sm:$0xff]  ;;  %1441 = vrot.lane.b32.xlu0 %v5662_v2, %s4729_s7 }
 0x206   :  { %4586 = vmatprep.mubr.msk.f32.mxu1 %vm1837_vm4, %v1613_v5  ;;  %1301 = vrot.lane.b32.xlu1 %v5646_v35, %s4722_s22 }
 0x207   :  { %v937_v11 = vpop.permute.xlu0 %936 }
 0x208   :  { %v1128_v9 = vpop.permute.xlu1 %1127 }
 0x209   :  { %1351 = vrot.lane.b32.xlu0 %v5569_v41, %s4728_s1 }
 0x20a   :  { %1489 = vrot.lane.b32.xlu1 %v5545_v10, %s4724_s3  ;;  %v5703_v10 = vld [vmem:[#allocation4 + $0x51] sm:$0xff] }
 0x20b   :  { %v841_v18 = vpop.permute.xlu0 %840 }
 0x20c   :  { %v1177_v17 = vpop.permute.xlu1 %1176  ;;  %859 = vst.msk [vmem:[#allocation5 + $0x30] sm:$0xff] %vm852_vm9, %v841_v18 }
 0x20d   :  { %1257 = vrot.lane.b32.xlu0 %v1235_v14, %s4725_s0 }
 0x20e   :  { %1537 = vrot.lane.b32.xlu1 %v5640_v24, %s4726_s29 }
 0x20f   :  { %v1035_v30 = vpop.permute.xlu0 %1034 }
 0x210   :  { %v931_v29 = vpop.permute.xlu1 %930 }
 0x211   :  { %953 = vst.msk [vmem:[#allocation5 + $0x10] sm:$0xff] %vm950_vm13, %v931_v29  ;;  %1447 = vrot.lane.b32.xlu0 %v1426_v28, %s4729_s7 }
 0x212   :  { %1585 = vrot.lane.b32.xlu1 %v5646_v35, %s4727_s30 }
 0x213   :  { %v839_v40 = vpop.permute.xlu0 %838 }
 0x214   :  { %v980_v31 = vpop.permute.xlu1 %979  ;;  %858 = vst.msk [vmem:[#allocation5 + $0x28] sm:$0xff] %vm852_vm9, %v839_v40 }
 0x215   :  { %1002 = vst.msk [vmem:[#allocation5 + $0x10] sm:$0xff] %vm999_vm14, %v980_v31  ;;  %1255 = vrot.lane.b32.xlu0 %v5703_v10, %s4725_s0 }
 0x216   :  { %1051 = vst.msk [vmem:[#allocation5 + $0x10] sm:$0xff] %vm1048_vm15, %v1029_v7  ;;  %1345 = vrot.lane.b32.xlu1 %v5554_v23, %s4728_s1 }
 0x217   :  { %1101 = vst.msk [vmem:[#allocation5 + $0x10] sm:$0xff] %vm1098_vm0, %v1079_v6  ;;  %v888_v52 = vpop.permute.xlu0 %887 }
 0x218   :  { %1150 = vst.msk [vmem:[#allocation5 + $0x10] sm:$0xff] %vm1147_vm1, %v1128_v9  ;;  %v1175_v47 = vpop.permute.xlu1 %1174 }
 0x219   :  { %1199 = vst.msk [vmem:[#allocation5 + $0x10] sm:$0xff] %vm1196_vm3, %v1177_v17  ;;  %1198 = vst.msk [vmem:[#allocation5 + $0x8] sm:$0xff] %vm1196_vm3, %v1175_v47  ;;  %1303 = vrot.lane.b32.xlu0 %v5713_v44, %s4722_s22 }
 0x21a   :  { %907 = vst.msk [vmem:[#allocation5 + $0x28] sm:$0xff] %vm901_vm10, %v888_v52  ;;  %1393 = vrot.lane.b32.xlu1 %v5652_v32, %s4723_s23 }
 0x21b   :  { %956 = vst.msk [vmem:[#allocation5 + $0x28] sm:$0xff] %vm950_vm13, %v937_v11  ;;  %v1081_v50 = vpop.permute.xlu0 %1080 }
 0x21c   :  { %v986_v23 = vpop.permute.xlu1 %985  ;;  %1102 = vst.msk [vmem:[#allocation5 + $0x18] sm:$0xff] %vm1098_vm0, %v1081_v50 }
 0x21d   :  { %1005 = vst.msk [vmem:[#allocation5 + $0x28] sm:$0xff] %vm999_vm14, %v986_v23  ;;  %1491 = vrot.lane.b32.xlu0 %v5577_v33, %s4724_s3 }
 0x21e   :  { %1054 = vst.msk [vmem:[#allocation5 + $0x28] sm:$0xff] %vm1048_vm15, %v1035_v30  ;;  %1583 = vrot.lane.b32.xlu1 %v5662_v2, %s4727_s30 }
 0x21f   :  { %v1130_v55 = vpop.permute.xlu0 %1129 }
 0x220   :  { %v890_v53 = vpop.permute.xlu1 %889  ;;  %v1614_v43 = vld [vmem:[#allocation5 + $0x8] sm:$0xff]  ;;  %v1615_v56 = vld [vmem:[#allocation5 + $0x10] sm:$0xff]  ;;  %1151 = vst.msk [vmem:[#allocation5 + $0x18] sm:$0xff] %vm1147_vm1, %v1130_v55 }
 0x221   :  { %908 = vst.msk [vmem:[#allocation5 + $0x30] sm:$0xff] %vm901_vm10, %v890_v53  ;;  %4587 = vmatmul.mubr.msk.f32.vlgmr.msra.gmra.mxu1 %vm1837_vm4, %v1614_v43  ;;  %1539 = vrot.lane.b32.xlu0 %v5703_v10, %s4726_s29 }
 0x222   :  { %4589 = vmatprep.mubr.msk.f32.mxu1 %vm1837_vm4, %v1615_v56  ;;  %1399 = vrot.lane.b32.xlu1 %v1235_v14, %s4723_s23 }
 0x223   :  { %v1033_v57 = vpop.permute.xlu0 %1032 }
 0x224   :  { %v1083_v26 = vpop.permute.xlu1 %1082 }
 0x225   :  { %1445 = vrot.lane.b32.xlu0 %v5713_v44, %s4729_s7 }
 0x226   :  { %1305 = vrot.lane.b32.xlu1 %v1426_v28, %s4722_s22 }
 0x227   :  { %v941_v12 = vpop.permute.xlu0 %940 }
 0x228   :  { %v1132_v59 = vpop.permute.xlu1 %1131 }
 0x229   :  { %1355 = vrot.lane.b32.xlu0 %v1332_v63, %s4728_s1 }
 0x22a   :  { %1493 = vrot.lane.b32.xlu1 %v5569_v41, %s4724_s3 }
 0x22b   :  { %v990_v36 = vpop.permute.xlu0 %989 }
 0x22c   :  { %v1181_v16 = vpop.permute.xlu1 %1180 }
 0x22d   :  { %1403 = vrot.lane.b32.xlu0 %v1380_v37, %s4723_s23 }
 0x22e   :  { %1541 = vrot.lane.b32.xlu1 %v1235_v14, %s4726_s29  ;;  %v2193_v14 = vld [vmem:[#allocation6 + $0x2] sm:$0xff] }
 0x22f   :  { %v1039_v49 = vpop.permute.xlu0 %1038 }
 0x230   :  { %v935_v48 = vpop.permute.xlu1 %934 }
 0x231   :  { %955 = vst.msk [vmem:[#allocation5 + $0x20] sm:$0xff] %vm950_vm13, %v935_v48  ;;  %1497 = vrot.lane.b32.xlu0 %v1332_v63, %s4724_s3 }
 0x232   :  { %1589 = vrot.lane.b32.xlu1 %v1426_v28, %s4727_s30  ;;  %v2393_v28 = vld [vmem:[#allocation6 + $0x90] sm:$0xff] }
 0x233   :  { %v843_v13 = vpop.permute.xlu0 %842 }
 0x234   :  { %v984_v3 = vpop.permute.xlu1 %983  ;;  %860 = vst.msk [vmem:[#allocation5 + $0x38] sm:$0xff] %vm852_vm9, %v843_v13 }
 0x235   :  { %1004 = vst.msk [vmem:[#allocation5 + $0x20] sm:$0xff] %vm999_vm14, %v984_v3  ;;  %1545 = vrot.lane.b32.xlu0 %v1380_v37, %s4726_s29 }
 0x236   :  { %1053 = vst.msk [vmem:[#allocation5 + $0x20] sm:$0xff] %vm1048_vm15, %v1033_v57  ;;  %1349 = vrot.lane.b32.xlu1 %v5577_v33, %s4728_s1 }
 0x237   :  { %1103 = vst.msk [vmem:[#allocation5 + $0x20] sm:$0xff] %vm1098_vm0, %v1083_v26  ;;  %v892_v15 = vpop.permute.xlu0 %891 }
 0x238   :  { %1152 = vst.msk [vmem:[#allocation5 + $0x20] sm:$0xff] %vm1147_vm1, %v1132_v59  ;;  %v1179_v41 = vpop.permute.xlu1 %1178 }
 0x239   :  { %1201 = vst.msk [vmem:[#allocation5 + $0x20] sm:$0xff] %vm1196_vm3, %v1181_v16  ;;  %1200 = vst.msk [vmem:[#allocation5 + $0x18] sm:$0xff] %vm1196_vm3, %v1179_v41  ;;  %1259 = vrot.lane.b32.xlu0 %v1236_v19, %s4725_s0 }
 0x23a   :  { %909 = vst.msk [vmem:[#allocation5 + $0x38] sm:$0xff] %vm901_vm10, %v892_v15  ;;  %1397 = vrot.lane.b32.xlu1 %v5703_v10, %s4723_s23  ;;  %v2441_v10 = vld [vmem:[#allocation6 + $0x91] sm:$0xff] }
 0x23b   :  { %958 = vst.msk [vmem:[#allocation5 + $0x38] sm:$0xff] %vm950_vm13, %v941_v12  ;;  %v1085_v20 = vpop.permute.xlu0 %1084 }
 0x23c   :  { %1007 = vst.msk [vmem:[#allocation5 + $0x38] sm:$0xff] %vm999_vm14, %v990_v36  ;;  %v1087_v33 = vpop.permute.xlu1 %1086 }
 0x23d   :  { %1056 = vst.msk [vmem:[#allocation5 + $0x38] sm:$0xff] %vm1048_vm15, %v1039_v49  ;;  %1307 = vrot.lane.b32.xlu0 %v1284_v21, %s4722_s22 }
 0x23e   :  { %1106 = vst.msk [vmem:[#allocation5 + $0x38] sm:$0xff] %vm1098_vm0, %v5603_v39  ;;  %1104 = vst.msk [vmem:[#allocation5 + $0x28] sm:$0xff] %vm1098_vm0, %v1085_v20  ;;  %1587 = vrot.lane.b32.xlu1 %v5713_v44, %s4727_s30  ;;  %v1428_v39 = vld [vmem:[#allocation4 + $0x82] sm:$0xff]  ;;  %v2489_v44 = vld [vmem:[#allocation6 + $0x92] sm:$0xff] }
 0x23f   :  { %1155 = vst.msk [vmem:[#allocation5 + $0x38] sm:$0xff] %vm1147_vm1, %v5610_v51  ;;  %v1134_v24 = vpop.permute.xlu0 %1133 }
 0x240   :  { %1204 = vst.msk [vmem:[#allocation5 + $0x38] sm:$0xff] %vm1196_vm3, %v5618_v8  ;;  %v1136_v22 = vpop.permute.xlu1 %1135  ;;  %v1616_v25 = vld [vmem:[#allocation5 + $0x18] sm:$0xff]  ;;  %v1617_v34 = vld [vmem:[#allocation5 + $0x20] sm:$0xff] }
 0x241   :  { %1153 = vst.msk [vmem:[#allocation5 + $0x28] sm:$0xff] %vm1147_vm1, %v1134_v24  ;;  %4590 = vmatmul.mubr.msk.f32.gmra.mxu1 %vm1837_vm4, %v1616_v25  ;;  %1495 = vrot.lane.b32.xlu0 %v5595_v27, %s4724_s3 }
 0x242   :  { %4592 = vmatprep.mubr.msk.f32.mxu1 %vm1837_vm4, %v1617_v34  ;;  %1451 = vrot.lane.b32.xlu1 %v1428_v39, %s4729_s7  ;;  %v5850_v34 = vpop.f32.mrf.mxu1 }
 0x243   :  { %v1183_v8 = vpop.permute.xlu0 %1182 }
 0x244   :  { %v1185_v51 = vpop.permute.xlu1 %1184  ;;  %1202 = vst.msk [vmem:[#allocation5 + $0x28] sm:$0xff] %vm1196_vm3, %v1183_v8  ;;  %v5852_v8 = vpop.f32.mrf.mxu1 }
 0x245   :  { %1543 = vrot.lane.b32.xlu0 %v1236_v19, %s4726_s29 }
 0x246   :  { %1353 = vrot.lane.b32.xlu1 %v5595_v27, %s4728_s1  ;;  %v1572_v27 = vld [vmem:[#allocation4 + $0x92] sm:$0xff] }
 0x247   :  { %v1344_v38 = vpop.permute.xlu0 %1343  ;;  %v1620_v7 = vld [vmem:[#allocation5 + $0x38] sm:$0xff] }
 0x248   :  { %v939_v35 = vpop.permute.xlu1 %938 }
 0x249   :  { %957 = vst.msk [vmem:[#allocation5 + $0x30] sm:$0xff] %vm950_vm13, %v939_v35  ;;  %1591 = vrot.lane.b32.xlu0 %v1284_v21, %s4727_s30 }
 0x24a   :  { %1401 = vrot.lane.b32.xlu1 %v1236_v19, %s4723_s23 }
 0x24b   :  { %v1392_v32 = vpop.permute.xlu0 %1391  ;;  %v1618_v45 = vld [vmem:[#allocation5 + $0x28] sm:$0xff] }
 0x24c   :  { %v988_v42 = vpop.permute.xlu1 %987  ;;  %4593 = vmatmul.mubr.msk.f32.gmra.mxu1 %vm1837_vm4, %v1618_v45 }
 0x24d   :  { %1006 = vst.msk [vmem:[#allocation5 + $0x30] sm:$0xff] %vm999_vm14, %v988_v42  ;;  %1593 = vrot.lane.b32.xlu0 %v1428_v39, %s4727_s30  ;;  %v5855_v42 = vpop.f32.mrf.mxu1 }
 0x24e   :  { %1449 = vrot.lane.b32.xlu1 %v1284_v21, %s4729_s7 }
 0x24f   :  { %v1440_v2 = vpop.permute.xlu0 %1439 }
 0x250   :  { %v1037_v54 = vpop.permute.xlu1 %1036 }
 0x251   :  { %1055 = vst.msk [vmem:[#allocation5 + $0x30] sm:$0xff] %vm1048_vm15, %v1037_v54  ;;  %2161 = vrot.lane.b32.xlu0 %v2145_v4, %s4725_s0 }
 0x252   :  { %1105 = vst.msk [vmem:[#allocation5 + $0x30] sm:$0xff] %vm1098_vm0, %v1087_v33  ;;  %1595 = vrot.lane.b32.xlu1 %v1572_v27, %s4727_s30  ;;  %v5858_v27 = vpop.f32.mrf.mxu1 }
 0x253   :  { %1154 = vst.msk [vmem:[#allocation5 + $0x30] sm:$0xff] %vm1147_vm1, %v1136_v22  ;;  %v1248_v46 = vpop.permute.xlu0 %1247 }
 0x254   :  { %1203 = vst.msk [vmem:[#allocation5 + $0x30] sm:$0xff] %vm1196_vm3, %v1185_v51  ;;  %v1250_v60 = vpop.permute.xlu1 %1249 }
 0x255   :  { %1271 = vst.msk [vmem:[#allocation5 + $0x50] sm:$0xff] %vm852_vm9, %v1250_v60  ;;  %1270 = vst.msk [vmem:[#allocation5 + $0x48] sm:$0xff] %vm852_vm9, %v1248_v46  ;;  %2209 = vrot.lane.b32.xlu0 %v2193_v14, %s4722_s22 }
 0x256   :  { %2570 = vrot.lane.b32.xlu1 %v2145_v4, %s4725_s0  ;;  %v5866_v4 = vpop.f32.mrf.mxu1 }
 0x257   :  { %v1296_v62 = vpop.permute.xlu0 %1295 }
 0x258   :  { %v1298_v61 = vpop.permute.xlu1 %1297  ;;  %1318 = vst.msk [vmem:[#allocation5 + $0x48] sm:$0xff] %vm901_vm10, %v1296_v62 }
 0x259   :  { %1319 = vst.msk [vmem:[#allocation5 + $0x50] sm:$0xff] %vm901_vm10, %v1298_v61  ;;  %2416 = vrot.lane.b32.xlu0 %v2393_v28, %s4724_s3  ;;  %v5872_v61 = vpop.f32.mrf.mxu1 }
 0x25a   :  { %1366 = vst.msk [vmem:[#allocation5 + $0x48] sm:$0xff] %vm950_vm13, %v1344_v38  ;;  %2618 = vrot.lane.b32.xlu1 %v2193_v14, %s4722_s22 }
 0x25b   :  { %1414 = vst.msk [vmem:[#allocation5 + $0x48] sm:$0xff] %vm999_vm14, %v1392_v32  ;;  %v1619_v0 = vld [vmem:[#allocation5 + $0x30] sm:$0xff]  ;;  %v1348_v6 = vpop.permute.xlu0 %1347 }
 0x25c   :  { %4595 = vmatprep.mubr.msk.f32.mxu1 %vm1837_vm4, %v1619_v0  ;;  %1462 = vst.msk [vmem:[#allocation5 + $0x48] sm:$0xff] %vm1048_vm15, %v1440_v2  ;;  %v1486_v5 = vpop.permute.xlu1 %1485 }
 0x25d   :  { %4596 = vmatmul.mubr.msk.f32.gmra.mxu1 %vm1837_vm4, %v1620_v7  ;;  %2464 = vrot.lane.b32.xlu0 %v2441_v10, %s4726_s29  ;;  %v5881_v7 = vpop.f32.mrf.mxu1 }
 0x25e   :  { %2824 = vrot.lane.b32.xlu1 %v2393_v28, %s4724_s3 }
 0x25f   :  { %v1254_v11 = vpop.permute.xlu0 %1253 }
 0x260   :  { %v1534_v9 = vpop.permute.xlu1 %1533  ;;  %1273 = vst.msk [vmem:[#allocation5 + $0x60] sm:$0xff] %vm852_vm9, %v1254_v11  ;;  %v5886_v11 = vpop.f32.mrf.mxu1 }
 0x261   :  { %2512 = vrot.lane.b32.xlu0 %v2489_v44, %s4727_s30  ;;  %v2129_v44 = vld [vmem:[#allocation6] sm:$0xff] }
 0x262   :  { %2872 = vrot.lane.b32.xlu1 %v2441_v10, %s4726_s29  ;;  %v5890_v14 = vpop.f32.mrf.mxu1  ;;  %2137 = vst.msk [vmem:[#allocation7] sm:$0xff] %vm759_vm2, %v2129_v44  ;;  %2546 = vst.msk [vmem:[#allocation7 + $0x40] sm:$0xff] %vm759_vm2, %v2129_v44 }
 0x263   :  { %v1444_v18 = vpop.permute.xlu0 %1443 }
 0x264   :  { %v1582_v17 = vpop.permute.xlu1 %1581 }
 0x267   :  { %v1252_v30 = vpop.permute.xlu0 %1251 }
 0x268   :  { %v1342_v29 = vpop.permute.xlu1 %1341  ;;  %1272 = vst.msk [vmem:[#allocation5 + $0x58] sm:$0xff] %vm852_vm9, %v1252_v30 }
 0x269   :  { %1365 = vst.msk [vmem:[#allocation5 + $0x40] sm:$0xff] %vm950_vm13, %v1342_v29  ;;  %v5896_v29 = vpop.f32.mrf.mxu1 }
 0x26b   :  { %v1300_v40 = vpop.permute.xlu0 %1299  ;;  %v5899_v30 = vpop.f32.mrf.mxu1 }
 0x26c   :  { %v1390_v31 = vpop.permute.xlu1 %1389  ;;  %1320 = vst.msk [vmem:[#allocation5 + $0x58] sm:$0xff] %vm901_vm10, %v1300_v40 }
 0x26d   :  { %1413 = vst.msk [vmem:[#allocation5 + $0x40] sm:$0xff] %vm999_vm14, %v1390_v31  ;;  %v5903_v40 = vpop.f32.mrf.mxu1 }
 0x26e   :  { %1368 = vst.msk [vmem:[#allocation5 + $0x58] sm:$0xff] %vm950_vm13, %v1348_v6 }
 0x26f   :  { %v1488_v52 = vpop.permute.xlu0 %1487 }
 0x270   :  { %v1438_v47 = vpop.permute.xlu1 %1437  ;;  %1510 = vst.msk [vmem:[#allocation5 + $0x48] sm:$0xff] %vm1098_vm0, %v1488_v52  ;;  %v5908_v52 = vpop.f32.mrf.mxu1 }
 0x271   :  { %1461 = vst.msk [vmem:[#allocation5 + $0x40] sm:$0xff] %vm1048_vm15, %v1438_v47 }
 0x272   :  { %1509 = vst.msk [vmem:[#allocation5 + $0x40] sm:$0xff] %vm1098_vm0, %v1486_v5 }
 0x273   :  { %1557 = vst.msk [vmem:[#allocation5 + $0x40] sm:$0xff] %vm1147_vm1, %v1534_v9  ;;  %v1536_v50 = vpop.permute.xlu0 %1535 }
 0x274   :  { %1605 = vst.msk [vmem:[#allocation5 + $0x40] sm:$0xff] %vm1196_vm3, %v1582_v17  ;;  %v1396_v23 = vpop.permute.xlu1 %1395 }
 0x275   :  { %1416 = vst.msk [vmem:[#allocation5 + $0x58] sm:$0xff] %vm999_vm14, %v1396_v23 }
 0x276   :  { %1558 = vst.msk [vmem:[#allocation5 + $0x48] sm:$0xff] %vm1147_vm1, %v1536_v50  ;;  %v5911_v50 = vpop.f32.mrf.mxu1 }
 0x277   :  { %1464 = vst.msk [vmem:[#allocation5 + $0x58] sm:$0xff] %vm1048_vm15, %v1444_v18  ;;  %v1442_v55 = vpop.permute.xlu0 %1441 }
 0x278   :  { %v1302_v53 = vpop.permute.xlu1 %1301 }
 0x279   :  { %1321 = vst.msk [vmem:[#allocation5 + $0x60] sm:$0xff] %vm901_vm10, %v1302_v53 }
 0x27b   :  { %v1621_v43 = vld [vmem:[#allocation5 + $0x40] sm:$0xff]  ;;  %v1352_v26 = vpop.permute.xlu0 %1351 }
 0x27c   :  { %4598 = vmatprep.mubr.msk.f32.mxu1 %vm1837_vm4, %v1621_v43  ;;  %v1490_v56 = vpop.permute.xlu1 %1489  ;;  %v5915_v43 = vpop.f32.mrf.mxu1 }
 0x27f   :  { %v1258_v59 = vpop.permute.xlu0 %1257 }
 0x280   :  { %v1538_v57 = vpop.permute.xlu1 %1537  ;;  %1275 = vst.msk [vmem:[#allocation5 + $0x70] sm:$0xff] %vm852_vm9, %v1258_v59 }
 0x283   :  { %v1448_v63 = vpop.permute.xlu0 %1447 }
 0x284   :  { %v1586_v12 = vpop.permute.xlu1 %1585 }
 0x287   :  { %v1256_v36 = vpop.permute.xlu0 %1255 }
 0x288   :  { %v1346_v16 = vpop.permute.xlu1 %1345  ;;  %1274 = vst.msk [vmem:[#allocation5 + $0x68] sm:$0xff] %vm852_vm9, %v1256_v36 }
 0x289   :  { %1367 = vst.msk [vmem:[#allocation5 + $0x50] sm:$0xff] %vm950_vm13, %v1346_v16 }
 0x28b   :  { %v1304_v48 = vpop.permute.xlu0 %1303 }
 0x28c   :  { %v1394_v37 = vpop.permute.xlu1 %1393  ;;  %1322 = vst.msk [vmem:[#allocation5 + $0x68] sm:$0xff] %vm901_vm10, %v1304_v48 }
 0x28d   :  { %1415 = vst.msk [vmem:[#allocation5 + $0x50] sm:$0xff] %vm999_vm14, %v1394_v37 }
 0x28e   :  { %1463 = vst.msk [vmem:[#allocation5 + $0x50] sm:$0xff] %vm1048_vm15, %v1442_v55 }
 0x28f   :  { %1370 = vst.msk [vmem:[#allocation5 + $0x68] sm:$0xff] %vm950_vm13, %v1352_v26  ;;  %v1492_v3 = vpop.permute.xlu0 %1491 }
 0x290   :  { %1511 = vst.msk [vmem:[#allocation5 + $0x50] sm:$0xff] %vm1098_vm0, %v1490_v56  ;;  %v1584_v49 = vpop.permute.xlu1 %1583  ;;  %1512 = vst.msk [vmem:[#allocation5 + $0x58] sm:$0xff] %vm1098_vm0, %v1492_v3  ;;  %v5917_v56 = vpop.f32.mrf.mxu1 }
 0x291   :  { %1559 = vst.msk [vmem:[#allocation5 + $0x50] sm:$0xff] %vm1147_vm1, %v1538_v57  ;;  %v5922_v57 = vld [vmem:[%s6870_s8] ss:$0 sm:$0xff] }
 0x292   :  { %1607 = vst.msk [vmem:[#allocation5 + $0x50] sm:$0xff] %vm1196_vm3, %v1586_v12  ;;  %1606 = vst.msk [vmem:[#allocation5 + $0x48] sm:$0xff] %vm1196_vm3, %v1584_v49  ;;  %v5930_v12 = vld [vmem:[%s6871_s9] ss:$0 sm:$0xff] }
 0x293   :  { %v1540_v41 = vpop.permute.xlu0 %1539 }
 0x294   :  { %v1400_v13 = vpop.permute.xlu1 %1399  ;;  %1560 = vst.msk [vmem:[#allocation5 + $0x58] sm:$0xff] %vm1147_vm1, %v1540_v41 }
 0x295   :  { %1418 = vst.msk [vmem:[#allocation5 + $0x68] sm:$0xff] %vm999_vm14, %v1400_v13 }
 0x296   :  { %1466 = vst.msk [vmem:[#allocation5 + $0x68] sm:$0xff] %vm1048_vm15, %v1448_v63 }
 0x297   :  { %v1446_v20 = vpop.permute.xlu0 %1445 }
 0x298   :  { %v1306_v15 = vpop.permute.xlu1 %1305 }
 0x299   :  { %v1622_v19 = vld [vmem:[#allocation5 + $0x48] sm:$0xff]  ;;  %v1623_v33 = vld [vmem:[#allocation5 + $0x50] sm:$0xff]  ;;  %1323 = vst.msk [vmem:[#allocation5 + $0x70] sm:$0xff] %vm901_vm10, %v1306_v15 }
 0x29a   :  { %4599 = vmatmul.mubr.msk.f32.gmra.mxu1 %vm1837_vm4, %v1622_v19 }
 0x29b   :  { %4601 = vmatprep.mubr.msk.f32.mxu1 %vm1837_vm4, %v1623_v33  ;;  %v1356_v22 = vpop.permute.xlu0 %1355 }
 0x29c   :  { %v1494_v21 = vpop.permute.xlu1 %1493 }
 0x29f   :  { %v1404_v25 = vpop.permute.xlu0 %1403 }
 0x2a0   :  { %v1542_v24 = vpop.permute.xlu1 %1541 }
 0x2a3   :  { %v1498_v51 = vpop.permute.xlu0 %1497 }
 0x2a4   :  { %v1590_v39 = vpop.permute.xlu1 %1589 }
 0x2a7   :  { %v1546_v38 = vpop.permute.xlu0 %1545 }
 0x2a8   :  { %v1350_v35 = vpop.permute.xlu1 %1349 }
 0x2a9   :  { %1369 = vst.msk [vmem:[#allocation5 + $0x60] sm:$0xff] %vm950_vm13, %v1350_v35 }
 0x2ab   :  { %v1260_v45 = vpop.permute.xlu0 %1259 }
 0x2ac   :  { %v1398_v32 = vpop.permute.xlu1 %1397  ;;  %1276 = vst.msk [vmem:[#allocation5 + $0x78] sm:$0xff] %vm852_vm9, %v1260_v45 }
 0x2ad   :  { %1417 = vst.msk [vmem:[#allocation5 + $0x60] sm:$0xff] %vm999_vm14, %v1398_v32 }
 0x2ae   :  { %1465 = vst.msk [vmem:[#allocation5 + $0x60] sm:$0xff] %vm1048_vm15, %v1446_v20 }
 0x2af   :  { %1513 = vst.msk [vmem:[#allocation5 + $0x60] sm:$0xff] %vm1098_vm0, %v1494_v21  ;;  %v1308_v2 = vpop.permute.xlu0 %1307 }
 0x2b0   :  { %1561 = vst.msk [vmem:[#allocation5 + $0x60] sm:$0xff] %vm1147_vm1, %v1542_v24  ;;  %v1588_v54 = vpop.permute.xlu1 %1587 }
 0x2b1   :  { %1609 = vst.msk [vmem:[#allocation5 + $0x60] sm:$0xff] %vm1196_vm3, %v1590_v39  ;;  %1608 = vst.msk [vmem:[#allocation5 + $0x58] sm:$0xff] %vm1196_vm3, %v1588_v54 }
 0x2b2   :  { %1324 = vst.msk [vmem:[#allocation5 + $0x78] sm:$0xff] %vm901_vm10, %v1308_v2 }
 0x2b3   :  { %1372 = vst.msk [vmem:[#allocation5 + $0x78] sm:$0xff] %vm950_vm13, %v1356_v22  ;;  %v1496_v46 = vpop.permute.xlu0 %1495 }
 0x2b4   :  { %1420 = vst.msk [vmem:[#allocation5 + $0x78] sm:$0xff] %vm999_vm14, %v1404_v25  ;;  %v1452_v60 = vpop.permute.xlu1 %1451 }
 0x2b5   :  { %1468 = vst.msk [vmem:[#allocation5 + $0x78] sm:$0xff] %vm1048_vm15, %v1452_v60 }
 0x2b6   :  { %1516 = vst.msk [vmem:[#allocation5 + $0x78] sm:$0xff] %vm1098_vm0, %v5608_v58  ;;  %1514 = vst.msk [vmem:[#allocation5 + $0x68] sm:$0xff] %vm1098_vm0, %v1496_v46 }
 0x2b7   :  { %1564 = vst.msk [vmem:[#allocation5 + $0x78] sm:$0xff] %vm1147_vm1, %v5616_v1  ;;  %v1544_v6 = vpop.permute.xlu0 %1543 }
 0x2b8   :  { %v1354_v62 = vpop.permute.xlu1 %1353  ;;  %v1624_v0 = vld [vmem:[#allocation5 + $0x58] sm:$0xff]  ;;  %v1625_v5 = vld [vmem:[#allocation5 + $0x60] sm:$0xff]  ;;  %1562 = vst.msk [vmem:[#allocation5 + $0x68] sm:$0xff] %vm1147_vm1, %v1544_v6 }
 0x2b9   :  { %1371 = vst.msk [vmem:[#allocation5 + $0x70] sm:$0xff] %vm950_vm13, %v1354_v62  ;;  %4602 = vmatmul.mubr.msk.f32.gmra.mxu1 %vm1837_vm4, %v1624_v0 }
 0x2ba   :  { %4604 = vmatprep.mubr.msk.f32.mxu1 %vm1837_vm4, %v1625_v5 }
 0x2bb   :  { %v1592_v9 = vpop.permute.xlu0 %1591 }
 0x2bc   :  { %v1402_v58 = vpop.permute.xlu1 %1401  ;;  %1610 = vst.msk [vmem:[#allocation5 + $0x68] sm:$0xff] %vm1196_vm3, %v1592_v9  ;;  %v2962_v9 = vld [vmem:[%s6872_s10 + $0x40] sm:$0xff] }
 0x2bd   :  { %1419 = vst.msk [vmem:[#allocation5 + $0x70] sm:$0xff] %vm999_vm14, %v1402_v58  ;;  %4610 = vmatprep.subr.mxu0 %v2962_v9 }
 0x2be   :  { %4611 = vmatpush3.msra.mxu0 %v2962_v9 }
 0x2bf   :  { %v1594_v17 = vpop.permute.xlu0 %1593 }
 0x2c0   :  { %v1450_v1 = vpop.permute.xlu1 %1449 }
 0x2c1   :  { %1467 = vst.msk [vmem:[#allocation5 + $0x70] sm:$0xff] %vm1048_vm15, %v1450_v1  ;;  %v2961_v1 = vld [vmem:[%s6872_s10 + $0x38] sm:$0xff] }
 0x2c2   :  { %1515 = vst.msk [vmem:[#allocation5 + $0x70] sm:$0xff] %vm1098_vm0, %v1498_v51  ;;  %4612 = vmatprep.subr.mxu0 %v2961_v1 }
 0x2c3   :  { %1563 = vst.msk [vmem:[#allocation5 + $0x70] sm:$0xff] %vm1147_vm1, %v1546_v38  ;;  %v1626_v28 = vld [vmem:[#allocation5 + $0x68] sm:$0xff]  ;;  %v2162_v47 = vpop.permute.xlu0 %2161  ;;  %4613 = vmatpush3.msra.mxu0 %v2961_v1 }
 0x2c4   :  { %1611 = vst.msk [vmem:[#allocation5 + $0x70] sm:$0xff] %vm1196_vm3, %v1594_v17  ;;  %v1596_v18 = vpop.permute.xlu1 %1595  ;;  %4605 = vmatmul.mubr.msk.f32.gmra.mxu1 %vm1837_vm4, %v1626_v28 }
 0x2c5   :  { %1612 = vst.msk [vmem:[#allocation5 + $0x78] sm:$0xff] %vm1196_vm3, %v1596_v18 }
 0x2c6   :  { %2185 = vst.msk [vmem:[#allocation7] sm:$0xff] %vm852_vm9, %v2162_v47 }
 0x2c7   :  { %v2210_v53 = vpop.permute.xlu0 %2209 }
 0x2c8   :  { %v2571_v23 = vpop.permute.xlu1 %2570  ;;  %2233 = vst.msk [vmem:[#allocation7] sm:$0xff] %vm901_vm10, %v2210_v53 }
 0x2c9   :  { %2594 = vst.msk [vmem:[#allocation7 + $0x40] sm:$0xff] %vm852_vm9, %v2571_v23 }
 0x2cb   :  { %v1627_v10 = vld [vmem:[#allocation5 + $0x70] sm:$0xff] }
 0x2cc   :  { %4607 = vmatprep.mubr.msk.f32.mxu1 %vm1837_vm4, %v1627_v10  ;;  %v1628_v31 = vld [vmem:[#allocation5 + $0x78] sm:$0xff]  ;;  %v2619_v55 = vpop.permute.xlu1 %2618 }
 0x2cd   :  { %4608 = vmatmul.mubr.msk.f32.gmra.mxu1 %vm1837_vm4, %v1628_v31  ;;  %2642 = vst.msk [vmem:[#allocation7 + $0x40] sm:$0xff] %vm901_vm10, %v2619_v55  ;;  %v2960_v31 = vld [vmem:[%s6872_s10 + $0x30] sm:$0xff]  ;;  %v2959_v55 = vld [vmem:[%s6872_s10 + $0x28] sm:$0xff] }
 0x2ce   :  { %4614 = vmatprep.subr.mxu0 %v2960_v31 }
 0x2cf   :  { %4615 = vmatpush3.msra.mxu0 %v2960_v31 }
 0x2d0   :  { %4616 = vmatprep.subr.mxu0 %v2959_v55 }
 0x2d1   :  { %4617 = vmatpush3.msra.mxu0 %v2959_v55 }
 0x2e1   :  { %v4588_v26 = vpop.f32.mrf.mxu1 }
 0x2e2   :  { %v5925_v59 = vadd.f32 %v4588_v26, %v5850_v34 }
 0x2e3   :  { %v1952_v63 = vpop.f32.mrf.mxu1 }
 0x2e4   :  { %v2042_v16 = vmul.f32 %v5922_v57, %v5925_v59  ;;  %v5935_v36 = vadd.f32 %v1952_v63, %v5852_v8 }
 0x2e6   :  { %v2064_v37 = vadd.f32 %v5930_v12, %v2042_v16  ;;  %v2041_v48 = vmul.f32 %v5922_v57, %v5935_v36 }
 0x2e8   :  { %v2080_v49 = vmax.f32 %v2064_v37, 0.0  ;;  %v2063_v3 = vadd.f32 %v5930_v12, %v2041_v48  ;;  %v2957_v48 = vld [vmem:[%s6872_s10 + $0x18] sm:$0xff] }
 0x2ea   :  { %2122 = vst.msk [vmem:[#allocation6 + $0x21] sm:$0xff] %vm759_vm2, %v2080_v49  ;;  %v2079_v13 = vmax.f32 %v2063_v3, 0.0  ;;  %v2956_v3 = vld [vmem:[%s6872_s10 + $0x10] sm:$0xff] }
 0x2ec   :  { %2121 = vst.msk [vmem:[#allocation6 + $0x11] sm:$0xff] %vm759_vm2, %v2079_v13  ;;  %v2955_v13 = vld [vmem:[%s6872_s10 + $0x8] sm:$0xff] }
 0x2f1   :  { %v2242_v41 = vld [vmem:[#allocation6 + $0x20] sm:$0xff] }
 0x2f2   :  { %v2290_v15 = vld [vmem:[#allocation6 + $0x21] sm:$0xff]  ;;  %2259 = vrot.lane.b32.xlu1 %v2242_v41, %s4728_s1  ;;  %2139 = vst.msk [vmem:[#allocation7 + $0x10] sm:$0xff] %vm759_vm2, %v2242_v41 }
 0x2f3   :  { %2307 = vrot.lane.b32.xlu0 %v2290_v15, %s4723_s23  ;;  %v2241_v19 = vld [vmem:[#allocation6 + $0x10] sm:$0xff]  ;;  %v2338_v33 = vld [vmem:[#allocation6 + $0x22] sm:$0xff] }
 0x2f4   :  { %2138 = vst.msk [vmem:[#allocation7 + $0x8] sm:$0xff] %vm759_vm2, %v2241_v19  ;;  %v2289_v20 = vld [vmem:[#allocation6 + $0x11] sm:$0xff] }
 0x2f5   :  { %v2194_v32 = vld [vmem:[#allocation6 + $0x12] sm:$0xff] }
 0x2f6   :  { %2165 = vrot.lane.b32.xlu1 %v2290_v15, %s4725_s0 }
 0x2f7   :  { %2355 = vrot.lane.b32.xlu0 %v2338_v33, %s4729_s7 }
 0x2fa   :  { %2213 = vrot.lane.b32.xlu1 %v2338_v33, %s4722_s22 }
 0x2fb   :  { %2257 = vrot.lane.b32.xlu0 %v2241_v19, %s4728_s1 }
 0x2fe   :  { %2402 = vrot.lane.b32.xlu1 %v2242_v41, %s4724_s3  ;;  %v2954_v41 = vld [vmem:[%s6872_s10] sm:$0xff] }
 0x2ff   :  { %2305 = vrot.lane.b32.xlu0 %v2289_v20, %s4723_s23 }
 0x301   :  { %v4591_v21 = vpop.f32.mrf.mxu1 }
 0x302   :  { %v5954_v22 = vadd.f32 %v4591_v21, %v5855_v42  ;;  %2450 = vrot.lane.b32.xlu1 %v2290_v15, %s4726_s29 }
 0x303   :  { %v1962_v24 = vpop.f32.mrf.mxu1 }
 0x304   :  { %v2044_v25 = vmul.f32 %v5922_v57, %v5954_v22  ;;  %v5960_v34 = vadd.f32 %v1962_v24, %v5858_v27 }
 0x306   :  { %v2066_v39 = vadd.f32 %v5930_v12, %v2044_v25  ;;  %v2043_v51 = vmul.f32 %v5922_v57, %v5960_v34  ;;  %2498 = vrot.lane.b32.xlu1 %v2338_v33, %s4727_s30  ;;  %v6065_v25 = vpop.permute.xlu0 %2416 }
 0x308   :  { %v2082_v8 = vmax.f32 %v2066_v39, 0.0  ;;  %v2065_v35 = vadd.f32 %v5930_v12, %v2043_v51  ;;  %v6069_v51 = vpop.permute.xlu1 %2824 }
 0x30a   :  { %2124 = vst.msk [vmem:[#allocation6 + $0x41] sm:$0xff] %vm759_vm2, %v2082_v8  ;;  %v2081_v38 = vmax.f32 %v2065_v35, 0.0  ;;  %2163 = vrot.lane.b32.xlu1 %v2289_v20, %s4725_s0  ;;  %v6071_v8 = vpop.permute.xlu0 %2464 }
 0x30c   :  { %2123 = vst.msk [vmem:[#allocation6 + $0x31] sm:$0xff] %vm759_vm2, %v2081_v38  ;;  %v4594_v42 = vpop.f32.mrf.mxu1 }
 0x30d   :  { %v5971_v45 = vadd.f32 %v4594_v42, %v5866_v4 }
 0x30e   :  { %2211 = vrot.lane.b32.xlu1 %v2194_v32, %s4722_s22  ;;  %v1972_v27 = vpop.f32.mrf.mxu1 }
 0x30f   :  { %v2046_v54 = vmul.f32 %v5922_v57, %v5971_v45  ;;  %v5977_v2 = vadd.f32 %v1972_v27, %v5872_v61 }
 0x311   :  { %v2244_v60 = vld [vmem:[#allocation6 + $0x40] sm:$0xff]  ;;  %v2068_v46 = vadd.f32 %v5930_v12, %v2046_v54  ;;  %v2045_v62 = vmul.f32 %v5922_v57, %v5977_v2 }
 0x312   :  { %2353 = vrot.lane.b32.xlu1 %v2194_v32, %s4729_s7  ;;  %2263 = vrot.lane.b32.xlu0 %v2244_v60, %s4728_s1  ;;  %2141 = vst.msk [vmem:[#allocation7 + $0x20] sm:$0xff] %vm759_vm2, %v2244_v60  ;;  %v2292_v61 = vld [vmem:[#allocation6 + $0x41] sm:$0xff] }
 0x313   :  { %v2387_v4 = vld [vmem:[#allocation6 + $0x30] sm:$0xff]  ;;  %v2084_v0 = vmax.f32 %v2068_v46, 0.0  ;;  %v2067_v5 = vadd.f32 %v5930_v12, %v2045_v62  ;;  %v2197_v58 = vld [vmem:[#allocation6 + $0x42] sm:$0xff] }
 0x314   :  { %2140 = vst.msk [vmem:[#allocation7 + $0x18] sm:$0xff] %vm759_vm2, %v2387_v4  ;;  %v2148_v18 = vld [vmem:[#allocation6 + $0x31] sm:$0xff] }
 0x315   :  { %2126 = vst.msk [vmem:[#allocation6 + $0x61] sm:$0xff] %vm759_vm2, %v2084_v0  ;;  %v2083_v6 = vmax.f32 %v2067_v5, 0.0 }
 0x316   :  { %2311 = vrot.lane.b32.xlu1 %v2292_v61, %s4723_s23  ;;  %2169 = vrot.lane.b32.xlu0 %v2292_v61, %s4725_s0 }
 0x317   :  { %2125 = vst.msk [vmem:[#allocation6 + $0x51] sm:$0xff] %vm759_vm2, %v2083_v6 }
 0x31a   :  { %2217 = vrot.lane.b32.xlu1 %v2197_v58, %s4722_s22  ;;  %2359 = vrot.lane.b32.xlu0 %v2197_v58, %s4729_s7 }
 0x31c   :  { %v2246_v28 = vld [vmem:[#allocation6 + $0x60] sm:$0xff] }
 0x31d   :  { %v4597_v17 = vpop.f32.mrf.mxu1  ;;  %2143 = vst.msk [vmem:[#allocation7 + $0x30] sm:$0xff] %vm759_vm2, %v2246_v28  ;;  %v2294_v19 = vld [vmem:[#allocation6 + $0x61] sm:$0xff] }
 0x31e   :  { %v6000_v10 = vadd.f32 %v4597_v17, %v5881_v7  ;;  %2406 = vrot.lane.b32.xlu1 %v2244_v60, %s4724_s3  ;;  %2167 = vrot.lane.b32.xlu0 %v2148_v18, %s4725_s0  ;;  %v2389_v47 = vld [vmem:[#allocation6 + $0x50] sm:$0xff]  ;;  %v2199_v33 = vld [vmem:[#allocation6 + $0x62] sm:$0xff] }
 0x31f   :  { %v1982_v44 = vpop.f32.mrf.mxu1  ;;  %2142 = vst.msk [vmem:[#allocation7 + $0x28] sm:$0xff] %vm759_vm2, %v2389_v47  ;;  %v2196_v7 = vld [vmem:[#allocation6 + $0x32] sm:$0xff] }
 0x320   :  { %v2048_v23 = vmul.f32 %v5922_v57, %v6000_v10  ;;  %v6011_v53 = vadd.f32 %v1982_v44, %v5886_v11  ;;  %v2958_v11 = vld [vmem:[%s6872_s10 + $0x20] sm:$0xff] }
 0x321   :  { %4618 = vmatprep.subr.mxu0 %v2958_v11  ;;  %v2150_v20 = vld [vmem:[#allocation6 + $0x51] sm:$0xff] }
 0x322   :  { %v2070_v26 = vadd.f32 %v5930_v12, %v2048_v23  ;;  %v2047_v63 = vmul.f32 %v5922_v57, %v6011_v53  ;;  %2454 = vrot.lane.b32.xlu1 %v2292_v61, %s4726_s29  ;;  %2215 = vrot.lane.b32.xlu0 %v2196_v7, %s4722_s22  ;;  %v2198_v21 = vld [vmem:[#allocation6 + $0x52] sm:$0xff] }
 0x323   :  { %4619 = vmatpush3.msra.mxu0 %v2958_v11 }
 0x324   :  { %v2086_v16 = vmax.f32 %v2070_v26, 0.0  ;;  %v2069_v37 = vadd.f32 %v5930_v12, %v2047_v63  ;;  %4620 = vmatprep.subr.mxu0 %v2957_v48 }
 0x325   :  { %4621 = vmatpush3.msra.mxu0 %v2957_v48 }
 0x326   :  { %2128 = vst.msk [vmem:[#allocation6 + $0x81] sm:$0xff] %vm759_vm2, %v2086_v16  ;;  %v2085_v49 = vmax.f32 %v2069_v37, 0.0  ;;  %2502 = vrot.lane.b32.xlu1 %v2197_v58, %s4727_s30  ;;  %2404 = vrot.lane.b32.xlu0 %v2387_v4, %s4724_s3 }
 0x327   :  { %4622 = vmatprep.subr.mxu0 %v2956_v3 }
 0x328   :  { %2127 = vst.msk [vmem:[#allocation6 + $0x71] sm:$0xff] %vm759_vm2, %v2085_v49  ;;  %4623 = vmatpush3.msra.mxu0 %v2956_v3 }
 0x329   :  { %4624 = vmatprep.subr.mxu0 %v2955_v13 }
 0x32a   :  { %2261 = vrot.lane.b32.xlu1 %v2387_v4, %s4728_s1  ;;  %2452 = vrot.lane.b32.xlu0 %v2148_v18, %s4726_s29  ;;  %v6090_v4 = vpop.permute.xlu0 %2512 }
 0x32b   :  { %4625 = vmatpush3.msra.mxu0 %v2955_v13 }
 0x32c   :  { %4626 = vmatprep.subr.mxu0 %v2954_v41 }
 0x32d   :  { %4627 = vmatpush3.msra.mxu0 %v2954_v41  ;;  %v2248_v24 = vld [vmem:[#allocation6 + $0x80] sm:$0xff] }
 0x32e   :  { %2309 = vrot.lane.b32.xlu1 %v2148_v18, %s4723_s23  ;;  %2357 = vrot.lane.b32.xlu0 %v2196_v7, %s4729_s7  ;;  %v2296_v39 = vld [vmem:[#allocation6 + $0x81] sm:$0xff] }
 0x32f   :  { %v2247_v15 = vld [vmem:[#allocation6 + $0x70] sm:$0xff]  ;;  %v2344_v38 = vld [vmem:[#allocation6 + $0x82] sm:$0xff] }
 0x330   :  { %2144 = vst.msk [vmem:[#allocation7 + $0x38] sm:$0xff] %vm759_vm2, %v2247_v15  ;;  %v2152_v60 = vld [vmem:[#allocation6 + $0x71] sm:$0xff] }
 0x331   :  { %v2200_v61 = vld [vmem:[#allocation6 + $0x72] sm:$0xff] }
 0x332   :  { %2500 = vrot.lane.b32.xlu1 %v2196_v7, %s4727_s30  ;;  %2267 = vrot.lane.b32.xlu0 %v2246_v28, %s4728_s1 }
 0x336   :  { %2315 = vrot.lane.b32.xlu1 %v2294_v19, %s4723_s23  ;;  %2173 = vrot.lane.b32.xlu0 %v2294_v19, %s4725_s0 }
 0x33a   :  { %2221 = vrot.lane.b32.xlu1 %v2199_v33, %s4722_s22  ;;  %2363 = vrot.lane.b32.xlu0 %v2199_v33, %s4729_s7 }
 0x33e   :  { %2410 = vrot.lane.b32.xlu1 %v2246_v28, %s4724_s3  ;;  %2171 = vrot.lane.b32.xlu0 %v2150_v20, %s4725_s0 }
 0x342   :  { %2458 = vrot.lane.b32.xlu1 %v2294_v19, %s4726_s29  ;;  %2219 = vrot.lane.b32.xlu0 %v2198_v21, %s4722_s22 }
 0x346   :  { %2506 = vrot.lane.b32.xlu1 %v2199_v33, %s4727_s30  ;;  %2408 = vrot.lane.b32.xlu0 %v2389_v47, %s4724_s3 }
 0x34a   :  { %2265 = vrot.lane.b32.xlu1 %v2389_v47, %s4728_s1  ;;  %2456 = vrot.lane.b32.xlu0 %v2150_v20, %s4726_s29 }
 0x34e   :  { %2313 = vrot.lane.b32.xlu1 %v2150_v20, %s4723_s23  ;;  %2361 = vrot.lane.b32.xlu0 %v2198_v21, %s4729_s7 }
 0x352   :  { %2504 = vrot.lane.b32.xlu1 %v2198_v21, %s4727_s30  ;;  %2271 = vrot.lane.b32.xlu0 %v2248_v24, %s4728_s1 }
 0x356   :  { %2414 = vrot.lane.b32.xlu1 %v2248_v24, %s4724_s3  ;;  %2319 = vrot.lane.b32.xlu0 %v2296_v39, %s4723_s23 }
 0x35a   :  { %v4600_v35 = vpop.f32.mrf.mxu1  ;;  %2462 = vrot.lane.b32.xlu1 %v2296_v39, %s4726_s29  ;;  %2367 = vrot.lane.b32.xlu0 %v2344_v38, %s4729_s7 }
 0x35b   :  { %v6074_v42 = vadd.f32 %v4600_v35, %v5890_v14  ;;  %v6088_v14 = vpop.permute.xlu1 %2872 }
 0x35c   :  { %v1992_v32 = vpop.f32.mrf.mxu1 }
 0x35d   :  { %v2050_v27 = vmul.f32 %v5922_v57, %v6074_v42  ;;  %v6081_v54 = vadd.f32 %v1992_v32, %v5896_v29 }
 0x35e   :  { %2510 = vrot.lane.b32.xlu1 %v2344_v38, %s4727_s30  ;;  %2175 = vrot.lane.b32.xlu0 %v2152_v60, %s4725_s0 }
 0x35f   :  { %v2072_v46 = vadd.f32 %v5930_v12, %v2050_v27  ;;  %v2049_v62 = vmul.f32 %v5922_v57, %v6081_v54 }
 0x361   :  { %v2088_v0 = vmax.f32 %v2072_v46, 0.0  ;;  %v2071_v5 = vadd.f32 %v5930_v12, %v2049_v62 }
 0x362   :  { %2269 = vrot.lane.b32.xlu1 %v2247_v15, %s4728_s1  ;;  %2223 = vrot.lane.b32.xlu0 %v2200_v61, %s4722_s22 }
 0x363   :  { %v2087_v29 = vmax.f32 %v2071_v5, 0.0  ;;  %2531 = vst.msk [vmem:[#allocation6 + $0x21] sm:$0xff] %vm759_vm2, %v2088_v0 }
 0x364   :  { %v2260_v6 = vpop.permute.xlu1 %2259 }
 0x365   :  { %v2308_v58 = vpop.permute.xlu0 %2307  ;;  %2530 = vst.msk [vmem:[#allocation6 + $0x11] sm:$0xff] %vm759_vm2, %v2087_v29 }
 0x366   :  { %2317 = vrot.lane.b32.xlu1 %v2152_v60, %s4723_s23  ;;  %2412 = vrot.lane.b32.xlu0 %v2247_v15, %s4724_s3 }
 0x368   :  { %v2166_v9 = vpop.permute.xlu1 %2165 }
 0x369   :  { %v2356_v1 = vpop.permute.xlu0 %2355  ;;  %2187 = vst.msk [vmem:[#allocation7 + $0x10] sm:$0xff] %vm852_vm9, %v2166_v9 }
 0x36a   :  { %v2651_v17 = vld [vmem:[#allocation6 + $0x20] sm:$0xff]  ;;  %2365 = vrot.lane.b32.xlu1 %v2200_v61, %s4729_s7  ;;  %2460 = vrot.lane.b32.xlu0 %v2152_v60, %s4726_s29 }
 0x36b   :  { %2548 = vst.msk [vmem:[#allocation7 + $0x50] sm:$0xff] %vm759_vm2, %v2651_v17  ;;  %v2556_v44 = vld [vmem:[#allocation6 + $0x21] sm:$0xff] }
 0x36c   :  { %v2650_v18 = vld [vmem:[#allocation6 + $0x10] sm:$0xff]  ;;  %v2214_v28 = vpop.permute.xlu1 %2213  ;;  %v2604_v7 = vld [vmem:[#allocation6 + $0x22] sm:$0xff] }
 0x36d   :  { %v2258_v31 = vpop.permute.xlu0 %2257  ;;  %2547 = vst.msk [vmem:[#allocation7 + $0x48] sm:$0xff] %vm759_vm2, %v2650_v18  ;;  %v2555_v3 = vld [vmem:[#allocation6 + $0x11] sm:$0xff] }
 0x36e   :  { %2235 = vst.msk [vmem:[#allocation7 + $0x10] sm:$0xff] %vm901_vm10, %v2214_v28  ;;  %2574 = vrot.lane.b32.xlu1 %v2556_v44, %s4725_s0  ;;  %2508 = vrot.lane.b32.xlu0 %v2200_v61, %s4727_s30 }
 0x36f   :  { %2281 = vst.msk [vmem:[#allocation7] sm:$0xff] %vm950_vm13, %v2258_v31 }
 0x370   :  { %v2403_v47 = vpop.permute.xlu1 %2402 }
 0x371   :  { %v2306_v23 = vpop.permute.xlu0 %2305 }
 0x372   :  { %2329 = vst.msk [vmem:[#allocation7] sm:$0xff] %vm999_vm14, %v2306_v23  ;;  %2622 = vrot.lane.b32.xlu1 %v2604_v7, %s4722_s22  ;;  %2668 = vrot.lane.b32.xlu0 %v2651_v17, %s4728_s1 }
 0x374   :  { %v2451_v55 = vpop.permute.xlu1 %2450 }
 0x376   :  { %2810 = vrot.lane.b32.xlu1 %v2651_v17, %s4724_s3  ;;  %2716 = vrot.lane.b32.xlu0 %v2556_v44, %s4723_s23 }
 0x378   :  { %v2499_v26 = vpop.permute.xlu1 %2498 }
 0x379   :  { %v4603_v63 = vpop.f32.mrf.mxu1 }
 0x37a   :  { %v6114_v11 = vadd.f32 %v4603_v63, %v5899_v30  ;;  %2858 = vrot.lane.b32.xlu1 %v2556_v44, %s4726_s29  ;;  %2764 = vrot.lane.b32.xlu0 %v2604_v7, %s4729_s7 }
 0x37b   :  { %v2002_v16 = vpop.f32.mrf.mxu1 }
 0x37c   :  { %v2052_v37 = vmul.f32 %v5922_v57, %v6114_v11  ;;  %v6121_v48 = vadd.f32 %v2002_v16, %v5903_v40  ;;  %v2164_v49 = vpop.permute.xlu1 %2163  ;;  %v2603_v40 = vld [vmem:[#allocation6 + $0x12] sm:$0xff] }
 0x37d   :  { %2186 = vst.msk [vmem:[#allocation7 + $0x8] sm:$0xff] %vm852_vm9, %v2164_v49 }
 0x37e   :  { %v2074_v13 = vadd.f32 %v5930_v12, %v2052_v37  ;;  %v2051_v30 = vmul.f32 %v5922_v57, %v6121_v48  ;;  %2906 = vrot.lane.b32.xlu1 %v2604_v7, %s4727_s30  ;;  %2572 = vrot.lane.b32.xlu0 %v2555_v3, %s4725_s0 }
 0x380   :  { %v2090_v41 = vmax.f32 %v2074_v13, 0.0  ;;  %v2073_v15 = vadd.f32 %v5930_v12, %v2051_v30  ;;  %v2212_v19 = vpop.permute.xlu1 %2211 }
 0x381   :  { %2234 = vst.msk [vmem:[#allocation7 + $0x8] sm:$0xff] %vm901_vm10, %v2212_v19 }
 0x382   :  { %v2089_v33 = vmax.f32 %v2073_v15, 0.0  ;;  %2282 = vst.msk [vmem:[#allocation7 + $0x8] sm:$0xff] %vm950_vm13, %v2260_v6  ;;  %2666 = vrot.lane.b32.xlu1 %v2650_v18, %s4728_s1  ;;  %2620 = vrot.lane.b32.xlu0 %v2603_v40, %s4722_s22 }
 0x383   :  { %2533 = vst.msk [vmem:[#allocation6 + $0x41] sm:$0xff] %vm759_vm2, %v2090_v41 }
 0x384   :  { %2330 = vst.msk [vmem:[#allocation7 + $0x8] sm:$0xff] %vm999_vm14, %v2308_v58  ;;  %v2354_v20 = vpop.permute.xlu1 %2353  ;;  %v2264_v21 = vpop.permute.xlu0 %2263 }
 0x385   :  { %2378 = vst.msk [vmem:[#allocation7 + $0x8] sm:$0xff] %vm1048_vm15, %v2356_v1  ;;  %2377 = vst.msk [vmem:[#allocation7] sm:$0xff] %vm1048_vm15, %v2354_v20  ;;  %v4606_v24 = vpop.f32.mrf.mxu1 }
 0x386   :  { %2532 = vst.msk [vmem:[#allocation6 + $0x31] sm:$0xff] %vm759_vm2, %v2089_v33  ;;  %2714 = vrot.lane.b32.xlu1 %v2555_v3, %s4723_s23  ;;  %v6143_v39 = vadd.f32 %v4606_v24, %v5908_v52 }
 0x387   :  { %2426 = vst.msk [vmem:[#allocation7] sm:$0xff] %vm1098_vm0, %v2403_v47  ;;  %v2012_v35 = vpop.f32.mrf.mxu1 }
 0x388   :  { %2474 = vst.msk [vmem:[#allocation7] sm:$0xff] %vm1147_vm1, %v2451_v55  ;;  %v2312_v38 = vpop.permute.xlu1 %2311  ;;  %v2054_v32 = vmul.f32 %v5922_v57, %v6143_v39  ;;  %v6149_v27 = vadd.f32 %v2012_v35, %v5911_v50  ;;  %v2170_v60 = vpop.permute.xlu0 %2169 }
 0x389   :  { %2522 = vst.msk [vmem:[#allocation7] sm:$0xff] %vm1196_vm3, %v2499_v26 }
 0x38a   :  { %v2653_v46 = vld [vmem:[#allocation6 + $0x40] sm:$0xff]  ;;  %2189 = vst.msk [vmem:[#allocation7 + $0x20] sm:$0xff] %vm852_vm9, %v2170_v60  ;;  %2762 = vrot.lane.b32.xlu1 %v2603_v40, %s4729_s7  ;;  %v2076_v52 = vadd.f32 %v5930_v12, %v2054_v32  ;;  %v2053_v62 = vmul.f32 %v5922_v57, %v6149_v27 }
 0x38b   :  { %2672 = vrot.lane.b32.xlu0 %v2653_v46, %s4728_s1  ;;  %2550 = vst.msk [vmem:[#allocation7 + $0x60] sm:$0xff] %vm759_vm2, %v2653_v46  ;;  %v2701_v58 = vld [vmem:[#allocation6 + $0x41] sm:$0xff] }
 0x38c   :  { %v2218_v5 = vpop.permute.xlu1 %2217  ;;  %v2092_v50 = vmax.f32 %v2076_v52, 0.0  ;;  %v2075_v61 = vadd.f32 %v5930_v12, %v2053_v62  ;;  %v2360_v29 = vpop.permute.xlu0 %2359  ;;  %v2606_v47 = vld [vmem:[#allocation6 + $0x42] sm:$0xff] }
 0x38d   :  { %v6158_v0 = vld [vmem:[#allocation6 + $0x30] sm:$0xff]  ;;  %2237 = vst.msk [vmem:[#allocation7 + $0x20] sm:$0xff] %vm901_vm10, %v2218_v5  ;;  %v4609_v6 = vpop.f32.mrf.mxu1 }
 0x38e   :  { %2549 = vst.msk [vmem:[#allocation7 + $0x58] sm:$0xff] %vm759_vm2, %v6158_v0  ;;  %v6165_v9 = vadd.f32 %v4609_v6, %v5915_v43  ;;  %2720 = vrot.lane.b32.xlu1 %v2701_v58, %s4723_s23  ;;  %v2091_v1 = vmax.f32 %v2075_v61, 0.0  ;;  %2535 = vst.msk [vmem:[#allocation6 + $0x61] sm:$0xff] %vm759_vm2, %v2092_v50  ;;  %v2557_v16 = vld [vmem:[#allocation6 + $0x31] sm:$0xff] }
 0x38f   :  { %2578 = vrot.lane.b32.xlu0 %v2701_v58, %s4725_s0  ;;  %v2022_v17 = vpop.f32.mrf.mxu1  ;;  %v2605_v13 = vld [vmem:[#allocation6 + $0x32] sm:$0xff] }
 0x390   :  { %v2938_v18 = vld [vmem:[#allocation7] sm:$0xff]  ;;  %v2056_v28 = vmul.f32 %v5922_v57, %v6165_v9  ;;  %v6173_v31 = vadd.f32 %v2022_v17, %v5917_v56  ;;  %v2407_v44 = vpop.permute.xlu1 %2406  ;;  %v2168_v43 = vpop.permute.xlu0 %2167  ;;  %2534 = vst.msk [vmem:[#allocation6 + $0x51] sm:$0xff] %vm759_vm2, %v2091_v1 }
 0x391   :  { %4628 = vmatprep.mubr.msk.f32.mxu0 %vm1837_vm4, %v2938_v18  ;;  %2188 = vst.msk [vmem:[#allocation7 + $0x18] sm:$0xff] %vm852_vm9, %v2168_v43 }
 0x392   :  { %v2078_v23 = vadd.f32 %v5930_v12, %v2056_v28  ;;  %v2055_v7 = vmul.f32 %v5922_v57, %v6173_v31  ;;  %2626 = vrot.lane.b32.xlu1 %v2606_v47, %s4722_s22 }
 0x393   :  { %2768 = vrot.lane.b32.xlu0 %v2606_v47, %s4729_s7 }
 0x394   :  { %v2094_v56 = vmax.f32 %v2078_v23, 0.0  ;;  %v2077_v55 = vadd.f32 %v5930_v12, %v2055_v7  ;;  %v2455_v26 = vpop.permute.xlu1 %2454  ;;  %v2216_v63 = vpop.permute.xlu0 %2215 }
 0x395   :  { %2236 = vst.msk [vmem:[#allocation7 + $0x18] sm:$0xff] %vm901_vm10, %v2216_v63  ;;  %v2655_v57 = vld [vmem:[#allocation6 + $0x60] sm:$0xff] }
 0x396   :  { %2537 = vst.msk [vmem:[#allocation6 + $0x81] sm:$0xff] %vm759_vm2, %v2094_v56  ;;  %v2093_v37 = vmax.f32 %v2077_v55, 0.0  ;;  %2814 = vrot.lane.b32.xlu1 %v2653_v46, %s4724_s3  ;;  %2552 = vst.msk [vmem:[#allocation7 + $0x70] sm:$0xff] %vm759_vm2, %v2655_v57  ;;  %v2703_v46 = vld [vmem:[#allocation6 + $0x61] sm:$0xff] }
 0x397   :  { %2576 = vrot.lane.b32.xlu0 %v2557_v16, %s4725_s0  ;;  %2284 = vst.msk [vmem:[#allocation7 + $0x18] sm:$0xff] %vm950_vm13, %v2264_v21  ;;  %v6191_v49 = vld [vmem:[#allocation6 + $0x50] sm:$0xff] }
 0x398   :  { %2332 = vst.msk [vmem:[#allocation7 + $0x18] sm:$0xff] %vm999_vm14, %v2312_v38  ;;  %v2503_v12 = vpop.permute.xlu1 %2502  ;;  %v2405_v3 = vpop.permute.xlu0 %2404  ;;  %v2559_v61 = vld [vmem:[#allocation6 + $0x51] sm:$0xff] }
 0x399   :  { %2536 = vst.msk [vmem:[#allocation6 + $0x71] sm:$0xff] %vm759_vm2, %v2093_v37  ;;  %2551 = vst.msk [vmem:[#allocation7 + $0x68] sm:$0xff] %vm759_vm2, %v6191_v49 }
 0x39a   :  { %2380 = vst.msk [vmem:[#allocation7 + $0x18] sm:$0xff] %vm1048_vm15, %v2360_v29  ;;  %2862 = vrot.lane.b32.xlu1 %v2701_v58, %s4726_s29  ;;  %v2607_v58 = vld [vmem:[#allocation6 + $0x52] sm:$0xff] }
 0x39b   :  { %2427 = vst.msk [vmem:[#allocation7 + $0x8] sm:$0xff] %vm1098_vm0, %v2405_v3  ;;  %2624 = vrot.lane.b32.xlu0 %v2605_v13, %s4722_s22 }
 0x39c   :  { %v2262_v30 = vpop.permute.xlu1 %2261  ;;  %v2453_v41 = vpop.permute.xlu0 %2452 }
 0x39d   :  { %2283 = vst.msk [vmem:[#allocation7 + $0x10] sm:$0xff] %vm950_vm13, %v2262_v30  ;;  %v2657_v7 = vld [vmem:[#allocation6 + $0x80] sm:$0xff] }
 0x39e   :  { %2475 = vst.msk [vmem:[#allocation7 + $0x8] sm:$0xff] %vm1147_vm1, %v2453_v41  ;;  %2910 = vrot.lane.b32.xlu1 %v2606_v47, %s4727_s30  ;;  %v2705_v37 = vld [vmem:[#allocation6 + $0x81] sm:$0xff] }
 0x39f   :  { %2812 = vrot.lane.b32.xlu0 %v6158_v0, %s4724_s3 }
 0x3a0   :  { %v6205_v15 = vld [vmem:[#allocation6 + $0x70] sm:$0xff]  ;;  %v2310_v19 = vpop.permute.xlu1 %2309  ;;  %v2358_v40 = vpop.permute.xlu0 %2357 }
 0x3a1   :  { %2553 = vst.msk [vmem:[#allocation7 + $0x78] sm:$0xff] %vm759_vm2, %v6205_v15 }
 0x3a2   :  { %2331 = vst.msk [vmem:[#allocation7 + $0x10] sm:$0xff] %vm999_vm14, %v2310_v19  ;;  %2670 = vrot.lane.b32.xlu1 %v6158_v0, %s4728_s1  ;;  %v2608_v0 = vld [vmem:[#allocation6 + $0x62] sm:$0xff]  ;;  %v2752_v19 = vld [vmem:[#allocation6 + $0x72] sm:$0xff] }
 0x3a3   :  { %2379 = vst.msk [vmem:[#allocation7 + $0x10] sm:$0xff] %vm1048_vm15, %v2358_v40  ;;  %2860 = vrot.lane.b32.xlu0 %v2557_v16, %s4726_s29  ;;  %v2897_v40 = vld [vmem:[#allocation6 + $0x92] sm:$0xff] }
 0x3a4   :  { %2428 = vst.msk [vmem:[#allocation7 + $0x10] sm:$0xff] %vm1098_vm0, %v2407_v44  ;;  %v2501_v33 = vpop.permute.xlu1 %2500  ;;  %v2268_v20 = vpop.permute.xlu0 %2267 }
 0x3a5   :  { %2476 = vst.msk [vmem:[#allocation7 + $0x10] sm:$0xff] %vm1147_vm1, %v2455_v26 }
 0x3a6   :  { %2524 = vst.msk [vmem:[#allocation7 + $0x10] sm:$0xff] %vm1196_vm3, %v2503_v12  ;;  %2523 = vst.msk [vmem:[#allocation7 + $0x8] sm:$0xff] %vm1196_vm3, %v2501_v33  ;;  %2718 = vrot.lane.b32.xlu1 %v2557_v16, %s4723_s23  ;;  %v2753_v16 = vld [vmem:[#allocation6 + $0x82] sm:$0xff] }
 0x3a7   :  { %2766 = vrot.lane.b32.xlu0 %v2605_v13, %s4729_s7 }
 0x3a8   :  { %v2316_v21 = vpop.permute.xlu1 %2315  ;;  %v2174_v24 = vpop.permute.xlu0 %2173 }
 0x3a9   :  { %2191 = vst.msk [vmem:[#allocation7 + $0x30] sm:$0xff] %vm852_vm9, %v2174_v24 }
 0x3aa   :  { %2908 = vrot.lane.b32.xlu1 %v2605_v13, %s4727_s30  ;;  %v2704_v13 = vld [vmem:[#allocation6 + $0x71] sm:$0xff] }
 0x3ab   :  { %2676 = vrot.lane.b32.xlu0 %v2655_v57, %s4728_s1 }
 0x3ac   :  { %v2222_v35 = vpop.permute.xlu1 %2221  ;;  %v2364_v60 = vpop.permute.xlu0 %2363 }
 0x3ad   :  { %v2939_v38 = vld [vmem:[#allocation7 + $0x8] sm:$0xff]  ;;  %v2940_v32 = vld [vmem:[#allocation7 + $0x10] sm:$0xff]  ;;  %2239 = vst.msk [vmem:[#allocation7 + $0x30] sm:$0xff] %vm901_vm10, %v2222_v35 }
 0x3ae   :  { %4629 = vmatmul.mubr.msk.f32.vlgmr.msra.gmra.mxu0 %vm1837_vm4, %v2939_v38  ;;  %2724 = vrot.lane.b32.xlu1 %v2703_v46, %s4723_s23 }
 0x3af   :  { %2582 = vrot.lane.b32.xlu0 %v2703_v46, %s4725_s0  ;;  %4631 = vmatprep.mubr.msk.f32.mxu0 %vm1837_vm4, %v2940_v32 }
 0x3b0   :  { %v2411_v52 = vpop.permute.xlu1 %2410  ;;  %v2172_v62 = vpop.permute.xlu0 %2171 }
 0x3b1   :  { %2190 = vst.msk [vmem:[#allocation7 + $0x28] sm:$0xff] %vm852_vm9, %v2172_v62 }
 0x3b2   :  { %2630 = vrot.lane.b32.xlu1 %v2608_v0, %s4722_s22 }
 0x3b3   :  { %2772 = vrot.lane.b32.xlu0 %v2608_v0, %s4729_s7 }
 0x3b4   :  { %v2459_v5 = vpop.permute.xlu1 %2458  ;;  %v2220_v50 = vpop.permute.xlu0 %2219 }
 0x3b5   :  { %2238 = vst.msk [vmem:[#allocation7 + $0x28] sm:$0xff] %vm901_vm10, %v2220_v50 }
 0x3b6   :  { %2818 = vrot.lane.b32.xlu1 %v2655_v57, %s4724_s3  ;;  %2286 = vst.msk [vmem:[#allocation7 + $0x28] sm:$0xff] %vm950_vm13, %v2268_v20 }
 0x3b7   :  { %2580 = vrot.lane.b32.xlu0 %v2559_v61, %s4725_s0  ;;  %2334 = vst.msk [vmem:[#allocation7 + $0x28] sm:$0xff] %vm999_vm14, %v2316_v21 }
 0x3b8   :  { %v2507_v29 = vpop.permute.xlu1 %2506  ;;  %2382 = vst.msk [vmem:[#allocation7 + $0x28] sm:$0xff] %vm1048_vm15, %v2364_v60  ;;  %v2409_v6 = vpop.permute.xlu0 %2408  ;;  %v3266_v60 = vld [vmem:[#allocation8 + $0x1] sm:$0xff] }
 0x3b9   :  { %2429 = vst.msk [vmem:[#allocation7 + $0x18] sm:$0xff] %vm1098_vm0, %v2409_v6 }
 0x3ba   :  { %2866 = vrot.lane.b32.xlu1 %v2703_v46, %s4726_s29 }
 0x3bb   :  { %2628 = vrot.lane.b32.xlu0 %v2607_v58, %s4722_s22 }
 0x3bc   :  { %v2266_v1 = vpop.permute.xlu1 %2265  ;;  %v2457_v17 = vpop.permute.xlu0 %2456 }
 0x3bd   :  { %2285 = vst.msk [vmem:[#allocation7 + $0x20] sm:$0xff] %vm950_vm13, %v2266_v1  ;;  %v3610_v1 = vld [vmem:[#allocation8 + $0x92] sm:$0xff] }
 0x3be   :  { %2477 = vst.msk [vmem:[#allocation7 + $0x18] sm:$0xff] %vm1147_vm1, %v2457_v17  ;;  %2914 = vrot.lane.b32.xlu1 %v2608_v0, %s4727_s30  ;;  %v3514_v0 = vld [vmem:[#allocation8 + $0x90] sm:$0xff] }
 0x3bf   :  { %2816 = vrot.lane.b32.xlu0 %v6191_v49, %s4724_s3 }
 0x3c0   :  { %v2314_v18 = vpop.permute.xlu1 %2313  ;;  %v2362_v28 = vpop.permute.xlu0 %2361 }
 0x3c1   :  { %2333 = vst.msk [vmem:[#allocation7 + $0x20] sm:$0xff] %vm999_vm14, %v2314_v18 }
 0x3c2   :  { %2381 = vst.msk [vmem:[#allocation7 + $0x20] sm:$0xff] %vm1048_vm15, %v2362_v28  ;;  %2674 = vrot.lane.b32.xlu1 %v6191_v49, %s4728_s1 }
 0x3c3   :  { %2864 = vrot.lane.b32.xlu0 %v2559_v61, %s4726_s29  ;;  %2430 = vst.msk [vmem:[#allocation7 + $0x20] sm:$0xff] %vm1098_vm0, %v2411_v52 }
 0x3c4   :  { %2478 = vst.msk [vmem:[#allocation7 + $0x20] sm:$0xff] %vm1147_vm1, %v2459_v5  ;;  %v2505_v44 = vpop.permute.xlu1 %2504  ;;  %v2272_v43 = vpop.permute.xlu0 %2271  ;;  %v3314_v5 = vld [vmem:[#allocation8 + $0x2] sm:$0xff] }
 0x3c5   :  { %2526 = vst.msk [vmem:[#allocation7 + $0x20] sm:$0xff] %vm1196_vm3, %v2507_v29  ;;  %2525 = vst.msk [vmem:[#allocation7 + $0x18] sm:$0xff] %vm1196_vm3, %v2505_v44  ;;  %v3562_v29 = vld [vmem:[#allocation8 + $0x91] sm:$0xff] }
 0x3c6   :  { %2722 = vrot.lane.b32.xlu1 %v2559_v61, %s4723_s23 }
 0x3c7   :  { %2770 = vrot.lane.b32.xlu0 %v2607_v58, %s4729_s7 }
 0x3c8   :  { %v2415_v47 = vpop.permute.xlu1 %2414  ;;  %v2320_v23 = vpop.permute.xlu0 %2319 }
 0x3ca   :  { %2912 = vrot.lane.b32.xlu1 %v2607_v58, %s4727_s30 }
 0x3cb   :  { %2680 = vrot.lane.b32.xlu0 %v2657_v7, %s4728_s1 }
 0x3cc   :  { %v2463_v56 = vpop.permute.xlu1 %2462  ;;  %v2941_v55 = vld [vmem:[#allocation7 + $0x18] sm:$0xff]  ;;  %v2942_v26 = vld [vmem:[#allocation7 + $0x20] sm:$0xff]  ;;  %v2368_v63 = vpop.permute.xlu0 %2367 }
 0x3cd   :  { %4632 = vmatmul.mubr.msk.f32.gmra.mxu0 %vm1837_vm4, %v2941_v55 }
 0x3ce   :  { %4634 = vmatprep.mubr.msk.f32.mxu0 %vm1837_vm4, %v2942_v26  ;;  %2776 = vrot.lane.b32.xlu1 %v2753_v16, %s4729_s7 }
 0x3cf   :  { %2728 = vrot.lane.b32.xlu0 %v2705_v37, %s4723_s23 }
 0x3d0   :  { %v2511_v57 = vpop.permute.xlu1 %2510  ;;  %v2176_v12 = vpop.permute.xlu0 %2175 }
 0x3d1   :  { %2192 = vst.msk [vmem:[#allocation7 + $0x38] sm:$0xff] %vm852_vm9, %v2176_v12 }
 0x3d2   :  { %2678 = vrot.lane.b32.xlu1 %v6205_v15, %s4728_s1 }
 0x3d3   :  { %2822 = vrot.lane.b32.xlu0 %v2657_v7, %s4724_s3 }
 0x3d4   :  { %v2270_v49 = vpop.permute.xlu1 %2269  ;;  %v2224_v3 = vpop.permute.xlu0 %2223 }
 0x3d5   :  { %2287 = vst.msk [vmem:[#allocation7 + $0x30] sm:$0xff] %vm950_vm13, %v2270_v49 }
 0x3d6   :  { %2240 = vst.msk [vmem:[#allocation7 + $0x38] sm:$0xff] %vm901_vm10, %v2224_v3  ;;  %2726 = vrot.lane.b32.xlu1 %v2704_v13, %s4723_s23 }
 0x3d7   :  { %2288 = vst.msk [vmem:[#allocation7 + $0x38] sm:$0xff] %vm950_vm13, %v2272_v43  ;;  %2870 = vrot.lane.b32.xlu0 %v2705_v37, %s4726_s29 }
 0x3d8   :  { %2336 = vst.msk [vmem:[#allocation7 + $0x38] sm:$0xff] %vm999_vm14, %v2320_v23  ;;  %v2318_v30 = vpop.permute.xlu1 %2317  ;;  %v2413_v41 = vpop.permute.xlu0 %2412 }
 0x3d9   :  { %2384 = vst.msk [vmem:[#allocation7 + $0x38] sm:$0xff] %vm1048_vm15, %v2368_v63 }
 0x3da   :  { %2335 = vst.msk [vmem:[#allocation7 + $0x30] sm:$0xff] %vm999_vm14, %v2318_v30  ;;  %2774 = vrot.lane.b32.xlu1 %v2752_v19, %s4729_s7 }
 0x3db   :  { %2433 = vst.msk [vmem:[#allocation7 + $0x38] sm:$0xff] %vm1098_vm0, %v6065_v25  ;;  %2431 = vst.msk [vmem:[#allocation7 + $0x28] sm:$0xff] %vm1098_vm0, %v2413_v41  ;;  %2584 = vrot.lane.b32.xlu0 %v2704_v13, %s4725_s0 }
 0x3dc   :  { %2481 = vst.msk [vmem:[#allocation7 + $0x38] sm:$0xff] %vm1147_vm1, %v6071_v8  ;;  %v2366_v33 = vpop.permute.xlu1 %2365  ;;  %v2461_v20 = vpop.permute.xlu0 %2460 }
 0x3dd   :  { %2529 = vst.msk [vmem:[#allocation7 + $0x38] sm:$0xff] %vm1196_vm3, %v6090_v4 }
 0x3de   :  { %2383 = vst.msk [vmem:[#allocation7 + $0x30] sm:$0xff] %vm1048_vm15, %v2366_v33  ;;  %2920 = vrot.lane.b32.xlu1 %v2897_v40, %s4727_s30 }
 0x3df   :  { %2432 = vst.msk [vmem:[#allocation7 + $0x30] sm:$0xff] %vm1098_vm0, %v2415_v47  ;;  %2632 = vrot.lane.b32.xlu0 %v2752_v19, %s4722_s22 }
 0x3e0   :  { %2479 = vst.msk [vmem:[#allocation7 + $0x28] sm:$0xff] %vm1147_vm1, %v2461_v20  ;;  %2480 = vst.msk [vmem:[#allocation7 + $0x30] sm:$0xff] %vm1147_vm1, %v2463_v56  ;;  %v2575_v25 = vpop.permute.xlu1 %2574  ;;  %v2509_v8 = vpop.permute.xlu0 %2508 }
 0x3e1   :  { %2528 = vst.msk [vmem:[#allocation7 + $0x30] sm:$0xff] %vm1196_vm3, %v2511_v57  ;;  %2527 = vst.msk [vmem:[#allocation7 + $0x28] sm:$0xff] %vm1196_vm3, %v2509_v8 }
 0x3e2   :  { %2596 = vst.msk [vmem:[#allocation7 + $0x50] sm:$0xff] %vm852_vm9, %v2575_v25  ;;  %3691 = vrot.lane.b32.xlu1 %v3266_v60, %s4725_s0 }
 0x3e3   :  { %2820 = vrot.lane.b32.xlu0 %v6205_v15, %s4724_s3 }
 0x3e4   :  { %v2623_v4 = vpop.permute.xlu1 %2622  ;;  %v2669_v21 = vpop.permute.xlu0 %2668  ;;  %v2945_v52 = vld [vmem:[#allocation7 + $0x38] sm:$0xff] }
 0x3e5   :  { %2644 = vst.msk [vmem:[#allocation7 + $0x50] sm:$0xff] %vm901_vm10, %v2623_v4 }
 0x3e6   :  { %3739 = vrot.lane.b32.xlu1 %v3314_v5, %s4722_s22 }
 0x3e7   :  { %2868 = vrot.lane.b32.xlu0 %v2704_v13, %s4726_s29 }
 0x3e8   :  { %v2811_v24 = vpop.permute.xlu1 %2810  ;;  %v2717_v35 = vpop.permute.xlu0 %2716  ;;  %v2943_v38 = vld [vmem:[#allocation7 + $0x28] sm:$0xff]  ;;  %v2944_v32 = vld [vmem:[#allocation7 + $0x30] sm:$0xff] }
 0x3e9   :  { %4635 = vmatmul.mubr.msk.f32.gmra.mxu0 %vm1837_vm4, %v2943_v38 }
 0x3ea   :  { %4637 = vmatprep.mubr.msk.f32.mxu0 %vm1837_vm4, %v2944_v32 }
 0x3eb   :  { %2916 = vrot.lane.b32.xlu0 %v2752_v19, %s4727_s30 }
 0x3ec   :  { %v2859_v46 = vpop.permute.xlu1 %2858  ;;  %v2765_v15 = vpop.permute.xlu0 %2764 }
 0x3ed   :  { %4638 = vmatmul.mubr.msk.f32.gmra.mxu0 %vm1837_vm4, %v2945_v52 }
 0x3ef   :  { %2918 = vrot.lane.b32.xlu0 %v2753_v16, %s4727_s30 }
 0x3f0   :  { %v2907_v62 = vpop.permute.xlu1 %2906  ;;  %v2573_v50 = vpop.permute.xlu0 %2572 }
 0x3f1   :  { %2595 = vst.msk [vmem:[#allocation7 + $0x48] sm:$0xff] %vm852_vm9, %v2573_v50 }
 0x3f3   :  { %3537 = vrot.lane.b32.xlu0 %v3514_v0, %s4724_s3 }
 0x3f4   :  { %v2667_v61 = vpop.permute.xlu1 %2666  ;;  %v2621_v6 = vpop.permute.xlu0 %2620 }
 0x3f5   :  { %2690 = vst.msk [vmem:[#allocation7 + $0x40] sm:$0xff] %vm950_vm13, %v2667_v61 }
 0x3f6   :  { %2643 = vst.msk [vmem:[#allocation7 + $0x48] sm:$0xff] %vm901_vm10, %v2621_v6 }
 0x3f7   :  { %2691 = vst.msk [vmem:[#allocation7 + $0x48] sm:$0xff] %vm950_vm13, %v2669_v21  ;;  %3585 = vrot.lane.b32.xlu0 %v3562_v29, %s4726_s29 }
 0x3f8   :  { %2739 = vst.msk [vmem:[#allocation7 + $0x48] sm:$0xff] %vm999_vm14, %v2717_v35  ;;  %v2715_v58 = vpop.permute.xlu1 %2714 }
 0x3f9   :  { %2738 = vst.msk [vmem:[#allocation7 + $0x40] sm:$0xff] %vm999_vm14, %v2715_v58 }
 0x3fa   :  { %2787 = vst.msk [vmem:[#allocation7 + $0x48] sm:$0xff] %vm1048_vm15, %v2765_v15 }
 0x3fb   :  { %3633 = vrot.lane.b32.xlu0 %v3610_v1, %s4727_s30 }
 0x3fc   :  { %v2763_v17 = vpop.permute.xlu1 %2762 }
 0x3fd   :  { %v2673_v18 = vpop.permute.xlu0 %2672  ;;  %2786 = vst.msk [vmem:[#allocation7 + $0x40] sm:$0xff] %vm1048_vm15, %v2763_v17 }
 0x3fe   :  { %2834 = vst.msk [vmem:[#allocation7 + $0x40] sm:$0xff] %vm1098_vm0, %v2811_v24 }
 0x3ff   :  { %2882 = vst.msk [vmem:[#allocation7 + $0x40] sm:$0xff] %vm1147_vm1, %v2859_v46  ;;  %3282 = vrot.lane.b32.xlu0 %v3266_v60, %s4725_s0 }
 0x400   :  { %2930 = vst.msk [vmem:[#allocation7 + $0x40] sm:$0xff] %vm1196_vm3, %v2907_v62  ;;  %v2721_v28 = vpop.permute.xlu1 %2720 }
 0x401   :  { %v2579_v44 = vpop.permute.xlu0 %2578 }
 0x402   :  { %2598 = vst.msk [vmem:[#allocation7 + $0x60] sm:$0xff] %vm852_vm9, %v2579_v44 }
 0x403   :  { %3330 = vrot.lane.b32.xlu0 %v3314_v5, %s4722_s22 }
 0x404   :  { %v2627_v43 = vpop.permute.xlu1 %2626 }
 0x405   :  { %v2769_v47 = vpop.permute.xlu0 %2768  ;;  %2646 = vst.msk [vmem:[#allocation7 + $0x60] sm:$0xff] %vm901_vm10, %v2627_v43 }
 0x407   :  { %v2946_v23 = vld [vmem:[#allocation7 + $0x40] sm:$0xff]  ;;  %3945 = vrot.lane.b32.xlu0 %v3514_v0, %s4724_s3 }
 0x408   :  { %v2815_v7 = vpop.permute.xlu1 %2814  ;;  %4640 = vmatprep.mubr.msk.f32.mxu0 %vm1837_vm4, %v2946_v23  ;;  %v3250_v23 = vld [vmem:[#allocation8] sm:$0xff] }
 0x409   :  { %v2577_v56 = vpop.permute.xlu0 %2576  ;;  %3258 = vst.msk [vmem:[#allocation9] sm:$0xff] %vm759_vm2, %v3250_v23  ;;  %3667 = vst.msk [vmem:[#allocation9 + $0x40] sm:$0xff] %vm759_vm2, %v3250_v23 }
 0x40a   :  { %2597 = vst.msk [vmem:[#allocation7 + $0x58] sm:$0xff] %vm852_vm9, %v2577_v56 }
 0x40b   :  { %3993 = vrot.lane.b32.xlu0 %v3562_v29, %s4726_s29 }
 0x40c   :  { %v2863_v55 = vpop.permute.xlu1 %2862 }
 0x40d   :  { %v2625_v26 = vpop.permute.xlu0 %2624 }
 0x40e   :  { %2645 = vst.msk [vmem:[#allocation7 + $0x58] sm:$0xff] %vm901_vm10, %v2625_v26 }
 0x40f   :  { %2693 = vst.msk [vmem:[#allocation7 + $0x58] sm:$0xff] %vm950_vm13, %v2673_v18 }
 0x410   :  { %2741 = vst.msk [vmem:[#allocation7 + $0x58] sm:$0xff] %vm999_vm14, %v2721_v28  ;;  %v2911_v63 = vpop.permute.xlu1 %2910 }
 0x411   :  { %2789 = vst.msk [vmem:[#allocation7 + $0x58] sm:$0xff] %vm1048_vm15, %v2769_v47  ;;  %v2813_v16 = vpop.permute.xlu0 %2812 }
 0x412   :  { %2835 = vst.msk [vmem:[#allocation7 + $0x48] sm:$0xff] %vm1098_vm0, %v2813_v16  ;;  %v6389_v16 = vld [vmem:[%s6873_s11] ss:$0 sm:$0xff] }
 0x414   :  { %v2671_v37 = vpop.permute.xlu1 %2670 }
 0x415   :  { %v2861_v57 = vpop.permute.xlu0 %2860  ;;  %2692 = vst.msk [vmem:[#allocation7 + $0x50] sm:$0xff] %vm950_vm13, %v2671_v37 }
 0x416   :  { %2883 = vst.msk [vmem:[#allocation7 + $0x48] sm:$0xff] %vm1147_vm1, %v2861_v57  ;;  %v6396_v57 = vld [vmem:[%s6874_s12] ss:$0 sm:$0xff] }
 0x418   :  { %v2719_v12 = vpop.permute.xlu1 %2718 }
 0x419   :  { %v2767_v49 = vpop.permute.xlu0 %2766  ;;  %2740 = vst.msk [vmem:[#allocation7 + $0x50] sm:$0xff] %vm999_vm14, %v2719_v12 }
 0x41a   :  { %2788 = vst.msk [vmem:[#allocation7 + $0x50] sm:$0xff] %vm1048_vm15, %v2767_v49 }
 0x41b   :  { %2836 = vst.msk [vmem:[#allocation7 + $0x50] sm:$0xff] %vm1098_vm0, %v2815_v7 }
 0x41c   :  { %2884 = vst.msk [vmem:[#allocation7 + $0x50] sm:$0xff] %vm1147_vm1, %v2863_v55  ;;  %v2909_v3 = vpop.permute.xlu1 %2908 }
 0x41d   :  { %v2677_v13 = vpop.permute.xlu0 %2676  ;;  %2932 = vst.msk [vmem:[#allocation7 + $0x50] sm:$0xff] %vm1196_vm3, %v2911_v63  ;;  %2931 = vst.msk [vmem:[#allocation7 + $0x48] sm:$0xff] %vm1196_vm3, %v2909_v3 }
 0x420   :  { %v2725_v30 = vpop.permute.xlu1 %2724 }
 0x421   :  { %v2583_v41 = vpop.permute.xlu0 %2582 }
 0x422   :  { %2600 = vst.msk [vmem:[#allocation7 + $0x70] sm:$0xff] %vm852_vm9, %v2583_v41 }
 0x424   :  { %v2631_v19 = vpop.permute.xlu1 %2630  ;;  %v2947_v33 = vld [vmem:[#allocation7 + $0x48] sm:$0xff]  ;;  %v2948_v20 = vld [vmem:[#allocation7 + $0x50] sm:$0xff] }
 0x425   :  { %v2773_v40 = vpop.permute.xlu0 %2772  ;;  %2648 = vst.msk [vmem:[#allocation7 + $0x70] sm:$0xff] %vm901_vm10, %v2631_v19  ;;  %4641 = vmatmul.mubr.msk.f32.gmra.mxu0 %vm1837_vm4, %v2947_v33 }
 0x426   :  { %4643 = vmatprep.mubr.msk.f32.mxu0 %vm1837_vm4, %v2948_v20 }
 0x428   :  { %v2819_v25 = vpop.permute.xlu1 %2818 }
 0x429   :  { %v2581_v8 = vpop.permute.xlu0 %2580 }
 0x42a   :  { %2599 = vst.msk [vmem:[#allocation7 + $0x68] sm:$0xff] %vm852_vm9, %v2581_v8 }
 0x42c   :  { %v2867_v4 = vpop.permute.xlu1 %2866 }
 0x42d   :  { %v2629_v21 = vpop.permute.xlu0 %2628 }
 0x42e   :  { %2647 = vst.msk [vmem:[#allocation7 + $0x68] sm:$0xff] %vm901_vm10, %v2629_v21 }
 0x42f   :  { %2695 = vst.msk [vmem:[#allocation7 + $0x68] sm:$0xff] %vm950_vm13, %v2677_v13 }
 0x430   :  { %2743 = vst.msk [vmem:[#allocation7 + $0x68] sm:$0xff] %vm999_vm14, %v2725_v30  ;;  %v2915_v24 = vpop.permute.xlu1 %2914 }
 0x431   :  { %2791 = vst.msk [vmem:[#allocation7 + $0x68] sm:$0xff] %vm1048_vm15, %v2773_v40  ;;  %v2817_v35 = vpop.permute.xlu0 %2816 }
 0x432   :  { %2837 = vst.msk [vmem:[#allocation7 + $0x58] sm:$0xff] %vm1098_vm0, %v2817_v35 }
 0x434   :  { %v2675_v38 = vpop.permute.xlu1 %2674 }
 0x435   :  { %v2865_v32 = vpop.permute.xlu0 %2864  ;;  %2694 = vst.msk [vmem:[#allocation7 + $0x60] sm:$0xff] %vm950_vm13, %v2675_v38 }
 0x436   :  { %2885 = vst.msk [vmem:[#allocation7 + $0x58] sm:$0xff] %vm1147_vm1, %v2865_v32 }
 0x438   :  { %v2723_v60 = vpop.permute.xlu1 %2722 }
 0x439   :  { %v2771_v46 = vpop.permute.xlu0 %2770  ;;  %2742 = vst.msk [vmem:[#allocation7 + $0x60] sm:$0xff] %vm999_vm14, %v2723_v60 }
 0x43a   :  { %2790 = vst.msk [vmem:[#allocation7 + $0x60] sm:$0xff] %vm1048_vm15, %v2771_v46 }
 0x43b   :  { %2838 = vst.msk [vmem:[#allocation7 + $0x60] sm:$0xff] %vm1098_vm0, %v2819_v25 }
 0x43c   :  { %2886 = vst.msk [vmem:[#allocation7 + $0x60] sm:$0xff] %vm1147_vm1, %v2867_v4  ;;  %v2913_v15 = vpop.permute.xlu1 %2912 }
 0x43d   :  { %v2681_v52 = vpop.permute.xlu0 %2680  ;;  %2934 = vst.msk [vmem:[#allocation7 + $0x60] sm:$0xff] %vm1196_vm3, %v2915_v24  ;;  %2933 = vst.msk [vmem:[#allocation7 + $0x58] sm:$0xff] %vm1196_vm3, %v2913_v15 }
 0x440   :  { %v2777_v62 = vpop.permute.xlu1 %2776 }
 0x441   :  { %v2729_v0 = vpop.permute.xlu0 %2728 }
 0x444   :  { %v2679_v5 = vpop.permute.xlu1 %2678  ;;  %v2949_v50 = vld [vmem:[#allocation7 + $0x58] sm:$0xff]  ;;  %v2950_v61 = vld [vmem:[#allocation7 + $0x60] sm:$0xff] }
 0x445   :  { %v2823_v29 = vpop.permute.xlu0 %2822  ;;  %2696 = vst.msk [vmem:[#allocation7 + $0x70] sm:$0xff] %vm950_vm13, %v2679_v5  ;;  %4644 = vmatmul.mubr.msk.f32.gmra.mxu0 %vm1837_vm4, %v2949_v50 }
 0x446   :  { %4646 = vmatprep.mubr.msk.f32.mxu0 %vm1837_vm4, %v2950_v61 }
 0x448   :  { %v2727_v6 = vpop.permute.xlu1 %2726 }
 0x449   :  { %v2871_v58 = vpop.permute.xlu0 %2870  ;;  %2744 = vst.msk [vmem:[#allocation7 + $0x70] sm:$0xff] %vm999_vm14, %v2727_v6 }
 0x44c   :  { %v2775_v1 = vpop.permute.xlu1 %2774 }
 0x44d   :  { %2792 = vst.msk [vmem:[#allocation7 + $0x70] sm:$0xff] %vm1048_vm15, %v2775_v1  ;;  %v2585_v17 = vpop.permute.xlu0 %2584 }
 0x44e   :  { %2840 = vst.msk [vmem:[#allocation7 + $0x70] sm:$0xff] %vm1098_vm0, %v2823_v29 }
 0x44f   :  { %2601 = vst.msk [vmem:[#allocation7 + $0x78] sm:$0xff] %vm852_vm9, %v2585_v17 }
 0x450   :  { %2888 = vst.msk [vmem:[#allocation7 + $0x70] sm:$0xff] %vm1147_vm1, %v2871_v58  ;;  %v2921_v44 = vpop.permute.xlu1 %2920  ;;  %v4083_v58 = vld [vmem:[%s6875_s13 + $0x40] sm:$0xff] }
 0x451   :  { %v2633_v18 = vpop.permute.xlu0 %2632  ;;  %4652 = vmatprep.subr.mxu0 %v4083_v58  ;;  %4694 = vmatprep.subr.mxu1 %v4083_v58 }
 0x452   :  { %2649 = vst.msk [vmem:[#allocation7 + $0x78] sm:$0xff] %vm901_vm10, %v2633_v18  ;;  %4653 = vmatpush3.msra.mxu0 %v4083_v58  ;;  %v4082_v18 = vld [vmem:[%s6875_s13 + $0x38] sm:$0xff]  ;;  %4703 = vmatpush3.msra.mxu1 %v4083_v58 }
 0x453   :  { %2697 = vst.msk [vmem:[#allocation7 + $0x78] sm:$0xff] %vm950_vm13, %v2681_v52  ;;  %4654 = vmatprep.subr.mxu0 %v4082_v18  ;;  %4695 = vmatprep.subr.mxu1 %v4082_v18 }
 0x454   :  { %2745 = vst.msk [vmem:[#allocation7 + $0x78] sm:$0xff] %vm999_vm14, %v2729_v0  ;;  %4655 = vmatpush3.msra.mxu0 %v4082_v18  ;;  %4704 = vmatpush3.msra.mxu1 %v4082_v18 }
 0x455   :  { %2793 = vst.msk [vmem:[#allocation7 + $0x78] sm:$0xff] %vm1048_vm15, %v2777_v62  ;;  %v2821_v28 = vpop.permute.xlu0 %2820 }
 0x456   :  { %2839 = vst.msk [vmem:[#allocation7 + $0x68] sm:$0xff] %vm1098_vm0, %v2821_v28  ;;  %2841 = vst.msk [vmem:[#allocation7 + $0x78] sm:$0xff] %vm1098_vm0, %v6069_v51 }
 0x457   :  { %2889 = vst.msk [vmem:[#allocation7 + $0x78] sm:$0xff] %vm1147_vm1, %v6088_v14  ;;  %v3692_v14 = vpop.permute.xlu1 %3691 }
 0x458   :  { %2937 = vst.msk [vmem:[#allocation7 + $0x78] sm:$0xff] %vm1196_vm3, %v2921_v44 }
 0x459   :  { %v2869_v43 = vpop.permute.xlu0 %2868  ;;  %3715 = vst.msk [vmem:[#allocation9 + $0x40] sm:$0xff] %vm852_vm9, %v3692_v14 }
 0x45a   :  { %2887 = vst.msk [vmem:[#allocation7 + $0x68] sm:$0xff] %vm1147_vm1, %v2869_v43 }
 0x45b   :  { %v3740_v37 = vpop.permute.xlu1 %3739 }
 0x45c   :  { %3763 = vst.msk [vmem:[#allocation9 + $0x40] sm:$0xff] %vm901_vm10, %v3740_v37 }
 0x45d   :  { %v2917_v47 = vpop.permute.xlu0 %2916 }
 0x45e   :  { %2935 = vst.msk [vmem:[#allocation7 + $0x68] sm:$0xff] %vm1196_vm3, %v2917_v47  ;;  %v4081_v47 = vld [vmem:[%s6875_s13 + $0x30] sm:$0xff] }
 0x45f   :  { %v2953_v55 = vld [vmem:[#allocation7 + $0x78] sm:$0xff]  ;;  %4656 = vmatprep.subr.mxu0 %v4081_v47  ;;  %4696 = vmatprep.subr.mxu1 %v4081_v47 }
 0x460   :  { %4657 = vmatpush3.msra.mxu0 %v4081_v47  ;;  %4705 = vmatpush3.msra.mxu1 %v4081_v47 }
 0x461   :  { %v2919_v7 = vpop.permute.xlu0 %2918 }
 0x462   :  { %2936 = vst.msk [vmem:[#allocation7 + $0x70] sm:$0xff] %vm1196_vm3, %v2919_v7 }
 0x465   :  { %v2951_v51 = vld [vmem:[#allocation7 + $0x68] sm:$0xff]  ;;  %v6379_v56 = vpop.permute.xlu0 %3537 }
 0x466   :  { %4647 = vmatmul.mubr.msk.f32.gmra.mxu0 %vm1837_vm4, %v2951_v51 }
 0x469   :  { %v2952_v26 = vld [vmem:[#allocation7 + $0x70] sm:$0xff]  ;;  %v6383_v63 = vpop.permute.xlu0 %3585 }
 0x46a   :  { %4649 = vmatprep.mubr.msk.f32.mxu0 %vm1837_vm4, %v2952_v26  ;;  %v4080_v26 = vld [vmem:[%s6875_s13 + $0x28] sm:$0xff] }
 0x46b   :  { %4650 = vmatmul.mubr.msk.f32.gmra.mxu0 %vm1837_vm4, %v2953_v55  ;;  %4658 = vmatprep.subr.mxu0 %v4080_v26 }
 0x46c   :  { %4697 = vmatprep.subr.mxu1 %v4080_v26  ;;  %4659 = vmatpush3.msra.mxu0 %v4080_v26 }
 0x46d   :  { %v6398_v49 = vpop.permute.xlu0 %3633  ;;  %4706 = vmatpush3.msra.mxu1 %v4080_v26 }
 0x46e   :  { %v4630_v12 = vpop.f32.mrf.mxu0 }
 0x46f   :  { %v3163_v3 = vmul.f32 %v4630_v12, %v6389_v16 }
 0x470   :  { %v3077_v13 = vpop.f32.mrf.mxu0 }
 0x471   :  { %v3185_v30 = vadd.f32 %v6396_v57, %v3163_v3  ;;  %v3162_v41 = vmul.f32 %v6389_v16, %v3077_v13  ;;  %v3283_v19 = vpop.permute.xlu0 %3282 }
 0x472   :  { %3306 = vst.msk [vmem:[#allocation9] sm:$0xff] %vm852_vm9, %v3283_v19 }
 0x473   :  { %v3201_v40 = vmax.f32 %v3185_v30, 0.0  ;;  %v3184_v33 = vadd.f32 %v6396_v57, %v3162_v41  ;;  %v4079_v30 = vld [vmem:[%s6875_s13 + $0x20] sm:$0xff] }
 0x474   :  { %4660 = vmatprep.subr.mxu0 %v4079_v30  ;;  %4698 = vmatprep.subr.mxu1 %v4079_v30 }
 0x475   :  { %3243 = vst.msk [vmem:[#allocation8 + $0x21] sm:$0xff] %vm759_vm2, %v3201_v40  ;;  %v3200_v20 = vmax.f32 %v3184_v33, 0.0  ;;  %v3331_v25 = vpop.permute.xlu0 %3330  ;;  %v4078_v33 = vld [vmem:[%s6875_s13 + $0x18] sm:$0xff]  ;;  %4661 = vmatpush3.msra.mxu0 %v4079_v30  ;;  %4707 = vmatpush3.msra.mxu1 %v4079_v30 }
 0x476   :  { %3354 = vst.msk [vmem:[#allocation9] sm:$0xff] %vm901_vm10, %v3331_v25  ;;  %v4077_v25 = vld [vmem:[%s6875_s13 + $0x10] sm:$0xff]  ;;  %4662 = vmatprep.subr.mxu0 %v4078_v33  ;;  %4699 = vmatprep.subr.mxu1 %v4078_v33 }
 0x477   :  { %3242 = vst.msk [vmem:[#allocation8 + $0x11] sm:$0xff] %vm759_vm2, %v3200_v20  ;;  %4663 = vmatpush3.msra.mxu0 %v4078_v33  ;;  %4708 = vmatpush3.msra.mxu1 %v4078_v33 }
 0x478   :  { %4664 = vmatprep.subr.mxu0 %v4077_v25  ;;  %4700 = vmatprep.subr.mxu1 %v4077_v25 }
 0x479   :  { %4665 = vmatpush3.msra.mxu0 %v4077_v25  ;;  %4709 = vmatpush3.msra.mxu1 %v4077_v25 }
 0x47c   :  { %v3363_v8 = vld [vmem:[#allocation8 + $0x20] sm:$0xff] }
 0x47d   :  { %v3411_v4 = vld [vmem:[#allocation8 + $0x21] sm:$0xff]  ;;  %3380 = vrot.lane.b32.xlu1 %v3363_v8, %s4728_s1  ;;  %3260 = vst.msk [vmem:[#allocation9 + $0x10] sm:$0xff] %vm759_vm2, %v3363_v8 }
 0x47e   :  { %3428 = vrot.lane.b32.xlu0 %v3411_v4, %s4723_s23  ;;  %v3362_v21 = vld [vmem:[#allocation8 + $0x10] sm:$0xff]  ;;  %v3459_v24 = vld [vmem:[#allocation8 + $0x22] sm:$0xff] }
 0x47f   :  { %3259 = vst.msk [vmem:[#allocation9 + $0x8] sm:$0xff] %vm759_vm2, %v3362_v21  ;;  %v3410_v35 = vld [vmem:[#allocation8 + $0x11] sm:$0xff] }
 0x480   :  { %v3315_v5 = vld [vmem:[#allocation8 + $0x12] sm:$0xff] }
 0x481   :  { %3286 = vrot.lane.b32.xlu1 %v3411_v4, %s4725_s0 }
 0x482   :  { %3476 = vrot.lane.b32.xlu0 %v3459_v24, %s4729_s7 }
 0x485   :  { %3334 = vrot.lane.b32.xlu1 %v3459_v24, %s4722_s22 }
 0x486   :  { %3378 = vrot.lane.b32.xlu0 %v3362_v21, %s4728_s1 }
 0x489   :  { %3523 = vrot.lane.b32.xlu1 %v3363_v8, %s4724_s3 }
 0x48a   :  { %3426 = vrot.lane.b32.xlu0 %v3410_v35, %s4723_s23 }
 0x48d   :  { %3571 = vrot.lane.b32.xlu1 %v3411_v4, %s4726_s29  ;;  %v4633_v38 = vpop.f32.mrf.mxu0  ;;  %v4076_v4 = vld [vmem:[%s6875_s13 + $0x8] sm:$0xff] }
 0x48e   :  { %v3165_v32 = vmul.f32 %v4633_v38, %v6389_v16  ;;  %4666 = vmatprep.subr.mxu0 %v4076_v4  ;;  %4701 = vmatprep.subr.mxu1 %v4076_v4 }
 0x48f   :  { %v3087_v60 = vpop.f32.mrf.mxu0  ;;  %4667 = vmatpush3.msra.mxu0 %v4076_v4  ;;  %4710 = vmatpush3.msra.mxu1 %v4076_v4 }
 0x490   :  { %v3187_v46 = vadd.f32 %v6396_v57, %v3165_v32  ;;  %v3164_v15 = vmul.f32 %v6389_v16, %v3087_v60 }
 0x491   :  { %3619 = vrot.lane.b32.xlu1 %v3459_v24, %s4727_s30  ;;  %v4075_v24 = vld [vmem:[%s6875_s13] sm:$0xff] }
 0x492   :  { %v3203_v52 = vmax.f32 %v3187_v46, 0.0  ;;  %v3186_v62 = vadd.f32 %v6396_v57, %v3164_v15  ;;  %4668 = vmatprep.subr.mxu0 %v4075_v24  ;;  %4702 = vmatprep.subr.mxu1 %v4075_v24 }
 0x493   :  { %4669 = vmatpush3.msra.mxu0 %v4075_v24  ;;  %4711 = vmatpush3.msra.mxu1 %v4075_v24 }
 0x494   :  { %3245 = vst.msk [vmem:[#allocation8 + $0x41] sm:$0xff] %vm759_vm2, %v3203_v52  ;;  %v3202_v0 = vmax.f32 %v3186_v62, 0.0  ;;  %v6517_v62 = vpop.permute.xlu0 %3945 }
 0x495   :  { %3284 = vrot.lane.b32.xlu1 %v3410_v35, %s4725_s0 }
 0x496   :  { %3244 = vst.msk [vmem:[#allocation8 + $0x31] sm:$0xff] %vm759_vm2, %v3202_v0 }
 0x499   :  { %3332 = vrot.lane.b32.xlu1 %v3315_v5, %s4722_s22 }
 0x49b   :  { %v3270_v50 = vld [vmem:[#allocation8 + $0x41] sm:$0xff] }
 0x49c   :  { %v3509_v61 = vld [vmem:[#allocation8 + $0x40] sm:$0xff]  ;;  %3290 = vrot.lane.b32.xlu0 %v3270_v50, %s4725_s0 }
 0x49d   :  { %3474 = vrot.lane.b32.xlu1 %v3315_v5, %s4729_s7  ;;  %3262 = vst.msk [vmem:[#allocation9 + $0x20] sm:$0xff] %vm759_vm2, %v3509_v61  ;;  %v6431_v29 = vld [vmem:[#allocation8 + $0x30] sm:$0xff]  ;;  %v3318_v6 = vld [vmem:[#allocation8 + $0x42] sm:$0xff] }
 0x49e   :  { %3261 = vst.msk [vmem:[#allocation9 + $0x18] sm:$0xff] %vm759_vm2, %v6431_v29  ;;  %v3412_v55 = vld [vmem:[#allocation8 + $0x31] sm:$0xff] }
 0x49f   :  { %v3460_v40 = vld [vmem:[#allocation8 + $0x32] sm:$0xff] }
 0x4a0   :  { %3338 = vrot.lane.b32.xlu0 %v3318_v6, %s4722_s22 }
 0x4a1   :  { %3527 = vrot.lane.b32.xlu1 %v3509_v61, %s4724_s3 }
 0x4a4   :  { %3384 = vrot.lane.b32.xlu0 %v3509_v61, %s4728_s1 }
 0x4a5   :  { %3575 = vrot.lane.b32.xlu1 %v3270_v50, %s4726_s29 }
 0x4a8   :  { %3432 = vrot.lane.b32.xlu0 %v3270_v50, %s4723_s23 }
 0x4a9   :  { %3623 = vrot.lane.b32.xlu1 %v3318_v6, %s4727_s30  ;;  %v4636_v1 = vpop.f32.mrf.mxu0 }
 0x4aa   :  { %v3167_v17 = vmul.f32 %v4636_v1, %v6389_v16  ;;  %v6525_v1 = vpop.permute.xlu0 %3993 }
 0x4ab   :  { %v3097_v28 = vpop.f32.mrf.mxu0 }
 0x4ac   :  { %3480 = vrot.lane.b32.xlu0 %v3318_v6, %s4729_s7  ;;  %v3189_v44 = vadd.f32 %v6396_v57, %v3167_v17  ;;  %v3166_v43 = vmul.f32 %v6389_v16, %v3097_v28 }
 0x4ad   :  { %3382 = vrot.lane.b32.xlu1 %v6431_v29, %s4728_s1  ;;  %v4639_v23 = vpop.f32.mrf.mxu0 }
 0x4ae   :  { %v3205_v7 = vmax.f32 %v3189_v44, 0.0  ;;  %v3188_v51 = vadd.f32 %v6396_v57, %v3166_v43  ;;  %v3169_v14 = vmul.f32 %v4639_v23, %v6389_v16 }
 0x4af   :  { %v3107_v37 = vpop.f32.mrf.mxu0 }
 0x4b0   :  { %3288 = vrot.lane.b32.xlu0 %v3412_v55, %s4725_s0  ;;  %3247 = vst.msk [vmem:[#allocation8 + $0x61] sm:$0xff] %vm759_vm2, %v3205_v7  ;;  %v3204_v12 = vmax.f32 %v3188_v51, 0.0  ;;  %v3191_v3 = vadd.f32 %v6396_v57, %v3169_v14  ;;  %v3168_v13 = vmul.f32 %v6389_v16, %v3107_v37 }
 0x4b1   :  { %3430 = vrot.lane.b32.xlu1 %v3412_v55, %s4723_s23 }
 0x4b2   :  { %3246 = vst.msk [vmem:[#allocation8 + $0x51] sm:$0xff] %vm759_vm2, %v3204_v12  ;;  %v3207_v41 = vmax.f32 %v3191_v3, 0.0  ;;  %v3190_v19 = vadd.f32 %v6396_v57, %v3168_v13 }
 0x4b4   :  { %3336 = vrot.lane.b32.xlu0 %v3460_v40, %s4722_s22  ;;  %3249 = vst.msk [vmem:[#allocation8 + $0x81] sm:$0xff] %vm759_vm2, %v3207_v41  ;;  %v3206_v20 = vmax.f32 %v3190_v19, 0.0 }
 0x4b5   :  { %3478 = vrot.lane.b32.xlu1 %v3460_v40, %s4729_s7 }
 0x4b6   :  { %3248 = vst.msk [vmem:[#allocation8 + $0x71] sm:$0xff] %vm759_vm2, %v3206_v20 }
 0x4b7   :  { %v3367_v8 = vld [vmem:[#allocation8 + $0x60] sm:$0xff] }
 0x4b8   :  { %3525 = vrot.lane.b32.xlu0 %v6431_v29, %s4724_s3  ;;  %3264 = vst.msk [vmem:[#allocation9 + $0x30] sm:$0xff] %vm759_vm2, %v3367_v8  ;;  %v3272_v35 = vld [vmem:[#allocation8 + $0x61] sm:$0xff] }
 0x4b9   :  { %3388 = vrot.lane.b32.xlu1 %v3367_v8, %s4728_s1  ;;  %v3366_v21 = vld [vmem:[#allocation8 + $0x50] sm:$0xff]  ;;  %v3320_v32 = vld [vmem:[#allocation8 + $0x62] sm:$0xff] }
 0x4ba   :  { %3263 = vst.msk [vmem:[#allocation9 + $0x28] sm:$0xff] %vm759_vm2, %v3366_v21  ;;  %v3271_v60 = vld [vmem:[#allocation8 + $0x51] sm:$0xff] }
 0x4bb   :  { %v6505_v46 = vld [vmem:[#allocation8 + $0x52] sm:$0xff]  ;;  %v3513_v15 = vld [vmem:[#allocation8 + $0x80] sm:$0xff] }
 0x4bc   :  { %3573 = vrot.lane.b32.xlu0 %v3412_v55, %s4726_s29  ;;  %v3561_v52 = vld [vmem:[#allocation8 + $0x81] sm:$0xff] }
 0x4bd   :  { %3294 = vrot.lane.b32.xlu1 %v3272_v35, %s4725_s0  ;;  %v3368_v38 = vld [vmem:[#allocation8 + $0x70] sm:$0xff]  ;;  %v3609_v0 = vld [vmem:[#allocation8 + $0x82] sm:$0xff] }
 0x4be   :  { %3265 = vst.msk [vmem:[#allocation9 + $0x38] sm:$0xff] %vm759_vm2, %v3368_v38  ;;  %v3273_v29 = vld [vmem:[#allocation8 + $0x71] sm:$0xff] }
 0x4bf   :  { %v3321_v28 = vld [vmem:[#allocation8 + $0x72] sm:$0xff] }
 0x4c0   :  { %3621 = vrot.lane.b32.xlu0 %v3460_v40, %s4727_s30 }
 0x4c1   :  { %3342 = vrot.lane.b32.xlu1 %v3320_v32, %s4722_s22 }
 0x4c4   :  { %3436 = vrot.lane.b32.xlu0 %v3272_v35, %s4723_s23 }
 0x4c5   :  { %3531 = vrot.lane.b32.xlu1 %v3367_v8, %s4724_s3 }
 0x4c8   :  { %3484 = vrot.lane.b32.xlu0 %v3320_v32, %s4729_s7 }
 0x4c9   :  { %3579 = vrot.lane.b32.xlu1 %v3272_v35, %s4726_s29 }
 0x4cc   :  { %3386 = vrot.lane.b32.xlu0 %v3366_v21, %s4728_s1 }
 0x4cd   :  { %3627 = vrot.lane.b32.xlu1 %v3320_v32, %s4727_s30 }
 0x4d0   :  { %3434 = vrot.lane.b32.xlu0 %v3271_v60, %s4723_s23 }
 0x4d1   :  { %3292 = vrot.lane.b32.xlu1 %v3271_v60, %s4725_s0 }
 0x4d4   :  { %3529 = vrot.lane.b32.xlu0 %v3366_v21, %s4724_s3 }
 0x4d5   :  { %3340 = vrot.lane.b32.xlu1 %v6505_v46, %s4722_s22 }
 0x4d8   :  { %3577 = vrot.lane.b32.xlu0 %v3271_v60, %s4726_s29 }
 0x4d9   :  { %3482 = vrot.lane.b32.xlu1 %v6505_v46, %s4729_s7 }
 0x4dc   :  { %3392 = vrot.lane.b32.xlu0 %v3513_v15, %s4728_s1 }
 0x4dd   :  { %3535 = vrot.lane.b32.xlu1 %v3513_v15, %s4724_s3 }
 0x4e0   :  { %3440 = vrot.lane.b32.xlu0 %v3561_v52, %s4723_s23 }
 0x4e1   :  { %3583 = vrot.lane.b32.xlu1 %v3561_v52, %s4726_s29 }
 0x4e4   :  { %3488 = vrot.lane.b32.xlu0 %v3609_v0, %s4729_s7 }
 0x4e5   :  { %3631 = vrot.lane.b32.xlu1 %v3609_v0, %s4727_s30  ;;  %v4642_v5 = vpop.f32.mrf.mxu0 }
 0x4e6   :  { %v3171_v50 = vmul.f32 %v4642_v5, %v6389_v16 }
 0x4e7   :  { %v3117_v61 = vpop.f32.mrf.mxu0 }
 0x4e8   :  { %v3193_v6 = vadd.f32 %v6396_v57, %v3171_v50  ;;  %v3170_v58 = vmul.f32 %v6389_v16, %v3117_v61  ;;  %3296 = vrot.lane.b32.xlu0 %v3273_v29, %s4725_s0 }
 0x4e9   :  { %3390 = vrot.lane.b32.xlu1 %v3368_v38, %s4728_s1 }
 0x4ea   :  { %v3209_v17 = vmax.f32 %v3193_v6, 0.0  ;;  %v3192_v18 = vadd.f32 %v6396_v57, %v3170_v58 }
 0x4ec   :  { %v3208_v44 = vmax.f32 %v3192_v18, 0.0  ;;  %3344 = vrot.lane.b32.xlu0 %v3321_v28, %s4722_s22  ;;  %3652 = vst.msk [vmem:[#allocation8 + $0x21] sm:$0xff] %vm759_vm2, %v3209_v17 }
 0x4ed   :  { %3438 = vrot.lane.b32.xlu1 %v3273_v29, %s4723_s23 }
 0x4ee   :  { %3651 = vst.msk [vmem:[#allocation8 + $0x11] sm:$0xff] %vm759_vm2, %v3208_v44 }
 0x4ef   :  { %v3381_v43 = vpop.permute.xlu1 %3380 }
 0x4f0   :  { %v3429_v47 = vpop.permute.xlu0 %3428  ;;  %3533 = vrot.lane.b32.xlu0 %v3368_v38, %s4724_s3 }
 0x4f1   :  { %3486 = vrot.lane.b32.xlu1 %v3321_v28, %s4729_s7 }
 0x4f3   :  { %v3287_v23 = vpop.permute.xlu1 %3286  ;;  %v3677_v51 = vld [vmem:[#allocation8 + $0x21] sm:$0xff] }
 0x4f4   :  { %v3477_v7 = vpop.permute.xlu0 %3476  ;;  %3308 = vst.msk [vmem:[#allocation9 + $0x10] sm:$0xff] %vm852_vm9, %v3287_v23  ;;  %v3915_v14 = vld [vmem:[#allocation8 + $0x20] sm:$0xff]  ;;  %3581 = vrot.lane.b32.xlu0 %v3273_v29, %s4726_s29 }
 0x4f5   :  { %3669 = vst.msk [vmem:[#allocation9 + $0x50] sm:$0xff] %vm759_vm2, %v3915_v14  ;;  %3695 = vrot.lane.b32.xlu1 %v3677_v51, %s4725_s0  ;;  %v3771_v55 = vld [vmem:[#allocation8 + $0x10] sm:$0xff]  ;;  %v3725_v12 = vld [vmem:[#allocation8 + $0x22] sm:$0xff] }
 0x4f6   :  { %3668 = vst.msk [vmem:[#allocation9 + $0x48] sm:$0xff] %vm759_vm2, %v3771_v55  ;;  %v3676_v25 = vld [vmem:[#allocation8 + $0x11] sm:$0xff] }
 0x4f7   :  { %v3335_v26 = vpop.permute.xlu1 %3334  ;;  %v3724_v38 = vld [vmem:[#allocation8 + $0x12] sm:$0xff] }
 0x4f8   :  { %v3379_v37 = vpop.permute.xlu0 %3378  ;;  %3356 = vst.msk [vmem:[#allocation9 + $0x10] sm:$0xff] %vm901_vm10, %v3335_v26  ;;  %3629 = vrot.lane.b32.xlu0 %v3321_v28, %s4727_s30 }
 0x4f9   :  { %3402 = vst.msk [vmem:[#allocation9] sm:$0xff] %vm950_vm13, %v3379_v37  ;;  %3743 = vrot.lane.b32.xlu1 %v3725_v12, %s4722_s22 }
 0x4fb   :  { %v3524_v3 = vpop.permute.xlu1 %3523 }
 0x4fc   :  { %v3427_v13 = vpop.permute.xlu0 %3426  ;;  %3789 = vrot.lane.b32.xlu0 %v3915_v14, %s4728_s1 }
 0x4fd   :  { %3450 = vst.msk [vmem:[#allocation9] sm:$0xff] %vm999_vm14, %v3427_v13  ;;  %3931 = vrot.lane.b32.xlu1 %v3915_v14, %s4724_s3 }
 0x4ff   :  { %v3572_v30 = vpop.permute.xlu1 %3571 }
 0x500   :  { %3837 = vrot.lane.b32.xlu0 %v3677_v51, %s4723_s23 }
 0x501   :  { %3979 = vrot.lane.b32.xlu1 %v3677_v51, %s4726_s29 }
 0x503   :  { %v3620_v41 = vpop.permute.xlu1 %3619 }
 0x504   :  { %3885 = vrot.lane.b32.xlu0 %v3725_v12, %s4729_s7 }
 0x505   :  { %4027 = vrot.lane.b32.xlu1 %v3725_v12, %s4727_s30  ;;  %v4645_v19 = vpop.f32.mrf.mxu0 }
 0x506   :  { %v3173_v40 = vmul.f32 %v4645_v19, %v6389_v16 }
 0x507   :  { %v3285_v33 = vpop.permute.xlu1 %3284  ;;  %v3127_v20 = vpop.f32.mrf.mxu0 }
 0x508   :  { %3307 = vst.msk [vmem:[#allocation9 + $0x8] sm:$0xff] %vm852_vm9, %v3285_v33  ;;  %v3195_v8 = vadd.f32 %v6396_v57, %v3173_v40  ;;  %v3172_v4 = vmul.f32 %v6389_v16, %v3127_v20  ;;  %3693 = vrot.lane.b32.xlu0 %v3676_v25, %s4725_s0 }
 0x509   :  { %3787 = vrot.lane.b32.xlu1 %v3771_v55, %s4728_s1 }
 0x50a   :  { %v3211_v21 = vmax.f32 %v3195_v8, 0.0  ;;  %v3194_v24 = vadd.f32 %v6396_v57, %v3172_v4 }
 0x50b   :  { %v3333_v35 = vpop.permute.xlu1 %3332 }
 0x50c   :  { %3355 = vst.msk [vmem:[#allocation9 + $0x8] sm:$0xff] %vm901_vm10, %v3333_v35  ;;  %v3210_v32 = vmax.f32 %v3194_v24, 0.0  ;;  %3741 = vrot.lane.b32.xlu0 %v3724_v38, %s4722_s22 }
 0x50d   :  { %3403 = vst.msk [vmem:[#allocation9 + $0x8] sm:$0xff] %vm950_vm13, %v3381_v43  ;;  %3835 = vrot.lane.b32.xlu1 %v3676_v25, %s4723_s23 }
 0x50e   :  { %3654 = vst.msk [vmem:[#allocation8 + $0x41] sm:$0xff] %vm759_vm2, %v3211_v21  ;;  %3653 = vst.msk [vmem:[#allocation8 + $0x31] sm:$0xff] %vm759_vm2, %v3210_v32  ;;  %v3291_v15 = vpop.permute.xlu0 %3290 }
 0x50f   :  { %3451 = vst.msk [vmem:[#allocation9 + $0x8] sm:$0xff] %vm999_vm14, %v3429_v47  ;;  %v3475_v60 = vpop.permute.xlu1 %3474 }
 0x510   :  { %3499 = vst.msk [vmem:[#allocation9 + $0x8] sm:$0xff] %vm1048_vm15, %v3477_v7  ;;  %3498 = vst.msk [vmem:[#allocation9] sm:$0xff] %vm1048_vm15, %v3475_v60 }
 0x511   :  { %3310 = vst.msk [vmem:[#allocation9 + $0x20] sm:$0xff] %vm852_vm9, %v3291_v15  ;;  %3883 = vrot.lane.b32.xlu1 %v3724_v38, %s4729_s7 }
 0x512   :  { %3547 = vst.msk [vmem:[#allocation9] sm:$0xff] %vm1098_vm0, %v3524_v3  ;;  %v3339_v0 = vpop.permute.xlu0 %3338 }
 0x513   :  { %3595 = vst.msk [vmem:[#allocation9] sm:$0xff] %vm1147_vm1, %v3572_v30  ;;  %v3528_v52 = vpop.permute.xlu1 %3527 }
 0x514   :  { %3643 = vst.msk [vmem:[#allocation9] sm:$0xff] %vm1196_vm3, %v3620_v41 }
 0x515   :  { %3358 = vst.msk [vmem:[#allocation9 + $0x20] sm:$0xff] %vm901_vm10, %v3339_v0  ;;  %v3679_v5 = vld [vmem:[#allocation8 + $0x41] sm:$0xff]  ;;  %v6576_v61 = vld [vmem:[#allocation8 + $0x30] sm:$0xff] }
 0x516   :  { %v3774_v50 = vld [vmem:[#allocation8 + $0x40] sm:$0xff]  ;;  %3699 = vrot.lane.b32.xlu1 %v3679_v5, %s4725_s0  ;;  %v3385_v6 = vpop.permute.xlu0 %3384  ;;  %3670 = vst.msk [vmem:[#allocation9 + $0x58] sm:$0xff] %vm759_vm2, %v6576_v61  ;;  %v3821_v47 = vld [vmem:[#allocation8 + $0x31] sm:$0xff] }
 0x517   :  { %3793 = vrot.lane.b32.xlu0 %v3774_v50, %s4728_s1  ;;  %3671 = vst.msk [vmem:[#allocation9 + $0x60] sm:$0xff] %vm759_vm2, %v3774_v50  ;;  %v3576_v29 = vpop.permute.xlu1 %3575  ;;  %v3870_v58 = vld [vmem:[#allocation8 + $0x42] sm:$0xff]  ;;  %v3869_v51 = vld [vmem:[#allocation8 + $0x32] sm:$0xff] }
 0x51a   :  { %3889 = vrot.lane.b32.xlu1 %v3870_v58, %s4729_s7  ;;  %v3433_v28 = vpop.permute.xlu0 %3432 }
 0x51b   :  { %3841 = vrot.lane.b32.xlu0 %v3679_v5, %s4723_s23  ;;  %v4059_v17 = vld [vmem:[#allocation9] sm:$0xff]  ;;  %v3624_v18 = vpop.permute.xlu1 %3623 }
 0x51c   :  { %4670 = vmatprep.mubr.msk.f32.mxu0 %vm1837_vm4, %v4059_v17 }
 0x51e   :  { %3791 = vrot.lane.b32.xlu1 %v6576_v61, %s4728_s1  ;;  %v3481_v43 = vpop.permute.xlu0 %3480 }
 0x51f   :  { %3747 = vrot.lane.b32.xlu0 %v3870_v58, %s4722_s22  ;;  %v3383_v44 = vpop.permute.xlu1 %3382 }
 0x520   :  { %3404 = vst.msk [vmem:[#allocation9 + $0x10] sm:$0xff] %vm950_vm13, %v3383_v44 }
 0x522   :  { %3839 = vrot.lane.b32.xlu1 %v3821_v47, %s4723_s23  ;;  %v3289_v7 = vpop.permute.xlu0 %3288 }
 0x523   :  { %3935 = vrot.lane.b32.xlu0 %v3774_v50, %s4724_s3  ;;  %v3431_v23 = vpop.permute.xlu1 %3430  ;;  %3309 = vst.msk [vmem:[#allocation9 + $0x18] sm:$0xff] %vm852_vm9, %v3289_v7 }
 0x524   :  { %3452 = vst.msk [vmem:[#allocation9 + $0x10] sm:$0xff] %vm999_vm14, %v3431_v23 }
 0x526   :  { %3887 = vrot.lane.b32.xlu1 %v3869_v51, %s4729_s7  ;;  %v4648_v14 = vpop.f32.mrf.mxu0  ;;  %v3337_v37 = vpop.permute.xlu0 %3336 }
 0x527   :  { %3983 = vrot.lane.b32.xlu0 %v3679_v5, %s4726_s29  ;;  %v3479_v55 = vpop.permute.xlu1 %3478  ;;  %v3175_v26 = vmul.f32 %v4648_v14, %v6389_v16  ;;  %3357 = vst.msk [vmem:[#allocation9 + $0x18] sm:$0xff] %vm901_vm10, %v3337_v37 }
 0x528   :  { %3500 = vst.msk [vmem:[#allocation9 + $0x10] sm:$0xff] %vm1048_vm15, %v3479_v55  ;;  %v3137_v12 = vpop.f32.mrf.mxu0 }
 0x529   :  { %3549 = vst.msk [vmem:[#allocation9 + $0x10] sm:$0xff] %vm1098_vm0, %v3528_v52  ;;  %v3197_v3 = vadd.f32 %v6396_v57, %v3175_v26  ;;  %v3174_v13 = vmul.f32 %v6389_v16, %v3137_v12 }
 0x52a   :  { %3597 = vst.msk [vmem:[#allocation9 + $0x10] sm:$0xff] %vm1147_vm1, %v3576_v29  ;;  %v3526_v40 = vpop.permute.xlu0 %3525 }
 0x52b   :  { %4031 = vrot.lane.b32.xlu0 %v3870_v58, %s4727_s30  ;;  %3405 = vst.msk [vmem:[#allocation9 + $0x18] sm:$0xff] %vm950_vm13, %v3385_v6  ;;  %v3213_v30 = vmax.f32 %v3197_v3, 0.0  ;;  %v3196_v41 = vadd.f32 %v6396_v57, %v3174_v13  ;;  %v6606_v19 = vpop.permute.xlu1 %3388  ;;  %v4651_v33 = vpop.f32.mrf.mxu0 }
 0x52c   :  { %3645 = vst.msk [vmem:[#allocation9 + $0x10] sm:$0xff] %vm1196_vm3, %v3624_v18  ;;  %v3177_v25 = vmul.f32 %v4651_v33, %v6389_v16 }
 0x52d   :  { %3453 = vst.msk [vmem:[#allocation9 + $0x18] sm:$0xff] %vm999_vm14, %v3433_v28  ;;  %v3212_v20 = vmax.f32 %v3196_v41, 0.0  ;;  %v3147_v8 = vpop.f32.mrf.mxu0 }
 0x52e   :  { %3501 = vst.msk [vmem:[#allocation9 + $0x18] sm:$0xff] %vm1048_vm15, %v3481_v43  ;;  %v3574_v21 = vpop.permute.xlu0 %3573  ;;  %v3199_v24 = vadd.f32 %v6396_v57, %v3177_v25  ;;  %v3176_v35 = vmul.f32 %v6389_v16, %v3147_v8 }
 0x52f   :  { %3548 = vst.msk [vmem:[#allocation9 + $0x8] sm:$0xff] %vm1098_vm0, %v3526_v40  ;;  %3697 = vrot.lane.b32.xlu0 %v3821_v47, %s4725_s0  ;;  %v3295_v4 = vpop.permute.xlu1 %3294 }
 0x530   :  { %3656 = vst.msk [vmem:[#allocation8 + $0x61] sm:$0xff] %vm759_vm2, %v3213_v30  ;;  %3655 = vst.msk [vmem:[#allocation8 + $0x51] sm:$0xff] %vm759_vm2, %v3212_v20  ;;  %v3215_v38 = vmax.f32 %v3199_v24, 0.0  ;;  %v3198_v32 = vadd.f32 %v6396_v57, %v3176_v35 }
 0x531   :  { %3312 = vst.msk [vmem:[#allocation9 + $0x30] sm:$0xff] %vm852_vm9, %v3295_v4 }
 0x532   :  { %3596 = vst.msk [vmem:[#allocation9 + $0x8] sm:$0xff] %vm1147_vm1, %v3574_v21  ;;  %v3622_v15 = vpop.permute.xlu0 %3621  ;;  %v3214_v52 = vmax.f32 %v3198_v32, 0.0 }
 0x533   :  { %3745 = vrot.lane.b32.xlu0 %v3869_v51, %s4722_s22  ;;  %v3343_v60 = vpop.permute.xlu1 %3342  ;;  %3658 = vst.msk [vmem:[#allocation8 + $0x81] sm:$0xff] %vm759_vm2, %v3215_v38  ;;  %v4061_v17 = vld [vmem:[#allocation9 + $0x10] sm:$0xff] }
 0x534   :  { %3360 = vst.msk [vmem:[#allocation9 + $0x30] sm:$0xff] %vm901_vm10, %v3343_v60 }
 0x535   :  { %3644 = vst.msk [vmem:[#allocation9 + $0x8] sm:$0xff] %vm1196_vm3, %v3622_v15 }
 0x536   :  { %3657 = vst.msk [vmem:[#allocation8 + $0x71] sm:$0xff] %vm759_vm2, %v3214_v52  ;;  %v3437_v5 = vpop.permute.xlu0 %3436 }
 0x537   :  { %v3776_v0 = vld [vmem:[#allocation8 + $0x60] sm:$0xff]  ;;  %3933 = vrot.lane.b32.xlu0 %v6576_v61, %s4724_s3  ;;  %v3775_v16 = vld [vmem:[#allocation8 + $0x50] sm:$0xff]  ;;  %v3532_v57 = vpop.permute.xlu1 %3531 }
 0x538   :  { %3797 = vrot.lane.b32.xlu1 %v3776_v0, %s4728_s1  ;;  %3673 = vst.msk [vmem:[#allocation9 + $0x70] sm:$0xff] %vm759_vm2, %v3776_v0  ;;  %3672 = vst.msk [vmem:[#allocation9 + $0x68] sm:$0xff] %vm759_vm2, %v3775_v16  ;;  %v3824_v50 = vld [vmem:[#allocation8 + $0x61] sm:$0xff]  ;;  %v3680_v55 = vld [vmem:[#allocation8 + $0x51] sm:$0xff] }
 0x539   :  { %v3729_v61 = vld [vmem:[#allocation8 + $0x62] sm:$0xff]  ;;  %v3728_v12 = vld [vmem:[#allocation8 + $0x52] sm:$0xff] }
 0x53a   :  { %v3485_v6 = vpop.permute.xlu0 %3484  ;;  %v3778_v3 = vld [vmem:[#allocation8 + $0x80] sm:$0xff] }
 0x53b   :  { %3981 = vrot.lane.b32.xlu0 %v3821_v47, %s4726_s29  ;;  %v3580_v29 = vpop.permute.xlu1 %3579  ;;  %v3874_v41 = vld [vmem:[#allocation8 + $0x82] sm:$0xff] }
 0x53c   :  { %3845 = vrot.lane.b32.xlu1 %v3824_v50, %s4723_s23  ;;  %v4060_v58 = vld [vmem:[#allocation9 + $0x8] sm:$0xff] }
 0x53d   :  { %4671 = vmatmul.mubr.msk.f32.vlgmr.msra.gmra.mxu0 %vm1837_vm4, %v4060_v58  ;;  %v6632_v18 = vld [vmem:[#allocation8 + $0x70] sm:$0xff]  ;;  %v3826_v21 = vld [vmem:[#allocation8 + $0x81] sm:$0xff] }
 0x53e   :  { %4673 = vmatprep.mubr.msk.f32.mxu0 %vm1837_vm4, %v4061_v17  ;;  %3674 = vst.msk [vmem:[#allocation9 + $0x78] sm:$0xff] %vm759_vm2, %v6632_v18  ;;  %v3387_v44 = vpop.permute.xlu0 %3386  ;;  %v3682_v20 = vld [vmem:[#allocation8 + $0x71] sm:$0xff] }
 0x53f   :  { %4029 = vrot.lane.b32.xlu0 %v3869_v51, %s4727_s30  ;;  %v3628_v28 = vpop.permute.xlu1 %3627  ;;  %3406 = vst.msk [vmem:[#allocation9 + $0x20] sm:$0xff] %vm950_vm13, %v3387_v44  ;;  %v3730_v4 = vld [vmem:[#allocation8 + $0x72] sm:$0xff] }
 0x540   :  { %3751 = vrot.lane.b32.xlu1 %v3729_v61, %s4722_s22 }
 0x542   :  { %v3435_v47 = vpop.permute.xlu0 %3434 }
 0x543   :  { %3703 = vrot.lane.b32.xlu0 %v3824_v50, %s4725_s0  ;;  %v3293_v43 = vpop.permute.xlu1 %3292  ;;  %3454 = vst.msk [vmem:[#allocation9 + $0x20] sm:$0xff] %vm999_vm14, %v3435_v47 }
 0x544   :  { %3939 = vrot.lane.b32.xlu1 %v3776_v0, %s4724_s3  ;;  %3311 = vst.msk [vmem:[#allocation9 + $0x28] sm:$0xff] %vm852_vm9, %v3293_v43 }
 0x546   :  { %v3530_v7 = vpop.permute.xlu0 %3529 }
 0x547   :  { %3893 = vrot.lane.b32.xlu0 %v3729_v61, %s4729_s7  ;;  %v3341_v23 = vpop.permute.xlu1 %3340  ;;  %3550 = vst.msk [vmem:[#allocation9 + $0x18] sm:$0xff] %vm1098_vm0, %v3530_v7 }
 0x548   :  { %3987 = vrot.lane.b32.xlu1 %v3824_v50, %s4726_s29  ;;  %3359 = vst.msk [vmem:[#allocation9 + $0x28] sm:$0xff] %vm901_vm10, %v3341_v23 }
 0x549   :  { %3407 = vst.msk [vmem:[#allocation9 + $0x28] sm:$0xff] %vm950_vm13, %v6606_v19 }
 0x54a   :  { %3455 = vst.msk [vmem:[#allocation9 + $0x28] sm:$0xff] %vm999_vm14, %v3437_v5  ;;  %v3578_v14 = vpop.permute.xlu0 %3577 }
 0x54b   :  { %3795 = vrot.lane.b32.xlu0 %v3775_v16, %s4728_s1  ;;  %3503 = vst.msk [vmem:[#allocation9 + $0x28] sm:$0xff] %vm1048_vm15, %v3485_v6  ;;  %v3483_v51 = vpop.permute.xlu1 %3482 }
 0x54c   :  { %4035 = vrot.lane.b32.xlu1 %v3729_v61, %s4727_s30  ;;  %3502 = vst.msk [vmem:[#allocation9 + $0x20] sm:$0xff] %vm1048_vm15, %v3483_v51 }
 0x54d   :  { %3598 = vst.msk [vmem:[#allocation9 + $0x18] sm:$0xff] %vm1147_vm1, %v3578_v14 }
 0x54e   :  { %3551 = vst.msk [vmem:[#allocation9 + $0x20] sm:$0xff] %vm1098_vm0, %v3532_v57  ;;  %v3393_v37 = vpop.permute.xlu0 %3392 }
 0x54f   :  { %3843 = vrot.lane.b32.xlu0 %v3680_v55, %s4723_s23  ;;  %3599 = vst.msk [vmem:[#allocation9 + $0x20] sm:$0xff] %vm1147_vm1, %v3580_v29  ;;  %v3536_v26 = vpop.permute.xlu1 %3535 }
 0x550   :  { %3701 = vrot.lane.b32.xlu1 %v3680_v55, %s4725_s0  ;;  %3647 = vst.msk [vmem:[#allocation9 + $0x20] sm:$0xff] %vm1196_vm3, %v3628_v28 }
 0x552   :  { %v3441_v30 = vpop.permute.xlu0 %3440 }
 0x553   :  { %3891 = vrot.lane.b32.xlu0 %v3728_v12, %s4729_s7  ;;  %v3584_v13 = vpop.permute.xlu1 %3583 }
 0x554   :  { %3749 = vrot.lane.b32.xlu1 %v3728_v12, %s4722_s22 }
 0x556   :  { %v3489_v33 = vpop.permute.xlu0 %3488 }
 0x557   :  { %3801 = vrot.lane.b32.xlu0 %v3778_v3, %s4728_s1  ;;  %v4063_v19 = vld [vmem:[#allocation9 + $0x20] sm:$0xff]  ;;  %v3632_v40 = vpop.permute.xlu1 %3631 }
 0x558   :  { %3937 = vrot.lane.b32.xlu1 %v3775_v16, %s4724_s3  ;;  %4676 = vmatprep.mubr.msk.f32.mxu1 %vm1837_vm4, %v4063_v19 }
 0x55a   :  { %v3297_v8 = vpop.permute.xlu0 %3296 }
 0x55b   :  { %3897 = vrot.lane.b32.xlu0 %v3874_v41, %s4729_s7  ;;  %v3391_v25 = vpop.permute.xlu1 %3390  ;;  %3313 = vst.msk [vmem:[#allocation9 + $0x38] sm:$0xff] %vm852_vm9, %v3297_v8 }
 0x55c   :  { %3985 = vrot.lane.b32.xlu1 %v3680_v55, %s4726_s29  ;;  %3408 = vst.msk [vmem:[#allocation9 + $0x30] sm:$0xff] %vm950_vm13, %v3391_v25 }
 0x55e   :  { %v3345_v35 = vpop.permute.xlu0 %3344 }
 0x55f   :  { %3705 = vrot.lane.b32.xlu0 %v3682_v20, %s4725_s0  ;;  %v3439_v24 = vpop.permute.xlu1 %3438  ;;  %3361 = vst.msk [vmem:[#allocation9 + $0x38] sm:$0xff] %vm901_vm10, %v3345_v35 }
 0x560   :  { %4033 = vrot.lane.b32.xlu1 %v3728_v12, %s4727_s30  ;;  %3456 = vst.msk [vmem:[#allocation9 + $0x30] sm:$0xff] %vm999_vm14, %v3439_v24 }
 0x561   :  { %3409 = vst.msk [vmem:[#allocation9 + $0x38] sm:$0xff] %vm950_vm13, %v3393_v37 }
 0x562   :  { %3457 = vst.msk [vmem:[#allocation9 + $0x38] sm:$0xff] %vm999_vm14, %v3441_v30  ;;  %v3534_v32 = vpop.permute.xlu0 %3533 }
 0x563   :  { %3753 = vrot.lane.b32.xlu0 %v3730_v4, %s4722_s22  ;;  %3505 = vst.msk [vmem:[#allocation9 + $0x38] sm:$0xff] %vm1048_vm15, %v3489_v33  ;;  %v3487_v38 = vpop.permute.xlu1 %3486 }
 0x564   :  { %3849 = vrot.lane.b32.xlu1 %v3826_v21, %s4723_s23  ;;  %3554 = vst.msk [vmem:[#allocation9 + $0x38] sm:$0xff] %vm1098_vm0, %v6379_v56  ;;  %3552 = vst.msk [vmem:[#allocation9 + $0x28] sm:$0xff] %vm1098_vm0, %v3534_v32 }
 0x565   :  { %3504 = vst.msk [vmem:[#allocation9 + $0x30] sm:$0xff] %vm1048_vm15, %v3487_v38 }
 0x566   :  { %3602 = vst.msk [vmem:[#allocation9 + $0x38] sm:$0xff] %vm1147_vm1, %v6383_v63  ;;  %v3582_v60 = vpop.permute.xlu0 %3581 }
 0x567   :  { %3941 = vrot.lane.b32.xlu0 %v6632_v18, %s4724_s3  ;;  %3553 = vst.msk [vmem:[#allocation9 + $0x30] sm:$0xff] %vm1098_vm0, %v3536_v26  ;;  %v3696_v56 = vpop.permute.xlu1 %3695 }
 0x568   :  { %3943 = vrot.lane.b32.xlu1 %v3778_v3, %s4724_s3  ;;  %3650 = vst.msk [vmem:[#allocation9 + $0x38] sm:$0xff] %vm1196_vm3, %v6398_v49 }
 0x569   :  { %3601 = vst.msk [vmem:[#allocation9 + $0x30] sm:$0xff] %vm1147_vm1, %v3584_v13  ;;  %3600 = vst.msk [vmem:[#allocation9 + $0x28] sm:$0xff] %vm1147_vm1, %v3582_v60 }
 0x56a   :  { %3649 = vst.msk [vmem:[#allocation9 + $0x30] sm:$0xff] %vm1196_vm3, %v3632_v40  ;;  %v3630_v15 = vpop.permute.xlu0 %3629 }
 0x56b   :  { %3717 = vst.msk [vmem:[#allocation9 + $0x50] sm:$0xff] %vm852_vm9, %v3696_v56  ;;  %3989 = vrot.lane.b32.xlu0 %v3682_v20, %s4726_s29  ;;  %v3744_v63 = vpop.permute.xlu1 %3743 }
 0x56c   :  { %3991 = vrot.lane.b32.xlu1 %v3826_v21, %s4726_s29  ;;  %3765 = vst.msk [vmem:[#allocation9 + $0x50] sm:$0xff] %vm901_vm10, %v3744_v63 }
 0x56d   :  { %3648 = vst.msk [vmem:[#allocation9 + $0x28] sm:$0xff] %vm1196_vm3, %v3630_v15 }
 0x56e   :  { %v3790_v52 = vpop.permute.xlu0 %3789 }
 0x56f   :  { %3895 = vrot.lane.b32.xlu0 %v3730_v4, %s4729_s7  ;;  %v3932_v49 = vpop.permute.xlu1 %3931  ;;  %v4066_v6 = vld [vmem:[#allocation9 + $0x38] sm:$0xff] }
 0x570   :  { %4039 = vrot.lane.b32.xlu1 %v3874_v41, %s4727_s30 }
 0x571   :  { %v4065_v5 = vld [vmem:[#allocation9 + $0x30] sm:$0xff] }
 0x572   :  { %v3838_v16 = vpop.permute.xlu0 %3837 }
 0x573   :  { %3625 = vrot.lane.b32.xlu0 %v6505_v46, %s4727_s30  ;;  %v3980_v0 = vpop.permute.xlu1 %3979  ;;  %v4018_v46 = vld [vmem:[#allocation8 + $0x92] sm:$0xff] }
 0x574   :  { %3799 = vrot.lane.b32.xlu1 %v6632_v18, %s4728_s1  ;;  %v4064_v57 = vld [vmem:[#allocation9 + $0x28] sm:$0xff] }
 0x575   :  { %4677 = vmatmul.mubr.msk.f32.vlgmr.msra.gmra.mxu1 %vm1837_vm4, %v4064_v57 }
 0x576   :  { %4679 = vmatprep.mubr.msk.f32.mxu1 %vm1837_vm4, %v4065_v5  ;;  %v3886_v29 = vpop.permute.xlu0 %3885 }
 0x577   :  { %v4028_v50 = vpop.permute.xlu1 %4027 }
 0x578   :  { %3847 = vrot.lane.b32.xlu1 %v3682_v20, %s4723_s23 }
 0x579   :  { %4680 = vmatmul.mubr.msk.f32.gmra.mxu1 %vm1837_vm4, %v4066_v6 }
 0x57a   :  { %v3694_v61 = vpop.permute.xlu0 %3693 }
 0x57b   :  { %v3788_v58 = vpop.permute.xlu1 %3787  ;;  %3716 = vst.msk [vmem:[#allocation9 + $0x48] sm:$0xff] %vm852_vm9, %v3694_v61 }
 0x57c   :  { %4037 = vrot.lane.b32.xlu1 %v3730_v4, %s4727_s30  ;;  %3811 = vst.msk [vmem:[#allocation9 + $0x40] sm:$0xff] %vm950_vm13, %v3788_v58 }
 0x57e   :  { %v3742_v18 = vpop.permute.xlu0 %3741 }
 0x57f   :  { %v3836_v17 = vpop.permute.xlu1 %3835  ;;  %3764 = vst.msk [vmem:[#allocation9 + $0x48] sm:$0xff] %vm901_vm10, %v3742_v18 }
 0x580   :  { %4041 = vrot.lane.b32.xlu1 %v4018_v46, %s4727_s30  ;;  %3859 = vst.msk [vmem:[#allocation9 + $0x40] sm:$0xff] %vm999_vm14, %v3836_v17 }
 0x581   :  { %3812 = vst.msk [vmem:[#allocation9 + $0x48] sm:$0xff] %vm950_vm13, %v3790_v52 }
 0x582   :  { %3860 = vst.msk [vmem:[#allocation9 + $0x48] sm:$0xff] %vm999_vm14, %v3838_v16 }
 0x583   :  { %v3884_v28 = vpop.permute.xlu1 %3883  ;;  %3908 = vst.msk [vmem:[#allocation9 + $0x48] sm:$0xff] %vm1048_vm15, %v3886_v29 }
 0x584   :  { %3907 = vst.msk [vmem:[#allocation9 + $0x40] sm:$0xff] %vm1048_vm15, %v3884_v28 }
 0x585   :  { %3955 = vst.msk [vmem:[#allocation9 + $0x40] sm:$0xff] %vm1098_vm0, %v3932_v49 }
 0x586   :  { %4003 = vst.msk [vmem:[#allocation9 + $0x40] sm:$0xff] %vm1147_vm1, %v3980_v0 }
 0x587   :  { %4051 = vst.msk [vmem:[#allocation9 + $0x40] sm:$0xff] %vm1196_vm3, %v4028_v50 }
 0x588   :  { %v3700_v43 = vpop.permute.xlu1 %3699 }
 0x589   :  { %v3794_v44 = vpop.permute.xlu0 %3793  ;;  %3719 = vst.msk [vmem:[#allocation9 + $0x60] sm:$0xff] %vm852_vm9, %v3700_v43 }
 0x58c   :  { %v3890_v23 = vpop.permute.xlu1 %3889 }
 0x58d   :  { %v3842_v47 = vpop.permute.xlu0 %3841 }
 0x58e   :  { %v4067_v7 = vld [vmem:[#allocation9 + $0x40] sm:$0xff] }
 0x58f   :  { %4682 = vmatprep.mubr.msk.f32.mxu1 %vm1837_vm4, %v4067_v7 }
 0x590   :  { %v3792_v14 = vpop.permute.xlu1 %3791 }
 0x591   :  { %v3748_v51 = vpop.permute.xlu0 %3747  ;;  %3813 = vst.msk [vmem:[#allocation9 + $0x50] sm:$0xff] %vm950_vm13, %v3792_v14 }
 0x592   :  { %3767 = vst.msk [vmem:[#allocation9 + $0x60] sm:$0xff] %vm901_vm10, %v3748_v51 }
 0x594   :  { %v3840_v26 = vpop.permute.xlu1 %3839 }
 0x595   :  { %v3936_v55 = vpop.permute.xlu0 %3935  ;;  %3861 = vst.msk [vmem:[#allocation9 + $0x50] sm:$0xff] %vm999_vm14, %v3840_v26 }
 0x598   :  { %v3888_v12 = vpop.permute.xlu1 %3887 }
 0x599   :  { %v3984_v37 = vpop.permute.xlu0 %3983  ;;  %3909 = vst.msk [vmem:[#allocation9 + $0x50] sm:$0xff] %vm1048_vm15, %v3888_v12 }
 0x59a   :  { %3957 = vst.msk [vmem:[#allocation9 + $0x50] sm:$0xff] %vm1098_vm0, %v3936_v55 }
 0x59b   :  { %4005 = vst.msk [vmem:[#allocation9 + $0x50] sm:$0xff] %vm1147_vm1, %v3984_v37 }
 0x59d   :  { %v4032_v3 = vpop.permute.xlu0 %4031 }
 0x59e   :  { %4053 = vst.msk [vmem:[#allocation9 + $0x50] sm:$0xff] %vm1196_vm3, %v4032_v3 }
 0x5a1   :  { %v3698_v13 = vpop.permute.xlu0 %3697 }
 0x5a2   :  { %3718 = vst.msk [vmem:[#allocation9 + $0x58] sm:$0xff] %vm852_vm9, %v3698_v13 }
 0x5a5   :  { %v3746_v30 = vpop.permute.xlu0 %3745  ;;  %v4069_v38 = vld [vmem:[#allocation9 + $0x50] sm:$0xff] }
 0x5a6   :  { %3766 = vst.msk [vmem:[#allocation9 + $0x58] sm:$0xff] %vm901_vm10, %v3746_v30 }
 0x5a7   :  { %3814 = vst.msk [vmem:[#allocation9 + $0x58] sm:$0xff] %vm950_vm13, %v3794_v44 }
 0x5a8   :  { %3862 = vst.msk [vmem:[#allocation9 + $0x58] sm:$0xff] %vm999_vm14, %v3842_v47 }
 0x5a9   :  { %3910 = vst.msk [vmem:[#allocation9 + $0x58] sm:$0xff] %vm1048_vm15, %v3890_v23  ;;  %v3934_v41 = vpop.permute.xlu0 %3933 }
 0x5aa   :  { %v3798_v19 = vpop.permute.xlu1 %3797  ;;  %3956 = vst.msk [vmem:[#allocation9 + $0x48] sm:$0xff] %vm1098_vm0, %v3934_v41 }
 0x5ad   :  { %v3982_v40 = vpop.permute.xlu0 %3981 }
 0x5ae   :  { %v3846_v33 = vpop.permute.xlu1 %3845  ;;  %4004 = vst.msk [vmem:[#allocation9 + $0x48] sm:$0xff] %vm1147_vm1, %v3982_v40 }
 0x5b1   :  { %v4030_v20 = vpop.permute.xlu0 %4029 }
 0x5b2   :  { %v3752_v25 = vpop.permute.xlu1 %3751  ;;  %4052 = vst.msk [vmem:[#allocation9 + $0x48] sm:$0xff] %vm1196_vm3, %v4030_v20 }
 0x5b5   :  { %v3704_v8 = vpop.permute.xlu0 %3703 }
 0x5b6   :  { %v3940_v4 = vpop.permute.xlu1 %3939  ;;  %3721 = vst.msk [vmem:[#allocation9 + $0x70] sm:$0xff] %vm852_vm9, %v3704_v8 }
 0x5b7   :  { %3769 = vst.msk [vmem:[#allocation9 + $0x70] sm:$0xff] %vm901_vm10, %v3752_v25 }
 0x5b9   :  { %v3894_v21 = vpop.permute.xlu0 %3893  ;;  %v4068_v24 = vld [vmem:[#allocation9 + $0x48] sm:$0xff] }
 0x5ba   :  { %v3988_v35 = vpop.permute.xlu1 %3987  ;;  %4683 = vmatmul.mubr.msk.f32.gmra.mxu1 %vm1837_vm4, %v4068_v24 }
 0x5bb   :  { %4685 = vmatprep.mubr.msk.f32.mxu1 %vm1837_vm4, %v4069_v38 }
 0x5bd   :  { %v3796_v32 = vpop.permute.xlu0 %3795 }
 0x5be   :  { %v4036_v56 = vpop.permute.xlu1 %4035  ;;  %3815 = vst.msk [vmem:[#allocation9 + $0x60] sm:$0xff] %vm950_vm13, %v3796_v32 }
 0x5c1   :  { %v3844_v60 = vpop.permute.xlu0 %3843 }
 0x5c2   :  { %v3702_v63 = vpop.permute.xlu1 %3701  ;;  %3863 = vst.msk [vmem:[#allocation9 + $0x60] sm:$0xff] %vm999_vm14, %v3844_v60 }
 0x5c3   :  { %3720 = vst.msk [vmem:[#allocation9 + $0x68] sm:$0xff] %vm852_vm9, %v3702_v63 }
 0x5c5   :  { %v3892_v15 = vpop.permute.xlu0 %3891 }
 0x5c6   :  { %v3750_v49 = vpop.permute.xlu1 %3749  ;;  %3911 = vst.msk [vmem:[#allocation9 + $0x60] sm:$0xff] %vm1048_vm15, %v3892_v15 }
 0x5c7   :  { %3768 = vst.msk [vmem:[#allocation9 + $0x68] sm:$0xff] %vm901_vm10, %v3750_v49 }
 0x5c8   :  { %3959 = vst.msk [vmem:[#allocation9 + $0x60] sm:$0xff] %vm1098_vm0, %v3940_v4 }
 0x5c9   :  { %3816 = vst.msk [vmem:[#allocation9 + $0x68] sm:$0xff] %vm950_vm13, %v3798_v19  ;;  %v3802_v52 = vpop.permute.xlu0 %3801 }
 0x5ca   :  { %4007 = vst.msk [vmem:[#allocation9 + $0x60] sm:$0xff] %vm1147_vm1, %v3988_v35  ;;  %v3938_v0 = vpop.permute.xlu1 %3937 }
 0x5cb   :  { %3864 = vst.msk [vmem:[#allocation9 + $0x68] sm:$0xff] %vm999_vm14, %v3846_v33 }
 0x5cc   :  { %4055 = vst.msk [vmem:[#allocation9 + $0x60] sm:$0xff] %vm1196_vm3, %v4036_v56 }
 0x5cd   :  { %3912 = vst.msk [vmem:[#allocation9 + $0x68] sm:$0xff] %vm1048_vm15, %v3894_v21  ;;  %v3898_v16 = vpop.permute.xlu0 %3897 }
 0x5ce   :  { %3958 = vst.msk [vmem:[#allocation9 + $0x58] sm:$0xff] %vm1098_vm0, %v3938_v0  ;;  %v3986_v57 = vpop.permute.xlu1 %3985 }
 0x5cf   :  { %4006 = vst.msk [vmem:[#allocation9 + $0x58] sm:$0xff] %vm1147_vm1, %v3986_v57 }
 0x5d1   :  { %v3706_v5 = vpop.permute.xlu0 %3705 }
 0x5d2   :  { %v4034_v50 = vpop.permute.xlu1 %4033  ;;  %3722 = vst.msk [vmem:[#allocation9 + $0x78] sm:$0xff] %vm852_vm9, %v3706_v5 }
 0x5d3   :  { %4054 = vst.msk [vmem:[#allocation9 + $0x58] sm:$0xff] %vm1196_vm3, %v4034_v50  ;;  %v4071_v17 = vld [vmem:[#allocation9 + $0x60] sm:$0xff] }
 0x5d5   :  { %v3754_v29 = vpop.permute.xlu0 %3753 }
 0x5d6   :  { %v3850_v6 = vpop.permute.xlu1 %3849  ;;  %3770 = vst.msk [vmem:[#allocation9 + $0x78] sm:$0xff] %vm901_vm10, %v3754_v29 }
 0x5d7   :  { %3818 = vst.msk [vmem:[#allocation9 + $0x78] sm:$0xff] %vm950_vm13, %v3802_v52 }
 0x5d8   :  { %3866 = vst.msk [vmem:[#allocation9 + $0x78] sm:$0xff] %vm999_vm14, %v3850_v6 }
 0x5d9   :  { %3914 = vst.msk [vmem:[#allocation9 + $0x78] sm:$0xff] %vm1048_vm15, %v3898_v16  ;;  %v3942_v46 = vpop.permute.xlu0 %3941 }
 0x5da   :  { %v3944_v58 = vpop.permute.xlu1 %3943  ;;  %3962 = vst.msk [vmem:[#allocation9 + $0x78] sm:$0xff] %vm1098_vm0, %v6517_v62  ;;  %3960 = vst.msk [vmem:[#allocation9 + $0x68] sm:$0xff] %vm1098_vm0, %v3942_v46  ;;  %v4070_v61 = vld [vmem:[#allocation9 + $0x58] sm:$0xff] }
 0x5db   :  { %4010 = vst.msk [vmem:[#allocation9 + $0x78] sm:$0xff] %vm1147_vm1, %v6525_v1  ;;  %4686 = vmatmul.mubr.msk.f32.gmra.mxu1 %vm1837_vm4, %v4070_v61 }
 0x5dc   :  { %4688 = vmatprep.mubr.msk.f32.mxu1 %vm1837_vm4, %v4071_v17 }
 0x5dd   :  { %v3990_v18 = vpop.permute.xlu0 %3989 }
 0x5de   :  { %v3992_v28 = vpop.permute.xlu1 %3991  ;;  %4008 = vst.msk [vmem:[#allocation9 + $0x68] sm:$0xff] %vm1147_vm1, %v3990_v18 }
 0x5e1   :  { %v3896_v44 = vpop.permute.xlu0 %3895 }
 0x5e2   :  { %v4040_v43 = vpop.permute.xlu1 %4039 }
 0x5e5   :  { %v3626_v47 = vpop.permute.xlu0 %3625 }
 0x5e6   :  { %v3800_v23 = vpop.permute.xlu1 %3799  ;;  %3646 = vst.msk [vmem:[#allocation9 + $0x18] sm:$0xff] %vm1196_vm3, %v3626_v47 }
 0x5e7   :  { %3817 = vst.msk [vmem:[#allocation9 + $0x70] sm:$0xff] %vm950_vm13, %v3800_v23 }
 0x5ea   :  { %v3848_v62 = vpop.permute.xlu1 %3847 }
 0x5eb   :  { %3865 = vst.msk [vmem:[#allocation9 + $0x70] sm:$0xff] %vm999_vm14, %v3848_v62 }
 0x5ec   :  { %3913 = vst.msk [vmem:[#allocation9 + $0x70] sm:$0xff] %vm1048_vm15, %v3896_v44 }
 0x5ed   :  { %3961 = vst.msk [vmem:[#allocation9 + $0x70] sm:$0xff] %vm1098_vm0, %v3944_v58  ;;  %v4062_v1 = vld [vmem:[#allocation9 + $0x18] sm:$0xff] }
 0x5ee   :  { %4009 = vst.msk [vmem:[#allocation9 + $0x70] sm:$0xff] %vm1147_vm1, %v3992_v28  ;;  %v4038_v7 = vpop.permute.xlu1 %4037  ;;  %4674 = vmatmul.mubr.msk.f32.gmra.mxu0 %vm1837_vm4, %v4062_v1 }
 0x5ef   :  { %4057 = vst.msk [vmem:[#allocation9 + $0x70] sm:$0xff] %vm1196_vm3, %v4040_v43  ;;  %4056 = vst.msk [vmem:[#allocation9 + $0x68] sm:$0xff] %vm1196_vm3, %v4038_v7 }
 0x5f2   :  { %v4042_v51 = vpop.permute.xlu1 %4041 }
 0x5f3   :  { %4058 = vst.msk [vmem:[#allocation9 + $0x78] sm:$0xff] %vm1196_vm3, %v4042_v51 }
 0x5f6   :  { %v4072_v14 = vld [vmem:[#allocation9 + $0x68] sm:$0xff]  ;;  %v4073_v55 = vld [vmem:[#allocation9 + $0x70] sm:$0xff] }
 0x5f7   :  { %4689 = vmatmul.mubr.msk.f32.gmra.mxu1 %vm1837_vm4, %v4072_v14 }
 0x5f8   :  { %4691 = vmatprep.mubr.msk.f32.mxu1 %vm1837_vm4, %v4073_v55 }
 0x5fa   :  { %v4074_v26 = vld [vmem:[#allocation9 + $0x78] sm:$0xff] }
 0x5fb   :  { %4692 = vmatmul.mubr.msk.f32.gmra.mxu1 %vm1837_vm4, %v4074_v26 }
 0x5fd   :  { %v4672_v37 = vpop.f32.mrf.mxu0 }
 0x5fe   :  { %v4204_v12 = vadd.f32 %v4672_v37, %v5925_v59 }
 0x5ff   :  { %v4198_v3 = vpop.f32.mrf.mxu0 }
 0x600   :  { %4278 = vst.msk [vmem:[%s6876_s14 + $0x8] sm:$0xff] %vm759_vm2, %v4204_v12  ;;  %v4199_v13 = vadd.f32 %v4198_v3, %v5935_v36 }
 0x602   :  { %4277 = vst.msk [vmem:[%s6876_s14] sm:$0xff] %vm759_vm2, %v4199_v13 }
 0x635   :  { %v4678_v30 = vpop.f32.mrf.mxu1 }
 0x636   :  { %v4224_v41 = vadd.f32 %v4678_v30, %v5971_v45 }
 0x637   :  { %v4218_v19 = vpop.f32.mrf.mxu1 }
 0x638   :  { %4282 = vst.msk [vmem:[%s6876_s14 + $0x28] sm:$0xff] %vm759_vm2, %v4224_v41  ;;  %v4219_v59 = vadd.f32 %v4218_v19, %v5977_v2 }
 0x639   :  { %v4681_v40 = vpop.f32.mrf.mxu1 }
 0x63a   :  { %4281 = vst.msk [vmem:[%s6876_s14 + $0x20] sm:$0xff] %vm759_vm2, %v4219_v59  ;;  %v4234_v36 = vadd.f32 %v4681_v40, %v6000_v10 }
 0x63b   :  { %v4228_v33 = vpop.f32.mrf.mxu1 }
 0x63c   :  { %4284 = vst.msk [vmem:[%s6876_s14 + $0x38] sm:$0xff] %vm759_vm2, %v4234_v36  ;;  %v4229_v45 = vadd.f32 %v4228_v33, %v6011_v53 }
 0x63e   :  { %4283 = vst.msk [vmem:[%s6876_s14 + $0x30] sm:$0xff] %vm759_vm2, %v4229_v45 }
 0x67a   :  { %v4684_v2 = vpop.f32.mrf.mxu1 }
 0x67b   :  { %v4244_v20 = vadd.f32 %v4684_v2, %v6074_v42 }
 0x67c   :  { %v4238_v25 = vpop.f32.mrf.mxu1 }
 0x67d   :  { %4286 = vst.msk [vmem:[%s6876_s14 + $0x48] sm:$0xff] %vm759_vm2, %v4244_v20  ;;  %v4239_v10 = vadd.f32 %v4238_v25, %v6081_v54 }
 0x67f   :  { %4285 = vst.msk [vmem:[%s6876_s14 + $0x40] sm:$0xff] %vm759_vm2, %v4239_v10 }
 0x69b   :  { %v4687_v53 = vpop.f32.mrf.mxu1 }
 0x69c   :  { %v4254_v8 = vadd.f32 %v4687_v53, %v6114_v11 }
 0x69d   :  { %v4248_v4 = vpop.f32.mrf.mxu1 }
 0x69e   :  { %4288 = vst.msk [vmem:[%s6876_s14 + $0x58] sm:$0xff] %vm759_vm2, %v4254_v8  ;;  %v4249_v42 = vadd.f32 %v4248_v4, %v6121_v48 }
 0x6a0   :  { %4287 = vst.msk [vmem:[%s6876_s14 + $0x50] sm:$0xff] %vm759_vm2, %v4249_v42 }
 0x6ae   :  { %v4675_v54 = vpop.f32.mrf.mxu0 }
 0x6af   :  { %v4214_v21 = vadd.f32 %v4675_v54, %v5954_v22 }
 0x6b0   :  { %v4208_v24 = vpop.f32.mrf.mxu0 }
 0x6b1   :  { %4280 = vst.msk [vmem:[%s6876_s14 + $0x18] sm:$0xff] %vm759_vm2, %v4214_v21  ;;  %v4209_v11 = vadd.f32 %v4208_v24, %v5960_v34 }
 0x6b3   :  { %4279 = vst.msk [vmem:[%s6876_s14 + $0x10] sm:$0xff] %vm759_vm2, %v4209_v11 }
 0x6b7   :  { %v4690_v48 = vpop.f32.mrf.mxu1 }
 0x6b8   :  { %v4264_v35 = vadd.f32 %v4690_v48, %v6143_v39 }
 0x6b9   :  { %v4258_v38 = vpop.f32.mrf.mxu1 }
 0x6ba   :  { %4290 = vst.msk [vmem:[%s6876_s14 + $0x68] sm:$0xff] %vm759_vm2, %v4264_v35  ;;  %v4259_v22 = vadd.f32 %v4258_v38, %v6149_v27 }
 0x6bb   :  { %v4693_v32 = vpop.f32.mrf.mxu1 }
 0x6bc   :  { %4289 = vst.msk [vmem:[%s6876_s14 + $0x60] sm:$0xff] %vm759_vm2, %v4259_v22  ;;  %v4274_v34 = vadd.f32 %v4693_v32, %v6165_v9 }
 0x6bd   :  { %v4268_v56 = vpop.f32.mrf.mxu1 }
 0x6be   :  { %4292 = vst.msk [vmem:[%s6876_s14 + $0x78] sm:$0xff] %vm759_vm2, %v4274_v34  ;;  %v4269_v39 = vadd.f32 %v4268_v56, %v6173_v31 }
 0x6c0   :  { %4291 = vst.msk [vmem:[%s6876_s14 + $0x70] sm:$0xff] %vm759_vm2, %v4269_v39 }

</bundles_post_ra>
